<compile_context>
chip_gen: v5e
topology: v5e:2x2
jax: 0.10.0
libtpu: 0.0.40
codegen_flags: <defaults>
</compile_context>

<pallas_src>
import math

import jax
import jax.numpy as jnp
from jax.experimental import pallas as pl
from jax.experimental.pallas import tpu as pltpu

# ---------------- config (small, consistent with the module's forward) -------------
IMG = 16          # img_size
PATCH = 8         # patch_size
IN_CHANS = 3
EMBED = 32        # embed_dim
DEPTH = 2         # enc_depth
NHEADS = 4        # num_heads
MLP_RATIO = 4
NUM_CLASSES = 10
BATCH = 2
NUM_PATCHES = (IMG // PATCH) * (IMG // PATCH)
TOKENS = NUM_PATCHES + 1
BT = BATCH * TOKENS                      # batched token-slab rows
HEAD_DIM = EMBED // NHEADS
HIDDEN = EMBED * MLP_RATIO
CPP = IN_CHANS * PATCH * PATCH           # im2col row width
NUM_Q = 2                                # len(x_q)
LN_EPS = 1e-6


# ---------------- the single fused Pallas kernel ------------------------------------

def _vit_kernel(pm_ref, tok_ref, pw_ref, mask_ref,
                ln1g_ref, ln1b_ref, wqkv_ref, bqkv_ref, wpr_ref, bpr_ref,
                ln2g_ref, ln2b_ref, w1_ref, b1_ref, w2_ref, b2_ref,
                ng_ref, nb_ref,
                fcw_ref, fcb_ref, frw_ref, frb_ref,
                xq_ref,
                x_out_ref, pred_ref, loss_ref, prq_ref):
    scale = HEAD_DIM ** -0.5
    inv_sqrt2 = 1.0 / math.sqrt(2.0)

    def layernorm(v, g, b):
        mu = jnp.mean(v, axis=-1, keepdims=True)
        vc = v - mu
        var = jnp.mean(vc * vc, axis=-1, keepdims=True)
        return vc * jax.lax.rsqrt(var + LN_EPS) * g + b

    # block-diagonal additive attention mask (each image attends only to itself)
    neg_mask = mask_ref[...]                                            # (BT, BT)

    # patch embedding (im2col matmul == Conv2d(k=p, stride=p)) + cls + pos embed,
    # for the whole batch at once: (B*T, CPP) @ (CPP, D) + (B*T, D)
    x = jnp.dot(pm_ref[...], pw_ref[...],
                preferred_element_type=jnp.float32) + tok_ref[...]      # (BT, D)

    for d in range(DEPTH):
        # --- attention sub-block (pre-LN), fused QKV projection -------------------
        h = layernorm(x, ln1g_ref[d], ln1b_ref[d])
        qkv = jnp.dot(h, wqkv_ref[d],
                      preferred_element_type=jnp.float32) + bqkv_ref[d]  # (BT, 3D)
        heads = []
        for nh in range(NHEADS):
            q = qkv[:, 0 * EMBED + nh * HEAD_DIM: 0 * EMBED + (nh + 1) * HEAD_DIM]
            k = qkv[:, 1 * EMBED + nh * HEAD_DIM: 1 * EMBED + (nh + 1) * HEAD_DIM]
            v = qkv[:, 2 * EMBED + nh * HEAD_DIM: 2 * EMBED + (nh + 1) * HEAD_DIM]
            # scores = q k^T / sqrt(Dh) + block-diag mask (no explicit transpose)
            s = jax.lax.dot_general(q, k, (((1,), (1,)), ((), ())),
                                    preferred_element_type=jnp.float32)
            s = s * scale + neg_mask
            s = s - jnp.max(s, axis=-1, keepdims=True)
            p = jnp.exp(s)
            p = p / jnp.sum(p, axis=-1, keepdims=True)                   # exact softmax
            heads.append(jnp.dot(p, v, preferred_element_type=jnp.float32))
        o = jnp.concatenate(heads, axis=-1)                              # (BT, D)
        x = x + jnp.dot(o, wpr_ref[d],
                        preferred_element_type=jnp.float32) + bpr_ref[d]

        # --- MLP sub-block (pre-LN), exact erf GELU --------------------------------
        h = layernorm(x, ln2g_ref[d], ln2b_ref[d])
        m = jnp.dot(h, w1_ref[d], preferred_element_type=jnp.float32) + b1_ref[d]
        m = 0.5 * m * (1.0 + jax.lax.erf(m * inv_sqrt2))
        x = x + jnp.dot(m, w2_ref[d], preferred_element_type=jnp.float32) + b2_ref[d]

    # ----- final LN only on the cls rows, kept in vregs (no readback) --------------
    cls_rows = jnp.concatenate(
        [x[b * TOKENS:b * TOKENS + 1, :] for b in range(BATCH)], axis=0)  # (B, D)
    x_cls = layernorm(cls_rows, ng_ref[...], nb_ref[...])
    x_out_ref[...] = x_cls

    # ----- classification head -----------------------------------------------------
    pred_ref[...] = jnp.dot(x_cls, fcw_ref[...],
                            preferred_element_type=jnp.float32) + fcb_ref[...]

    # ----- straight-through RQ heads + MSE losses (all quantizers at once) ---------
    xq_all = xq_ref[...]                                                  # (NUM_Q*B, D)
    x_rep = jnp.concatenate([x_cls] * NUM_Q, axis=0)                      # (NUM_Q*B, D)
    xq_st = x_rep + (xq_all - x_rep)        # forward value of x + (x_q - x).detach()
    diff = x_rep - xq_st                    # forward value of x - x_q[i].detach()
    sq = diff * diff
    inv_bd = 1.0 / float(BATCH * EMBED)
    loss_parts = [jnp.sum(sq[i * BATCH:(i + 1) * BATCH, :], keepdims=True) * inv_bd
                  for i in range(NUM_Q)]                                  # each (1, 1)
    loss_ref[...] = jnp.concatenate(loss_parts, axis=1)                   # (1, NUM_Q)
    prq_ref[...] = jnp.dot(xq_st, frw_ref[...],
                           preferred_element_type=jnp.float32) + frb_ref[...]


def _full_spec(shape):
    n = len(shape)
    return pl.BlockSpec(shape, lambda i, _n=n: (0,) * _n)


# ---------------- one-time parameter preparation (hoisted out of the step) ----------

def prepare_params(params):
    """Fold / stack all weights into kernel-ready arrays.  Called ONCE."""
    enc = params["encoder"]
    D = EMBED

    # additive token term: pos_embed everywhere, + cls token at row 0,
    # + conv bias on patch rows; tiled over the batch -> (B*T, D)
    tok = enc["pos_embed"][0]
    tok = tok.at[0].add(enc["cls_token"][0, 0])
    tok = tok.at[1:].add(enc["patch_b"])
    tok_bt = jnp.tile(tok, (BATCH, 1))

    # block-diagonal additive attention mask over the batched token slab
    img_id = jnp.arange(BT, dtype=jnp.int32) // TOKENS
    mask = jnp.where(img_id[:, None] == img_id[None, :], 0.0, -1e30).astype(jnp.float32)

    def stk(fn):
        return jnp.stack([fn(b) for b in enc["blocks"]], axis=0)

    prep = {
        "pm_zero_row": jnp.zeros((BATCH, 1, CPP), jnp.float32),
        "tok": tok_bt,
        "pw": enc["patch_w"],
        "mask": mask,
        "ln1g": stk(lambda b: b["ln1_g"].reshape(1, D)),
        "ln1b": stk(lambda b: b["ln1_b"].reshape(1, D)),
        "wqkv": stk(lambda b: b["qkv_w"]),                        # (DEPTH, D, 3D)
        "bqkv": stk(lambda b: b["qkv_b"].reshape(1, 3 * D)),
        "wpr": stk(lambda b: b["proj_w"]),                        # (DEPTH, D, D)
        "bpr": stk(lambda b: b["proj_b"].reshape(1, D)),
        "ln2g": stk(lambda b: b["ln2_g"].reshape(1, D)),
        "ln2b": stk(lambda b: b["ln2_b"].reshape(1, D)),
        "w1": stk(lambda b: b["fc1_w"]),                          # (DEPTH, D, HID)
        "b1": stk(lambda b: b["fc1_b"].reshape(1, HIDDEN)),
        "w2": stk(lambda b: b["fc2_w"]),                          # (DEPTH, HID, D)
        "b2": stk(lambda b: b["fc2_b"].reshape(1, D)),
        "ng": enc["norm_g"].reshape(1, D),
        "nb": enc["norm_b"].reshape(1, D),
        "fcw": params["fc_w"],
        "fcb": params["fc_b"].reshape(1, NUM_CLASSES),
        "frw": params["fc_rq_w"],
        "frb": params["fc_rq_b"].reshape(1, NUM_CLASSES),
    }
    return jax.tree_util.tree_map(jnp.asarray, prep)


# ---------------- per-step forward (one pallas_call) --------------------------------

@jax.jit
def vitrqfc_forward(prep, src, x_q_list):
    B, C, H, W = src.shape
    p = PATCH

    # im2col for Conv2d(kernel=p, stride=p); prepend a zero row per image (cls slot);
    # flatten the whole batch into one (B*T, CPP) slab.
    patches = src.reshape(B, C, H // p, p, W // p, p)
    patches = patches.transpose(0, 2, 4, 1, 3, 5).reshape(B, NUM_PATCHES, CPP)
    pm = jnp.concatenate([prep["pm_zero_row"], patches], axis=1).reshape(BT, CPP)

    xq = jnp.concatenate(x_q_list, axis=0)                        # (NUM_Q*B, D)

    args = (pm, prep["tok"], prep["pw"], prep["mask"],
            prep["ln1g"], prep["ln1b"], prep["wqkv"], prep["bqkv"],
            prep["wpr"], prep["bpr"], prep["ln2g"], prep["ln2b"],
            prep["w1"], prep["b1"], prep["w2"], prep["b2"],
            prep["ng"], prep["nb"], prep["fcw"], prep["fcb"],
            prep["frw"], prep["frb"], xq)

    x, pred, loss, prq = pl.pallas_call(
        _vit_kernel,
        grid=(1,),
        out_shape=(
            jax.ShapeDtypeStruct((BATCH, EMBED), jnp.float32),
            jax.ShapeDtypeStruct((BATCH, NUM_CLASSES), jnp.float32),
            jax.ShapeDtypeStruct((1, NUM_Q), jnp.float32),
            jax.ShapeDtypeStruct((NUM_Q * BATCH, NUM_CLASSES), jnp.float32),
        ),
        in_specs=[_full_spec(a.shape) for a in args],
        out_specs=(
            _full_spec((BATCH, EMBED)),
            _full_spec((BATCH, NUM_CLASSES)),
            _full_spec((1, NUM_Q)),
            _full_spec((NUM_Q * BATCH, NUM_CLASSES)),
        ),
        compiler_params=pltpu.CompilerParams(dimension_semantics=("arbitrary",)),
    )(*args)

    loss_quant = [loss[0, i] for i in range(NUM_Q)]
    prq = prq.reshape(NUM_Q, BATCH, NUM_CLASSES)
    pred_rq_list = [prq[i] for i in range(NUM_Q)]
    return x, loss_quant, pred, pred_rq_list


# ---------------- parameter init (deterministic, xavier_uniform like _reset_parameters) ---

def _xavier(key, shape, fan_in, fan_out):
    bound = math.sqrt(6.0 / (fan_in + fan_out))
    return jax.random.uniform(key, shape, jnp.float32, -bound, bound)


def init_params(key):
    keys = iter(jax.random.split(key, 64))
    p = PATCH
    enc = {
        # conv weight (D, C, p, p) stored flattened/transposed as (C*p*p, D)
        "patch_w": _xavier(next(keys), (CPP, EMBED), CPP, EMBED * p * p),
        "patch_b": jnp.zeros((EMBED,), jnp.float32),
        "cls_token": _xavier(next(keys), (1, 1, EMBED), EMBED, EMBED),
        "pos_embed": _xavier(next(keys), (1, TOKENS, EMBED), TOKENS * EMBED, EMBED),
        "norm_g": jnp.ones((EMBED,), jnp.float32),
        "norm_b": jnp.zeros((EMBED,), jnp.float32),
        "blocks": [],
    }
    for _ in range(DEPTH):
        enc["blocks"].append({
            "ln1_g": jnp.ones((EMBED,), jnp.float32),
            "ln1_b": jnp.zeros((EMBED,), jnp.float32),
            "qkv_w": _xavier(next(keys), (EMBED, 3 * EMBED), EMBED, 3 * EMBED),
            "qkv_b": jnp.zeros((3 * EMBED,), jnp.float32),   # qkv_bias=True
            "proj_w": _xavier(next(keys), (EMBED, EMBED), EMBED, EMBED),
            "proj_b": jnp.zeros((EMBED,), jnp.float32),
            "ln2_g": jnp.ones((EMBED,), jnp.float32),
            "ln2_b": jnp.zeros((EMBED,), jnp.float32),
            "fc1_w": _xavier(next(keys), (EMBED, HIDDEN), EMBED, HIDDEN),
            "fc1_b": jnp.zeros((HIDDEN,), jnp.float32),
            "fc2_w": _xavier(next(keys), (HIDDEN, EMBED), HIDDEN, EMBED),
            "fc2_b": jnp.zeros((EMBED,), jnp.float32),
        })
    params = {
        "encoder": enc,
        "fc_w": _xavier(next(keys), (EMBED, NUM_CLASSES), EMBED, NUM_CLASSES),
        "fc_b": jnp.zeros((NUM_CLASSES,), jnp.float32),
        "fc_rq_w": _xavier(next(keys), (EMBED, NUM_CLASSES), EMBED, NUM_CLASSES),
        "fc_rq_b": jnp.zeros((NUM_CLASSES,), jnp.float32),
    }
    return params


# ---------------- main --------------------------------------------------------------

if __name__ == "__main__":
    key = jax.random.PRNGKey(0)
    k_param, k_src, k_q = jax.random.split(key, 3)

    params = init_params(k_param)
    prep = prepare_params(params)          # one-time packing, outside the step

    src = jax.random.normal(k_src, (BATCH, IN_CHANS, IMG, IMG), jnp.float32)   # NCHW
    x_q = [jax.random.normal(jax.random.fold_in(k_q, i), (BATCH, EMBED), jnp.float32)
           for i in range(NUM_Q)]

    x, loss_quant, pred, pred_rq = vitrqfc_forward(prep, src, x_q)
    jax.block_until_ready((x, loss_quant, pred, pred_rq))

    assert x.shape == (BATCH, EMBED)
    assert pred.shape == (BATCH, NUM_CLASSES)
    assert len(loss_quant) == NUM_Q and len(pred_rq) == NUM_Q
    assert all(p.shape == (BATCH, NUM_CLASSES) for p in pred_rq)
    assert bool(jnp.isfinite(x).all()) and bool(jnp.isfinite(pred).all())
    assert all(bool(jnp.isfinite(l)) for l in loss_quant)
    assert all(bool(jnp.isfinite(p).all()) for p in pred_rq)
    print("KERNEL_OK")
</pallas_src>

<mosaic_0001>
module attributes {stable_mosaic.version = 11 : i64} {
  func.func @_vit_kernel(%arg0: i32, %arg1: memref<10x192xf32, #tpu.memory_space<vmem>>, %arg2: memref<10x32xf32, #tpu.memory_space<vmem>>, %arg3: memref<192x32xf32, #tpu.memory_space<vmem>>, %arg4: memref<10x10xf32, #tpu.memory_space<vmem>>, %arg5: memref<2x1x32xf32, #tpu.memory_space<vmem>>, %arg6: memref<2x1x32xf32, #tpu.memory_space<vmem>>, %arg7: memref<2x32x96xf32, #tpu.memory_space<vmem>>, %arg8: memref<2x1x96xf32, #tpu.memory_space<vmem>>, %arg9: memref<2x32x32xf32, #tpu.memory_space<vmem>>, %arg10: memref<2x1x32xf32, #tpu.memory_space<vmem>>, %arg11: memref<2x1x32xf32, #tpu.memory_space<vmem>>, %arg12: memref<2x1x32xf32, #tpu.memory_space<vmem>>, %arg13: memref<2x32x128xf32, #tpu.memory_space<vmem>>, %arg14: memref<2x1x128xf32, #tpu.memory_space<vmem>>, %arg15: memref<2x128x32xf32, #tpu.memory_space<vmem>>, %arg16: memref<2x1x32xf32, #tpu.memory_space<vmem>>, %arg17: memref<1x32xf32, #tpu.memory_space<vmem>>, %arg18: memref<1x32xf32, #tpu.memory_space<vmem>>, %arg19: memref<32x10xf32, #tpu.memory_space<vmem>>, %arg20: memref<1x10xf32, #tpu.memory_space<vmem>>, %arg21: memref<32x10xf32, #tpu.memory_space<vmem>>, %arg22: memref<1x10xf32, #tpu.memory_space<vmem>>, %arg23: memref<4x32xf32, #tpu.memory_space<vmem>>, %arg24: memref<2x32xf32, #tpu.memory_space<vmem>>, %arg25: memref<2x10xf32, #tpu.memory_space<vmem>>, %arg26: memref<1x2xf32, #tpu.memory_space<vmem>>, %arg27: memref<4x10xf32, #tpu.memory_space<vmem>>) attributes {dimension_semantics = [#tpu.dimension_semantics<arbitrary>], iteration_bounds = array<i64: 1>, scalar_prefetch = 0 : i64, scratch_operands = 0 : i64, tpu.core_type = #tpu.core_type<tc>, window_params = [{pipeline_mode = #tpu.pipeline_mode<synchronous>, transform_indices = @transform_0, window_bounds = array<i64: 10, 192>}, {pipeline_mode = #tpu.pipeline_mode<synchronous>, transform_indices = @transform_1, window_bounds = array<i64: 10, 32>}, {pipeline_mode = #tpu.pipeline_mode<synchronous>, transform_indices = @transform_2, window_bounds = array<i64: 192, 32>}, {pipeline_mode = #tpu.pipeline_mode<synchronous>, transform_indices = @transform_3, window_bounds = array<i64: 10, 10>}, {pipeline_mode = #tpu.pipeline_mode<synchronous>, transform_indices = @transform_4, window_bounds = array<i64: 2, 1, 32>}, {pipeline_mode = #tpu.pipeline_mode<synchronous>, transform_indices = @transform_5, window_bounds = array<i64: 2, 1, 32>}, {pipeline_mode = #tpu.pipeline_mode<synchronous>, transform_indices = @transform_6, window_bounds = array<i64: 2, 32, 96>}, {pipeline_mode = #tpu.pipeline_mode<synchronous>, transform_indices = @transform_7, window_bounds = array<i64: 2, 1, 96>}, {pipeline_mode = #tpu.pipeline_mode<synchronous>, transform_indices = @transform_8, window_bounds = array<i64: 2, 32, 32>}, {pipeline_mode = #tpu.pipeline_mode<synchronous>, transform_indices = @transform_9, window_bounds = array<i64: 2, 1, 32>}, {pipeline_mode = #tpu.pipeline_mode<synchronous>, transform_indices = @transform_10, window_bounds = array<i64: 2, 1, 32>}, {pipeline_mode = #tpu.pipeline_mode<synchronous>, transform_indices = @transform_11, window_bounds = array<i64: 2, 1, 32>}, {pipeline_mode = #tpu.pipeline_mode<synchronous>, transform_indices = @transform_12, window_bounds = array<i64: 2, 32, 128>}, {pipeline_mode = #tpu.pipeline_mode<synchronous>, transform_indices = @transform_13, window_bounds = array<i64: 2, 1, 128>}, {pipeline_mode = #tpu.pipeline_mode<synchronous>, transform_indices = @transform_14, window_bounds = array<i64: 2, 128, 32>}, {pipeline_mode = #tpu.pipeline_mode<synchronous>, transform_indices = @transform_15, window_bounds = array<i64: 2, 1, 32>}, {pipeline_mode = #tpu.pipeline_mode<synchronous>, transform_indices = @transform_16, window_bounds = array<i64: 1, 32>}, {pipeline_mode = #tpu.pipeline_mode<synchronous>, transform_indices = @transform_17, window_bounds = array<i64: 1, 32>}, {pipeline_mode = #tpu.pipeline_mode<synchronous>, transform_indices = @transform_18, window_bounds = array<i64: 32, 10>}, {pipeline_mode = #tpu.pipeline_mode<synchronous>, transform_indices = @transform_19, window_bounds = array<i64: 1, 10>}, {pipeline_mode = #tpu.pipeline_mode<synchronous>, transform_indices = @transform_20, window_bounds = array<i64: 32, 10>}, {pipeline_mode = #tpu.pipeline_mode<synchronous>, transform_indices = @transform_21, window_bounds = array<i64: 1, 10>}, {pipeline_mode = #tpu.pipeline_mode<synchronous>, transform_indices = @transform_22, window_bounds = array<i64: 4, 32>}, {pipeline_mode = #tpu.pipeline_mode<synchronous>, transform_indices = @transform_23, window_bounds = array<i64: 2, 32>}, {pipeline_mode = #tpu.pipeline_mode<synchronous>, transform_indices = @transform_24, window_bounds = array<i64: 2, 10>}, {pipeline_mode = #tpu.pipeline_mode<synchronous>, transform_indices = @transform_25, window_bounds = array<i64: 1, 2>}, {pipeline_mode = #tpu.pipeline_mode<synchronous>, transform_indices = @transform_26, window_bounds = array<i64: 4, 10>}]} {
    %c0 = arith.constant 0 : index
    %c0_0 = arith.constant 0 : index
    %0 = vector.load %arg4[%c0, %c0_0] : memref<10x10xf32, #tpu.memory_space<vmem>>, vector<10x10xf32>
    %c0_1 = arith.constant 0 : index
    %c0_2 = arith.constant 0 : index
    %1 = vector.load %arg1[%c0_1, %c0_2] : memref<10x192xf32, #tpu.memory_space<vmem>>, vector<10x192xf32>
    %c0_3 = arith.constant 0 : index
    %c0_4 = arith.constant 0 : index
    %2 = vector.load %arg3[%c0_3, %c0_4] : memref<192x32xf32, #tpu.memory_space<vmem>>, vector<192x32xf32>
    %cst = arith.constant dense<0.000000e+00> : vector<10x32xf32>
    %3 = tpu.matmul %1, %2, %cst {dimension_numbers = #tpu.dot_dimension_numbers<[1], [0], [0], [1], [0, 0, 1, 1], [], []>} : vector<10x192xf32>, vector<192x32xf32>, vector<10x32xf32> -> vector<10x32xf32>
    %c0_5 = arith.constant 0 : index
    %c0_6 = arith.constant 0 : index
    %4 = vector.load %arg2[%c0_5, %c0_6] : memref<10x32xf32, #tpu.memory_space<vmem>>, vector<10x32xf32>
    %5 = arith.addf %3, %4 : vector<10x32xf32>
    %c0_7 = arith.constant 0 : index
    %c0_8 = arith.constant 0 : index
    %c0_9 = arith.constant 0 : index
    %6 = vector.load %arg5[%c0_7, %c0_8, %c0_9] : memref<2x1x32xf32, #tpu.memory_space<vmem>>, vector<1x1x32xf32>
    %7 = vector.shape_cast %6 : vector<1x1x32xf32> to vector<1x32xf32>
    %c0_10 = arith.constant 0 : index
    %c0_11 = arith.constant 0 : index
    %c0_12 = arith.constant 0 : index
    %8 = vector.load %arg6[%c0_10, %c0_11, %c0_12] : memref<2x1x32xf32, #tpu.memory_space<vmem>>, vector<1x1x32xf32>
    %9 = vector.shape_cast %8 : vector<1x1x32xf32> to vector<1x32xf32>
    %cst_13 = arith.constant dense<0.000000e+00> : vector<10xf32>
    %10 = vector.multi_reduction <add>, %5, %cst_13 [1] : vector<10x32xf32> to vector<10xf32>
    %11 = vector.shape_cast %10 : vector<10xf32> to vector<10x1xf32>
    %cst_14 = arith.constant 3.200000e+01 : f32
    %12 = vector.broadcast %cst_14 : f32 to vector<10x1xf32>
    %13 = arith.divf %11, %12 : vector<10x1xf32>
    %14 = vector.broadcast %13 : vector<10x1xf32> to vector<10x32xf32>
    %15 = arith.subf %5, %14 : vector<10x32xf32>
    %16 = arith.mulf %15, %15 : vector<10x32xf32>
    %cst_15 = arith.constant dense<0.000000e+00> : vector<10xf32>
    %17 = vector.multi_reduction <add>, %16, %cst_15 [1] : vector<10x32xf32> to vector<10xf32>
    %18 = vector.shape_cast %17 : vector<10xf32> to vector<10x1xf32>
    %cst_16 = arith.constant 3.200000e+01 : f32
    %19 = vector.broadcast %cst_16 : f32 to vector<10x1xf32>
    %20 = arith.divf %18, %19 : vector<10x1xf32>
    %cst_17 = arith.constant 9.99999997E-7 : f32
    %21 = vector.broadcast %cst_17 : f32 to vector<10x1xf32>
    %22 = arith.addf %20, %21 : vector<10x1xf32>
    %23 = math.rsqrt %22 : vector<10x1xf32>
    %24 = vector.broadcast %23 : vector<10x1xf32> to vector<10x32xf32>
    %25 = arith.mulf %15, %24 : vector<10x32xf32>
    %26 = vector.broadcast %7 : vector<1x32xf32> to vector<10x32xf32>
    %27 = arith.mulf %25, %26 : vector<10x32xf32>
    %28 = vector.broadcast %9 : vector<1x32xf32> to vector<10x32xf32>
    %29 = arith.addf %27, %28 : vector<10x32xf32>
    %c0_18 = arith.constant 0 : index
    %c0_19 = arith.constant 0 : index
    %c0_20 = arith.constant 0 : index
    %30 = vector.load %arg7[%c0_18, %c0_19, %c0_20] : memref<2x32x96xf32, #tpu.memory_space<vmem>>, vector<1x32x96xf32>
    %31 = vector.shape_cast %30 : vector<1x32x96xf32> to vector<32x96xf32>
    %cst_21 = arith.constant dense<0.000000e+00> : vector<10x96xf32>
    %32 = tpu.matmul %29, %31, %cst_21 {dimension_numbers = #tpu.dot_dimension_numbers<[1], [0], [0], [1], [0, 0, 1, 1], [], []>} : vector<10x32xf32>, vector<32x96xf32>, vector<10x96xf32> -> vector<10x96xf32>
    %c0_22 = arith.constant 0 : index
    %c0_23 = arith.constant 0 : index
    %c0_24 = arith.constant 0 : index
    %33 = vector.load %arg8[%c0_22, %c0_23, %c0_24] : memref<2x1x96xf32, #tpu.memory_space<vmem>>, vector<1x1x96xf32>
    %34 = vector.shape_cast %33 : vector<1x1x96xf32> to vector<1x96xf32>
    %35 = vector.broadcast %34 : vector<1x96xf32> to vector<10x96xf32>
    %36 = arith.addf %32, %35 : vector<10x96xf32>
    %37 = vector.extract_strided_slice %36 {offsets = [0, 0], sizes = [10, 8], strides = [1, 1]} : vector<10x96xf32> to vector<10x8xf32>
    %38 = vector.extract_strided_slice %36 {offsets = [0, 32], sizes = [10, 8], strides = [1, 1]} : vector<10x96xf32> to vector<10x8xf32>
    %39 = vector.extract_strided_slice %36 {offsets = [0, 64], sizes = [10, 8], strides = [1, 1]} : vector<10x96xf32> to vector<10x8xf32>
    %cst_25 = arith.constant dense<0.000000e+00> : vector<10x10xf32>
    %40 = tpu.matmul %37, %38, %cst_25 {dimension_numbers = #tpu.dot_dimension_numbers<[1], [1], [0], [0], [0, 0, 1, 0], [], []>} : vector<10x8xf32>, vector<10x8xf32>, vector<10x10xf32> -> vector<10x10xf32>
    %cst_26 = arith.constant 0.353553385 : f32
    %41 = vector.broadcast %cst_26 : f32 to vector<10x10xf32>
    %42 = arith.mulf %40, %41 : vector<10x10xf32>
    %43 = arith.addf %42, %0 : vector<10x10xf32>
    %cst_27 = arith.constant dense<0xFF800000> : vector<10xf32>
    %44 = vector.multi_reduction <maximumf>, %43, %cst_27 [1] : vector<10x10xf32> to vector<10xf32>
    %45 = vector.shape_cast %44 : vector<10xf32> to vector<10x1xf32>
    %46 = vector.broadcast %45 : vector<10x1xf32> to vector<10x10xf32>
    %47 = arith.subf %43, %46 : vector<10x10xf32>
    %48 = math.exp %47 : vector<10x10xf32>
    %cst_28 = arith.constant dense<0.000000e+00> : vector<10xf32>
    %49 = vector.multi_reduction <add>, %48, %cst_28 [1] : vector<10x10xf32> to vector<10xf32>
    %50 = vector.shape_cast %49 : vector<10xf32> to vector<10x1xf32>
    %51 = vector.broadcast %50 : vector<10x1xf32> to vector<10x10xf32>
    %52 = arith.divf %48, %51 : vector<10x10xf32>
    %cst_29 = arith.constant dense<0.000000e+00> : vector<10x8xf32>
    %53 = tpu.matmul %52, %39, %cst_29 {dimension_numbers = #tpu.dot_dimension_numbers<[1], [0], [0], [1], [0, 0, 1, 1], [], []>} : vector<10x10xf32>, vector<10x8xf32>, vector<10x8xf32> -> vector<10x8xf32>
    %54 = vector.extract_strided_slice %36 {offsets = [0, 8], sizes = [10, 8], strides = [1, 1]} : vector<10x96xf32> to vector<10x8xf32>
    %55 = vector.extract_strided_slice %36 {offsets = [0, 40], sizes = [10, 8], strides = [1, 1]} : vector<10x96xf32> to vector<10x8xf32>
    %56 = vector.extract_strided_slice %36 {offsets = [0, 72], sizes = [10, 8], strides = [1, 1]} : vector<10x96xf32> to vector<10x8xf32>
    %cst_30 = arith.constant dense<0.000000e+00> : vector<10x10xf32>
    %57 = tpu.matmul %54, %55, %cst_30 {dimension_numbers = #tpu.dot_dimension_numbers<[1], [1], [0], [0], [0, 0, 1, 0], [], []>} : vector<10x8xf32>, vector<10x8xf32>, vector<10x10xf32> -> vector<10x10xf32>
    %cst_31 = arith.constant 0.353553385 : f32
    %58 = vector.broadcast %cst_31 : f32 to vector<10x10xf32>
    %59 = arith.mulf %57, %58 : vector<10x10xf32>
    %60 = arith.addf %59, %0 : vector<10x10xf32>
    %cst_32 = arith.constant dense<0xFF800000> : vector<10xf32>
    %61 = vector.multi_reduction <maximumf>, %60, %cst_32 [1] : vector<10x10xf32> to vector<10xf32>
    %62 = vector.shape_cast %61 : vector<10xf32> to vector<10x1xf32>
    %63 = vector.broadcast %62 : vector<10x1xf32> to vector<10x10xf32>
    %64 = arith.subf %60, %63 : vector<10x10xf32>
    %65 = math.exp %64 : vector<10x10xf32>
    %cst_33 = arith.constant dense<0.000000e+00> : vector<10xf32>
    %66 = vector.multi_reduction <add>, %65, %cst_33 [1] : vector<10x10xf32> to vector<10xf32>
    %67 = vector.shape_cast %66 : vector<10xf32> to vector<10x1xf32>
    %68 = vector.broadcast %67 : vector<10x1xf32> to vector<10x10xf32>
    %69 = arith.divf %65, %68 : vector<10x10xf32>
    %cst_34 = arith.constant dense<0.000000e+00> : vector<10x8xf32>
    %70 = tpu.matmul %69, %56, %cst_34 {dimension_numbers = #tpu.dot_dimension_numbers<[1], [0], [0], [1], [0, 0, 1, 1], [], []>} : vector<10x10xf32>, vector<10x8xf32>, vector<10x8xf32> -> vector<10x8xf32>
    %71 = vector.extract_strided_slice %36 {offsets = [0, 16], sizes = [10, 8], strides = [1, 1]} : vector<10x96xf32> to vector<10x8xf32>
    %72 = vector.extract_strided_slice %36 {offsets = [0, 48], sizes = [10, 8], strides = [1, 1]} : vector<10x96xf32> to vector<10x8xf32>
    %73 = vector.extract_strided_slice %36 {offsets = [0, 80], sizes = [10, 8], strides = [1, 1]} : vector<10x96xf32> to vector<10x8xf32>
    %cst_35 = arith.constant dense<0.000000e+00> : vector<10x10xf32>
    %74 = tpu.matmul %71, %72, %cst_35 {dimension_numbers = #tpu.dot_dimension_numbers<[1], [1], [0], [0], [0, 0, 1, 0], [], []>} : vector<10x8xf32>, vector<10x8xf32>, vector<10x10xf32> -> vector<10x10xf32>
    %cst_36 = arith.constant 0.353553385 : f32
    %75 = vector.broadcast %cst_36 : f32 to vector<10x10xf32>
    %76 = arith.mulf %74, %75 : vector<10x10xf32>
    %77 = arith.addf %76, %0 : vector<10x10xf32>
    %cst_37 = arith.constant dense<0xFF800000> : vector<10xf32>
    %78 = vector.multi_reduction <maximumf>, %77, %cst_37 [1] : vector<10x10xf32> to vector<10xf32>
    %79 = vector.shape_cast %78 : vector<10xf32> to vector<10x1xf32>
    %80 = vector.broadcast %79 : vector<10x1xf32> to vector<10x10xf32>
    %81 = arith.subf %77, %80 : vector<10x10xf32>
    %82 = math.exp %81 : vector<10x10xf32>
    %cst_38 = arith.constant dense<0.000000e+00> : vector<10xf32>
    %83 = vector.multi_reduction <add>, %82, %cst_38 [1] : vector<10x10xf32> to vector<10xf32>
    %84 = vector.shape_cast %83 : vector<10xf32> to vector<10x1xf32>
    %85 = vector.broadcast %84 : vector<10x1xf32> to vector<10x10xf32>
    %86 = arith.divf %82, %85 : vector<10x10xf32>
    %cst_39 = arith.constant dense<0.000000e+00> : vector<10x8xf32>
    %87 = tpu.matmul %86, %73, %cst_39 {dimension_numbers = #tpu.dot_dimension_numbers<[1], [0], [0], [1], [0, 0, 1, 1], [], []>} : vector<10x10xf32>, vector<10x8xf32>, vector<10x8xf32> -> vector<10x8xf32>
    %88 = vector.extract_strided_slice %36 {offsets = [0, 24], sizes = [10, 8], strides = [1, 1]} : vector<10x96xf32> to vector<10x8xf32>
    %89 = vector.extract_strided_slice %36 {offsets = [0, 56], sizes = [10, 8], strides = [1, 1]} : vector<10x96xf32> to vector<10x8xf32>
    %90 = vector.extract_strided_slice %36 {offsets = [0, 88], sizes = [10, 8], strides = [1, 1]} : vector<10x96xf32> to vector<10x8xf32>
    %cst_40 = arith.constant dense<0.000000e+00> : vector<10x10xf32>
    %91 = tpu.matmul %88, %89, %cst_40 {dimension_numbers = #tpu.dot_dimension_numbers<[1], [1], [0], [0], [0, 0, 1, 0], [], []>} : vector<10x8xf32>, vector<10x8xf32>, vector<10x10xf32> -> vector<10x10xf32>
    %cst_41 = arith.constant 0.353553385 : f32
    %92 = vector.broadcast %cst_41 : f32 to vector<10x10xf32>
    %93 = arith.mulf %91, %92 : vector<10x10xf32>
    %94 = arith.addf %93, %0 : vector<10x10xf32>
    %cst_42 = arith.constant dense<0xFF800000> : vector<10xf32>
    %95 = vector.multi_reduction <maximumf>, %94, %cst_42 [1] : vector<10x10xf32> to vector<10xf32>
    %96 = vector.shape_cast %95 : vector<10xf32> to vector<10x1xf32>
    %97 = vector.broadcast %96 : vector<10x1xf32> to vector<10x10xf32>
    %98 = arith.subf %94, %97 : vector<10x10xf32>
    %99 = math.exp %98 : vector<10x10xf32>
    %cst_43 = arith.constant dense<0.000000e+00> : vector<10xf32>
    %100 = vector.multi_reduction <add>, %99, %cst_43 [1] : vector<10x10xf32> to vector<10xf32>
    %101 = vector.shape_cast %100 : vector<10xf32> to vector<10x1xf32>
    %102 = vector.broadcast %101 : vector<10x1xf32> to vector<10x10xf32>
    %103 = arith.divf %99, %102 : vector<10x10xf32>
    %cst_44 = arith.constant dense<0.000000e+00> : vector<10x8xf32>
    %104 = tpu.matmul %103, %90, %cst_44 {dimension_numbers = #tpu.dot_dimension_numbers<[1], [0], [0], [1], [0, 0, 1, 1], [], []>} : vector<10x10xf32>, vector<10x8xf32>, vector<10x8xf32> -> vector<10x8xf32>
    %105 = tpu.concatenate %53, %70, %87, %104 in 1 : vector<10x8xf32>, vector<10x8xf32>, vector<10x8xf32>, vector<10x8xf32> -> vector<10x32xf32>
    %c0_45 = arith.constant 0 : index
    %c0_46 = arith.constant 0 : index
    %c0_47 = arith.constant 0 : index
    %106 = vector.load %arg9[%c0_45, %c0_46, %c0_47] : memref<2x32x32xf32, #tpu.memory_space<vmem>>, vector<1x32x32xf32>
    %107 = vector.shape_cast %106 : vector<1x32x32xf32> to vector<32x32xf32>
    %cst_48 = arith.constant dense<0.000000e+00> : vector<10x32xf32>
    %108 = tpu.matmul %105, %107, %cst_48 {dimension_numbers = #tpu.dot_dimension_numbers<[1], [0], [0], [1], [0, 0, 1, 1], [], []>} : vector<10x32xf32>, vector<32x32xf32>, vector<10x32xf32> -> vector<10x32xf32>
    %109 = arith.addf %5, %108 : vector<10x32xf32>
    %c0_49 = arith.constant 0 : index
    %c0_50 = arith.constant 0 : index
    %c0_51 = arith.constant 0 : index
    %110 = vector.load %arg10[%c0_49, %c0_50, %c0_51] : memref<2x1x32xf32, #tpu.memory_space<vmem>>, vector<1x1x32xf32>
    %111 = vector.shape_cast %110 : vector<1x1x32xf32> to vector<1x32xf32>
    %112 = vector.broadcast %111 : vector<1x32xf32> to vector<10x32xf32>
    %113 = arith.addf %109, %112 : vector<10x32xf32>
    %c0_52 = arith.constant 0 : index
    %c0_53 = arith.constant 0 : index
    %c0_54 = arith.constant 0 : index
    %114 = vector.load %arg11[%c0_52, %c0_53, %c0_54] : memref<2x1x32xf32, #tpu.memory_space<vmem>>, vector<1x1x32xf32>
    %115 = vector.shape_cast %114 : vector<1x1x32xf32> to vector<1x32xf32>
    %c0_55 = arith.constant 0 : index
    %c0_56 = arith.constant 0 : index
    %c0_57 = arith.constant 0 : index
    %116 = vector.load %arg12[%c0_55, %c0_56, %c0_57] : memref<2x1x32xf32, #tpu.memory_space<vmem>>, vector<1x1x32xf32>
    %117 = vector.shape_cast %116 : vector<1x1x32xf32> to vector<1x32xf32>
    %cst_58 = arith.constant dense<0.000000e+00> : vector<10xf32>
    %118 = vector.multi_reduction <add>, %113, %cst_58 [1] : vector<10x32xf32> to vector<10xf32>
    %119 = vector.shape_cast %118 : vector<10xf32> to vector<10x1xf32>
    %cst_59 = arith.constant 3.200000e+01 : f32
    %120 = vector.broadcast %cst_59 : f32 to vector<10x1xf32>
    %121 = arith.divf %119, %120 : vector<10x1xf32>
    %122 = vector.broadcast %121 : vector<10x1xf32> to vector<10x32xf32>
    %123 = arith.subf %113, %122 : vector<10x32xf32>
    %124 = arith.mulf %123, %123 : vector<10x32xf32>
    %cst_60 = arith.constant dense<0.000000e+00> : vector<10xf32>
    %125 = vector.multi_reduction <add>, %124, %cst_60 [1] : vector<10x32xf32> to vector<10xf32>
    %126 = vector.shape_cast %125 : vector<10xf32> to vector<10x1xf32>
    %cst_61 = arith.constant 3.200000e+01 : f32
    %127 = vector.broadcast %cst_61 : f32 to vector<10x1xf32>
    %128 = arith.divf %126, %127 : vector<10x1xf32>
    %cst_62 = arith.constant 9.99999997E-7 : f32
    %129 = vector.broadcast %cst_62 : f32 to vector<10x1xf32>
    %130 = arith.addf %128, %129 : vector<10x1xf32>
    %131 = math.rsqrt %130 : vector<10x1xf32>
    %132 = vector.broadcast %131 : vector<10x1xf32> to vector<10x32xf32>
    %133 = arith.mulf %123, %132 : vector<10x32xf32>
    %134 = vector.broadcast %115 : vector<1x32xf32> to vector<10x32xf32>
    %135 = arith.mulf %133, %134 : vector<10x32xf32>
    %136 = vector.broadcast %117 : vector<1x32xf32> to vector<10x32xf32>
    %137 = arith.addf %135, %136 : vector<10x32xf32>
    %c0_63 = arith.constant 0 : index
    %c0_64 = arith.constant 0 : index
    %c0_65 = arith.constant 0 : index
    %138 = vector.load %arg13[%c0_63, %c0_64, %c0_65] : memref<2x32x128xf32, #tpu.memory_space<vmem>>, vector<1x32x128xf32>
    %139 = vector.shape_cast %138 : vector<1x32x128xf32> to vector<32x128xf32>
    %cst_66 = arith.constant dense<0.000000e+00> : vector<10x128xf32>
    %140 = tpu.matmul %137, %139, %cst_66 {dimension_numbers = #tpu.dot_dimension_numbers<[1], [0], [0], [1], [0, 0, 1, 1], [], []>} : vector<10x32xf32>, vector<32x128xf32>, vector<10x128xf32> -> vector<10x128xf32>
    %c0_67 = arith.constant 0 : index
    %c0_68 = arith.constant 0 : index
    %c0_69 = arith.constant 0 : index
    %141 = vector.load %arg14[%c0_67, %c0_68, %c0_69] : memref<2x1x128xf32, #tpu.memory_space<vmem>>, vector<1x1x128xf32>
    %142 = vector.shape_cast %141 : vector<1x1x128xf32> to vector<1x128xf32>
    %143 = vector.broadcast %142 : vector<1x128xf32> to vector<10x128xf32>
    %144 = arith.addf %140, %143 : vector<10x128xf32>
    %cst_70 = arith.constant 5.000000e-01 : f32
    %145 = vector.broadcast %cst_70 : f32 to vector<10x128xf32>
    %146 = arith.mulf %145, %144 : vector<10x128xf32>
    %cst_71 = arith.constant 0.707106769 : f32
    %147 = vector.broadcast %cst_71 : f32 to vector<10x128xf32>
    %148 = arith.mulf %144, %147 : vector<10x128xf32>
    %149 = math.erf %148 : vector<10x128xf32>
    %cst_72 = arith.constant 1.000000e+00 : f32
    %150 = vector.broadcast %cst_72 : f32 to vector<10x128xf32>
    %151 = arith.addf %150, %149 : vector<10x128xf32>
    %152 = arith.mulf %146, %151 : vector<10x128xf32>
    %c0_73 = arith.constant 0 : index
    %c0_74 = arith.constant 0 : index
    %c0_75 = arith.constant 0 : index
    %153 = vector.load %arg15[%c0_73, %c0_74, %c0_75] : memref<2x128x32xf32, #tpu.memory_space<vmem>>, vector<1x128x32xf32>
    %154 = vector.shape_cast %153 : vector<1x128x32xf32> to vector<128x32xf32>
    %cst_76 = arith.constant dense<0.000000e+00> : vector<10x32xf32>
    %155 = tpu.matmul %152, %154, %cst_76 {dimension_numbers = #tpu.dot_dimension_numbers<[1], [0], [0], [1], [0, 0, 1, 1], [], []>} : vector<10x128xf32>, vector<128x32xf32>, vector<10x32xf32> -> vector<10x32xf32>
    %156 = arith.addf %113, %155 : vector<10x32xf32>
    %c0_77 = arith.constant 0 : index
    %c0_78 = arith.constant 0 : index
    %c0_79 = arith.constant 0 : index
    %157 = vector.load %arg16[%c0_77, %c0_78, %c0_79] : memref<2x1x32xf32, #tpu.memory_space<vmem>>, vector<1x1x32xf32>
    %158 = vector.shape_cast %157 : vector<1x1x32xf32> to vector<1x32xf32>
    %159 = vector.broadcast %158 : vector<1x32xf32> to vector<10x32xf32>
    %160 = arith.addf %156, %159 : vector<10x32xf32>
    %c1 = arith.constant 1 : index
    %c0_80 = arith.constant 0 : index
    %c0_81 = arith.constant 0 : index
    %161 = vector.load %arg5[%c1, %c0_80, %c0_81] : memref<2x1x32xf32, #tpu.memory_space<vmem>>, vector<1x1x32xf32>
    %162 = vector.shape_cast %161 : vector<1x1x32xf32> to vector<1x32xf32>
    %c1_82 = arith.constant 1 : index
    %c0_83 = arith.constant 0 : index
    %c0_84 = arith.constant 0 : index
    %163 = vector.load %arg6[%c1_82, %c0_83, %c0_84] : memref<2x1x32xf32, #tpu.memory_space<vmem>>, vector<1x1x32xf32>
    %164 = vector.shape_cast %163 : vector<1x1x32xf32> to vector<1x32xf32>
    %cst_85 = arith.constant dense<0.000000e+00> : vector<10xf32>
    %165 = vector.multi_reduction <add>, %160, %cst_85 [1] : vector<10x32xf32> to vector<10xf32>
    %166 = vector.shape_cast %165 : vector<10xf32> to vector<10x1xf32>
    %cst_86 = arith.constant 3.200000e+01 : f32
    %167 = vector.broadcast %cst_86 : f32 to vector<10x1xf32>
    %168 = arith.divf %166, %167 : vector<10x1xf32>
    %169 = vector.broadcast %168 : vector<10x1xf32> to vector<10x32xf32>
    %170 = arith.subf %160, %169 : vector<10x32xf32>
    %171 = arith.mulf %170, %170 : vector<10x32xf32>
    %cst_87 = arith.constant dense<0.000000e+00> : vector<10xf32>
    %172 = vector.multi_reduction <add>, %171, %cst_87 [1] : vector<10x32xf32> to vector<10xf32>
    %173 = vector.shape_cast %172 : vector<10xf32> to vector<10x1xf32>
    %cst_88 = arith.constant 3.200000e+01 : f32
    %174 = vector.broadcast %cst_88 : f32 to vector<10x1xf32>
    %175 = arith.divf %173, %174 : vector<10x1xf32>
    %cst_89 = arith.constant 9.99999997E-7 : f32
    %176 = vector.broadcast %cst_89 : f32 to vector<10x1xf32>
    %177 = arith.addf %175, %176 : vector<10x1xf32>
    %178 = math.rsqrt %177 : vector<10x1xf32>
    %179 = vector.broadcast %178 : vector<10x1xf32> to vector<10x32xf32>
    %180 = arith.mulf %170, %179 : vector<10x32xf32>
    %181 = vector.broadcast %162 : vector<1x32xf32> to vector<10x32xf32>
    %182 = arith.mulf %180, %181 : vector<10x32xf32>
    %183 = vector.broadcast %164 : vector<1x32xf32> to vector<10x32xf32>
    %184 = arith.addf %182, %183 : vector<10x32xf32>
    %c1_90 = arith.constant 1 : index
    %c0_91 = arith.constant 0 : index
    %c0_92 = arith.constant 0 : index
    %185 = vector.load %arg7[%c1_90, %c0_91, %c0_92] : memref<2x32x96xf32, #tpu.memory_space<vmem>>, vector<1x32x96xf32>
    %186 = vector.shape_cast %185 : vector<1x32x96xf32> to vector<32x96xf32>
    %cst_93 = arith.constant dense<0.000000e+00> : vector<10x96xf32>
    %187 = tpu.matmul %184, %186, %cst_93 {dimension_numbers = #tpu.dot_dimension_numbers<[1], [0], [0], [1], [0, 0, 1, 1], [], []>} : vector<10x32xf32>, vector<32x96xf32>, vector<10x96xf32> -> vector<10x96xf32>
    %c1_94 = arith.constant 1 : index
    %c0_95 = arith.constant 0 : index
    %c0_96 = arith.constant 0 : index
    %188 = vector.load %arg8[%c1_94, %c0_95, %c0_96] : memref<2x1x96xf32, #tpu.memory_space<vmem>>, vector<1x1x96xf32>
    %189 = vector.shape_cast %188 : vector<1x1x96xf32> to vector<1x96xf32>
    %190 = vector.broadcast %189 : vector<1x96xf32> to vector<10x96xf32>
    %191 = arith.addf %187, %190 : vector<10x96xf32>
    %192 = vector.extract_strided_slice %191 {offsets = [0, 0], sizes = [10, 8], strides = [1, 1]} : vector<10x96xf32> to vector<10x8xf32>
    %193 = vector.extract_strided_slice %191 {offsets = [0, 32], sizes = [10, 8], strides = [1, 1]} : vector<10x96xf32> to vector<10x8xf32>
    %194 = vector.extract_strided_slice %191 {offsets = [0, 64], sizes = [10, 8], strides = [1, 1]} : vector<10x96xf32> to vector<10x8xf32>
    %cst_97 = arith.constant dense<0.000000e+00> : vector<10x10xf32>
    %195 = tpu.matmul %192, %193, %cst_97 {dimension_numbers = #tpu.dot_dimension_numbers<[1], [1], [0], [0], [0, 0, 1, 0], [], []>} : vector<10x8xf32>, vector<10x8xf32>, vector<10x10xf32> -> vector<10x10xf32>
    %cst_98 = arith.constant 0.353553385 : f32
    %196 = vector.broadcast %cst_98 : f32 to vector<10x10xf32>
    %197 = arith.mulf %195, %196 : vector<10x10xf32>
    %198 = arith.addf %197, %0 : vector<10x10xf32>
    %cst_99 = arith.constant dense<0xFF800000> : vector<10xf32>
    %199 = vector.multi_reduction <maximumf>, %198, %cst_99 [1] : vector<10x10xf32> to vector<10xf32>
    %200 = vector.shape_cast %199 : vector<10xf32> to vector<10x1xf32>
    %201 = vector.broadcast %200 : vector<10x1xf32> to vector<10x10xf32>
    %202 = arith.subf %198, %201 : vector<10x10xf32>
    %203 = math.exp %202 : vector<10x10xf32>
    %cst_100 = arith.constant dense<0.000000e+00> : vector<10xf32>
    %204 = vector.multi_reduction <add>, %203, %cst_100 [1] : vector<10x10xf32> to vector<10xf32>
    %205 = vector.shape_cast %204 : vector<10xf32> to vector<10x1xf32>
    %206 = vector.broadcast %205 : vector<10x1xf32> to vector<10x10xf32>
    %207 = arith.divf %203, %206 : vector<10x10xf32>
    %cst_101 = arith.constant dense<0.000000e+00> : vector<10x8xf32>
    %208 = tpu.matmul %207, %194, %cst_101 {dimension_numbers = #tpu.dot_dimension_numbers<[1], [0], [0], [1], [0, 0, 1, 1], [], []>} : vector<10x10xf32>, vector<10x8xf32>, vector<10x8xf32> -> vector<10x8xf32>
    %209 = vector.extract_strided_slice %191 {offsets = [0, 8], sizes = [10, 8], strides = [1, 1]} : vector<10x96xf32> to vector<10x8xf32>
    %210 = vector.extract_strided_slice %191 {offsets = [0, 40], sizes = [10, 8], strides = [1, 1]} : vector<10x96xf32> to vector<10x8xf32>
    %211 = vector.extract_strided_slice %191 {offsets = [0, 72], sizes = [10, 8], strides = [1, 1]} : vector<10x96xf32> to vector<10x8xf32>
    %cst_102 = arith.constant dense<0.000000e+00> : vector<10x10xf32>
    %212 = tpu.matmul %209, %210, %cst_102 {dimension_numbers = #tpu.dot_dimension_numbers<[1], [1], [0], [0], [0, 0, 1, 0], [], []>} : vector<10x8xf32>, vector<10x8xf32>, vector<10x10xf32> -> vector<10x10xf32>
    %cst_103 = arith.constant 0.353553385 : f32
    %213 = vector.broadcast %cst_103 : f32 to vector<10x10xf32>
    %214 = arith.mulf %212, %213 : vector<10x10xf32>
    %215 = arith.addf %214, %0 : vector<10x10xf32>
    %cst_104 = arith.constant dense<0xFF800000> : vector<10xf32>
    %216 = vector.multi_reduction <maximumf>, %215, %cst_104 [1] : vector<10x10xf32> to vector<10xf32>
    %217 = vector.shape_cast %216 : vector<10xf32> to vector<10x1xf32>
    %218 = vector.broadcast %217 : vector<10x1xf32> to vector<10x10xf32>
    %219 = arith.subf %215, %218 : vector<10x10xf32>
    %220 = math.exp %219 : vector<10x10xf32>
    %cst_105 = arith.constant dense<0.000000e+00> : vector<10xf32>
    %221 = vector.multi_reduction <add>, %220, %cst_105 [1] : vector<10x10xf32> to vector<10xf32>
    %222 = vector.shape_cast %221 : vector<10xf32> to vector<10x1xf32>
    %223 = vector.broadcast %222 : vector<10x1xf32> to vector<10x10xf32>
    %224 = arith.divf %220, %223 : vector<10x10xf32>
    %cst_106 = arith.constant dense<0.000000e+00> : vector<10x8xf32>
    %225 = tpu.matmul %224, %211, %cst_106 {dimension_numbers = #tpu.dot_dimension_numbers<[1], [0], [0], [1], [0, 0, 1, 1], [], []>} : vector<10x10xf32>, vector<10x8xf32>, vector<10x8xf32> -> vector<10x8xf32>
    %226 = vector.extract_strided_slice %191 {offsets = [0, 16], sizes = [10, 8], strides = [1, 1]} : vector<10x96xf32> to vector<10x8xf32>
    %227 = vector.extract_strided_slice %191 {offsets = [0, 48], sizes = [10, 8], strides = [1, 1]} : vector<10x96xf32> to vector<10x8xf32>
    %228 = vector.extract_strided_slice %191 {offsets = [0, 80], sizes = [10, 8], strides = [1, 1]} : vector<10x96xf32> to vector<10x8xf32>
    %cst_107 = arith.constant dense<0.000000e+00> : vector<10x10xf32>
    %229 = tpu.matmul %226, %227, %cst_107 {dimension_numbers = #tpu.dot_dimension_numbers<[1], [1], [0], [0], [0, 0, 1, 0], [], []>} : vector<10x8xf32>, vector<10x8xf32>, vector<10x10xf32> -> vector<10x10xf32>
    %cst_108 = arith.constant 0.353553385 : f32
    %230 = vector.broadcast %cst_108 : f32 to vector<10x10xf32>
    %231 = arith.mulf %229, %230 : vector<10x10xf32>
    %232 = arith.addf %231, %0 : vector<10x10xf32>
    %cst_109 = arith.constant dense<0xFF800000> : vector<10xf32>
    %233 = vector.multi_reduction <maximumf>, %232, %cst_109 [1] : vector<10x10xf32> to vector<10xf32>
    %234 = vector.shape_cast %233 : vector<10xf32> to vector<10x1xf32>
    %235 = vector.broadcast %234 : vector<10x1xf32> to vector<10x10xf32>
    %236 = arith.subf %232, %235 : vector<10x10xf32>
    %237 = math.exp %236 : vector<10x10xf32>
    %cst_110 = arith.constant dense<0.000000e+00> : vector<10xf32>
    %238 = vector.multi_reduction <add>, %237, %cst_110 [1] : vector<10x10xf32> to vector<10xf32>
    %239 = vector.shape_cast %238 : vector<10xf32> to vector<10x1xf32>
    %240 = vector.broadcast %239 : vector<10x1xf32> to vector<10x10xf32>
    %241 = arith.divf %237, %240 : vector<10x10xf32>
    %cst_111 = arith.constant dense<0.000000e+00> : vector<10x8xf32>
    %242 = tpu.matmul %241, %228, %cst_111 {dimension_numbers = #tpu.dot_dimension_numbers<[1], [0], [0], [1], [0, 0, 1, 1], [], []>} : vector<10x10xf32>, vector<10x8xf32>, vector<10x8xf32> -> vector<10x8xf32>
    %243 = vector.extract_strided_slice %191 {offsets = [0, 24], sizes = [10, 8], strides = [1, 1]} : vector<10x96xf32> to vector<10x8xf32>
    %244 = vector.extract_strided_slice %191 {offsets = [0, 56], sizes = [10, 8], strides = [1, 1]} : vector<10x96xf32> to vector<10x8xf32>
    %245 = vector.extract_strided_slice %191 {offsets = [0, 88], sizes = [10, 8], strides = [1, 1]} : vector<10x96xf32> to vector<10x8xf32>
    %cst_112 = arith.constant dense<0.000000e+00> : vector<10x10xf32>
    %246 = tpu.matmul %243, %244, %cst_112 {dimension_numbers = #tpu.dot_dimension_numbers<[1], [1], [0], [0], [0, 0, 1, 0], [], []>} : vector<10x8xf32>, vector<10x8xf32>, vector<10x10xf32> -> vector<10x10xf32>
    %cst_113 = arith.constant 0.353553385 : f32
    %247 = vector.broadcast %cst_113 : f32 to vector<10x10xf32>
    %248 = arith.mulf %246, %247 : vector<10x10xf32>
    %249 = arith.addf %248, %0 : vector<10x10xf32>
    %cst_114 = arith.constant dense<0xFF800000> : vector<10xf32>
    %250 = vector.multi_reduction <maximumf>, %249, %cst_114 [1] : vector<10x10xf32> to vector<10xf32>
    %251 = vector.shape_cast %250 : vector<10xf32> to vector<10x1xf32>
    %252 = vector.broadcast %251 : vector<10x1xf32> to vector<10x10xf32>
    %253 = arith.subf %249, %252 : vector<10x10xf32>
    %254 = math.exp %253 : vector<10x10xf32>
    %cst_115 = arith.constant dense<0.000000e+00> : vector<10xf32>
    %255 = vector.multi_reduction <add>, %254, %cst_115 [1] : vector<10x10xf32> to vector<10xf32>
    %256 = vector.shape_cast %255 : vector<10xf32> to vector<10x1xf32>
    %257 = vector.broadcast %256 : vector<10x1xf32> to vector<10x10xf32>
    %258 = arith.divf %254, %257 : vector<10x10xf32>
    %cst_116 = arith.constant dense<0.000000e+00> : vector<10x8xf32>
    %259 = tpu.matmul %258, %245, %cst_116 {dimension_numbers = #tpu.dot_dimension_numbers<[1], [0], [0], [1], [0, 0, 1, 1], [], []>} : vector<10x10xf32>, vector<10x8xf32>, vector<10x8xf32> -> vector<10x8xf32>
    %260 = tpu.concatenate %208, %225, %242, %259 in 1 : vector<10x8xf32>, vector<10x8xf32>, vector<10x8xf32>, vector<10x8xf32> -> vector<10x32xf32>
    %c1_117 = arith.constant 1 : index
    %c0_118 = arith.constant 0 : index
    %c0_119 = arith.constant 0 : index
    %261 = vector.load %arg9[%c1_117, %c0_118, %c0_119] : memref<2x32x32xf32, #tpu.memory_space<vmem>>, vector<1x32x32xf32>
    %262 = vector.shape_cast %261 : vector<1x32x32xf32> to vector<32x32xf32>
    %cst_120 = arith.constant dense<0.000000e+00> : vector<10x32xf32>
    %263 = tpu.matmul %260, %262, %cst_120 {dimension_numbers = #tpu.dot_dimension_numbers<[1], [0], [0], [1], [0, 0, 1, 1], [], []>} : vector<10x32xf32>, vector<32x32xf32>, vector<10x32xf32> -> vector<10x32xf32>
    %264 = arith.addf %160, %263 : vector<10x32xf32>
    %c1_121 = arith.constant 1 : index
    %c0_122 = arith.constant 0 : index
    %c0_123 = arith.constant 0 : index
    %265 = vector.load %arg10[%c1_121, %c0_122, %c0_123] : memref<2x1x32xf32, #tpu.memory_space<vmem>>, vector<1x1x32xf32>
    %266 = vector.shape_cast %265 : vector<1x1x32xf32> to vector<1x32xf32>
    %267 = vector.broadcast %266 : vector<1x32xf32> to vector<10x32xf32>
    %268 = arith.addf %264, %267 : vector<10x32xf32>
    %c1_124 = arith.constant 1 : index
    %c0_125 = arith.constant 0 : index
    %c0_126 = arith.constant 0 : index
    %269 = vector.load %arg11[%c1_124, %c0_125, %c0_126] : memref<2x1x32xf32, #tpu.memory_space<vmem>>, vector<1x1x32xf32>
    %270 = vector.shape_cast %269 : vector<1x1x32xf32> to vector<1x32xf32>
    %c1_127 = arith.constant 1 : index
    %c0_128 = arith.constant 0 : index
    %c0_129 = arith.constant 0 : index
    %271 = vector.load %arg12[%c1_127, %c0_128, %c0_129] : memref<2x1x32xf32, #tpu.memory_space<vmem>>, vector<1x1x32xf32>
    %272 = vector.shape_cast %271 : vector<1x1x32xf32> to vector<1x32xf32>
    %cst_130 = arith.constant dense<0.000000e+00> : vector<10xf32>
    %273 = vector.multi_reduction <add>, %268, %cst_130 [1] : vector<10x32xf32> to vector<10xf32>
    %274 = vector.shape_cast %273 : vector<10xf32> to vector<10x1xf32>
    %cst_131 = arith.constant 3.200000e+01 : f32
    %275 = vector.broadcast %cst_131 : f32 to vector<10x1xf32>
    %276 = arith.divf %274, %275 : vector<10x1xf32>
    %277 = vector.broadcast %276 : vector<10x1xf32> to vector<10x32xf32>
    %278 = arith.subf %268, %277 : vector<10x32xf32>
    %279 = arith.mulf %278, %278 : vector<10x32xf32>
    %cst_132 = arith.constant dense<0.000000e+00> : vector<10xf32>
    %280 = vector.multi_reduction <add>, %279, %cst_132 [1] : vector<10x32xf32> to vector<10xf32>
    %281 = vector.shape_cast %280 : vector<10xf32> to vector<10x1xf32>
    %cst_133 = arith.constant 3.200000e+01 : f32
    %282 = vector.broadcast %cst_133 : f32 to vector<10x1xf32>
    %283 = arith.divf %281, %282 : vector<10x1xf32>
    %cst_134 = arith.constant 9.99999997E-7 : f32
    %284 = vector.broadcast %cst_134 : f32 to vector<10x1xf32>
    %285 = arith.addf %283, %284 : vector<10x1xf32>
    %286 = math.rsqrt %285 : vector<10x1xf32>
    %287 = vector.broadcast %286 : vector<10x1xf32> to vector<10x32xf32>
    %288 = arith.mulf %278, %287 : vector<10x32xf32>
    %289 = vector.broadcast %270 : vector<1x32xf32> to vector<10x32xf32>
    %290 = arith.mulf %288, %289 : vector<10x32xf32>
    %291 = vector.broadcast %272 : vector<1x32xf32> to vector<10x32xf32>
    %292 = arith.addf %290, %291 : vector<10x32xf32>
    %c1_135 = arith.constant 1 : index
    %c0_136 = arith.constant 0 : index
    %c0_137 = arith.constant 0 : index
    %293 = vector.load %arg13[%c1_135, %c0_136, %c0_137] : memref<2x32x128xf32, #tpu.memory_space<vmem>>, vector<1x32x128xf32>
    %294 = vector.shape_cast %293 : vector<1x32x128xf32> to vector<32x128xf32>
    %cst_138 = arith.constant dense<0.000000e+00> : vector<10x128xf32>
    %295 = tpu.matmul %292, %294, %cst_138 {dimension_numbers = #tpu.dot_dimension_numbers<[1], [0], [0], [1], [0, 0, 1, 1], [], []>} : vector<10x32xf32>, vector<32x128xf32>, vector<10x128xf32> -> vector<10x128xf32>
    %c1_139 = arith.constant 1 : index
    %c0_140 = arith.constant 0 : index
    %c0_141 = arith.constant 0 : index
    %296 = vector.load %arg14[%c1_139, %c0_140, %c0_141] : memref<2x1x128xf32, #tpu.memory_space<vmem>>, vector<1x1x128xf32>
    %297 = vector.shape_cast %296 : vector<1x1x128xf32> to vector<1x128xf32>
    %298 = vector.broadcast %297 : vector<1x128xf32> to vector<10x128xf32>
    %299 = arith.addf %295, %298 : vector<10x128xf32>
    %cst_142 = arith.constant 5.000000e-01 : f32
    %300 = vector.broadcast %cst_142 : f32 to vector<10x128xf32>
    %301 = arith.mulf %300, %299 : vector<10x128xf32>
    %cst_143 = arith.constant 0.707106769 : f32
    %302 = vector.broadcast %cst_143 : f32 to vector<10x128xf32>
    %303 = arith.mulf %299, %302 : vector<10x128xf32>
    %304 = math.erf %303 : vector<10x128xf32>
    %cst_144 = arith.constant 1.000000e+00 : f32
    %305 = vector.broadcast %cst_144 : f32 to vector<10x128xf32>
    %306 = arith.addf %305, %304 : vector<10x128xf32>
    %307 = arith.mulf %301, %306 : vector<10x128xf32>
    %c1_145 = arith.constant 1 : index
    %c0_146 = arith.constant 0 : index
    %c0_147 = arith.constant 0 : index
    %308 = vector.load %arg15[%c1_145, %c0_146, %c0_147] : memref<2x128x32xf32, #tpu.memory_space<vmem>>, vector<1x128x32xf32>
    %309 = vector.shape_cast %308 : vector<1x128x32xf32> to vector<128x32xf32>
    %cst_148 = arith.constant dense<0.000000e+00> : vector<10x32xf32>
    %310 = tpu.matmul %307, %309, %cst_148 {dimension_numbers = #tpu.dot_dimension_numbers<[1], [0], [0], [1], [0, 0, 1, 1], [], []>} : vector<10x128xf32>, vector<128x32xf32>, vector<10x32xf32> -> vector<10x32xf32>
    %311 = arith.addf %268, %310 : vector<10x32xf32>
    %c1_149 = arith.constant 1 : index
    %c0_150 = arith.constant 0 : index
    %c0_151 = arith.constant 0 : index
    %312 = vector.load %arg16[%c1_149, %c0_150, %c0_151] : memref<2x1x32xf32, #tpu.memory_space<vmem>>, vector<1x1x32xf32>
    %313 = vector.shape_cast %312 : vector<1x1x32xf32> to vector<1x32xf32>
    %314 = vector.broadcast %313 : vector<1x32xf32> to vector<10x32xf32>
    %315 = arith.addf %311, %314 : vector<10x32xf32>
    %316 = vector.extract_strided_slice %315 {offsets = [0, 0], sizes = [1, 32], strides = [1, 1]} : vector<10x32xf32> to vector<1x32xf32>
    %317 = vector.extract_strided_slice %315 {offsets = [5, 0], sizes = [1, 32], strides = [1, 1]} : vector<10x32xf32> to vector<1x32xf32>
    %318 = tpu.concatenate %316, %317 in 0 : vector<1x32xf32>, vector<1x32xf32> -> vector<2x32xf32>
    %c0_152 = arith.constant 0 : index
    %c0_153 = arith.constant 0 : index
    %319 = vector.load %arg17[%c0_152, %c0_153] : memref<1x32xf32, #tpu.memory_space<vmem>>, vector<1x32xf32>
    %c0_154 = arith.constant 0 : index
    %c0_155 = arith.constant 0 : index
    %320 = vector.load %arg18[%c0_154, %c0_155] : memref<1x32xf32, #tpu.memory_space<vmem>>, vector<1x32xf32>
    %cst_156 = arith.constant dense<0.000000e+00> : vector<2xf32>
    %321 = vector.multi_reduction <add>, %318, %cst_156 [1] : vector<2x32xf32> to vector<2xf32>
    %322 = vector.shape_cast %321 : vector<2xf32> to vector<2x1xf32>
    %cst_157 = arith.constant 3.200000e+01 : f32
    %323 = vector.broadcast %cst_157 : f32 to vector<2x1xf32>
    %324 = arith.divf %322, %323 : vector<2x1xf32>
    %325 = vector.broadcast %324 : vector<2x1xf32> to vector<2x32xf32>
    %326 = arith.subf %318, %325 : vector<2x32xf32>
    %327 = arith.mulf %326, %326 : vector<2x32xf32>
    %cst_158 = arith.constant dense<0.000000e+00> : vector<2xf32>
    %328 = vector.multi_reduction <add>, %327, %cst_158 [1] : vector<2x32xf32> to vector<2xf32>
    %329 = vector.shape_cast %328 : vector<2xf32> to vector<2x1xf32>
    %cst_159 = arith.constant 3.200000e+01 : f32
    %330 = vector.broadcast %cst_159 : f32 to vector<2x1xf32>
    %331 = arith.divf %329, %330 : vector<2x1xf32>
    %cst_160 = arith.constant 9.99999997E-7 : f32
    %332 = vector.broadcast %cst_160 : f32 to vector<2x1xf32>
    %333 = arith.addf %331, %332 : vector<2x1xf32>
    %334 = math.rsqrt %333 : vector<2x1xf32>
    %335 = vector.broadcast %334 : vector<2x1xf32> to vector<2x32xf32>
    %336 = arith.mulf %326, %335 : vector<2x32xf32>
    %337 = vector.broadcast %319 : vector<1x32xf32> to vector<2x32xf32>
    %338 = arith.mulf %336, %337 : vector<2x32xf32>
    %339 = vector.broadcast %320 : vector<1x32xf32> to vector<2x32xf32>
    %340 = arith.addf %338, %339 : vector<2x32xf32>
    %c0_161 = arith.constant 0 : index
    %c0_162 = arith.constant 0 : index
    %341 = vector.load %arg24[%c0_161, %c0_162] : memref<2x32xf32, #tpu.memory_space<vmem>>, vector<2x32xf32>
    tpu.vector_store %arg24[%c0_161, %c0_162], %340 {strides = array<i32>} : memref<2x32xf32, #tpu.memory_space<vmem>>, vector<2x32xf32>,
    %c0_163 = arith.constant 0 : index
    %c0_164 = arith.constant 0 : index
    %342 = vector.load %arg19[%c0_163, %c0_164] : memref<32x10xf32, #tpu.memory_space<vmem>>, vector<32x10xf32>
    %cst_165 = arith.constant dense<0.000000e+00> : vector<2x10xf32>
    %343 = tpu.matmul %340, %342, %cst_165 {dimension_numbers = #tpu.dot_dimension_numbers<[1], [0], [0], [1], [0, 0, 1, 1], [], []>} : vector<2x32xf32>, vector<32x10xf32>, vector<2x10xf32> -> vector<2x10xf32>
    %c0_166 = arith.constant 0 : index
    %c0_167 = arith.constant 0 : index
    %344 = vector.load %arg20[%c0_166, %c0_167] : memref<1x10xf32, #tpu.memory_space<vmem>>, vector<1x10xf32>
    %345 = vector.broadcast %344 : vector<1x10xf32> to vector<2x10xf32>
    %346 = arith.addf %343, %345 : vector<2x10xf32>
    %c0_168 = arith.constant 0 : index
    %c0_169 = arith.constant 0 : index
    %347 = vector.load %arg25[%c0_168, %c0_169] : memref<2x10xf32, #tpu.memory_space<vmem>>, vector<2x10xf32>
    tpu.vector_store %arg25[%c0_168, %c0_169], %346 {strides = array<i32>} : memref<2x10xf32, #tpu.memory_space<vmem>>, vector<2x10xf32>,
    %c0_170 = arith.constant 0 : index
    %c0_171 = arith.constant 0 : index
    %348 = vector.load %arg23[%c0_170, %c0_171] : memref<4x32xf32, #tpu.memory_space<vmem>>, vector<4x32xf32>
    %349 = tpu.concatenate %340, %340 in 0 : vector<2x32xf32>, vector<2x32xf32> -> vector<4x32xf32>
    %350 = arith.subf %348, %349 : vector<4x32xf32>
    %351 = arith.addf %349, %350 : vector<4x32xf32>
    %352 = arith.subf %349, %351 : vector<4x32xf32>
    %353 = arith.mulf %352, %352 : vector<4x32xf32>
    %354 = vector.extract_strided_slice %353 {offsets = [0, 0], sizes = [2, 32], strides = [1, 1]} : vector<4x32xf32> to vector<2x32xf32>
    %355 = vector.shape_cast %354 : vector<2x32xf32> to vector<1x2x32xf32>
    %cst_172 = arith.constant dense<0.000000e+00> : vector<1xf32>
    %356 = vector.multi_reduction <add>, %355, %cst_172 [1, 2] : vector<1x2x32xf32> to vector<1xf32>
    %357 = vector.shape_cast %356 : vector<1xf32> to vector<1x1x1xf32>
    %358 = vector.extract %357[0, 0, 0] : f32 from vector<1x1x1xf32>
    %359 = vector.broadcast %358 : f32 to vector<1x1xf32>
    %cst_173 = arith.constant 1.562500e-02 : f32
    %360 = vector.broadcast %cst_173 : f32 to vector<1x1xf32>
    %361 = arith.mulf %359, %360 : vector<1x1xf32>
    %362 = vector.extract_strided_slice %353 {offsets = [2, 0], sizes = [2, 32], strides = [1, 1]} : vector<4x32xf32> to vector<2x32xf32>
    %363 = vector.shape_cast %362 : vector<2x32xf32> to vector<1x2x32xf32>
    %cst_174 = arith.constant dense<0.000000e+00> : vector<1xf32>
    %364 = vector.multi_reduction <add>, %363, %cst_174 [1, 2] : vector<1x2x32xf32> to vector<1xf32>
    %365 = vector.shape_cast %364 : vector<1xf32> to vector<1x1x1xf32>
    %366 = vector.extract %365[0, 0, 0] : f32 from vector<1x1x1xf32>
    %367 = vector.broadcast %366 : f32 to vector<1x1xf32>
    %cst_175 = arith.constant 1.562500e-02 : f32
    %368 = vector.broadcast %cst_175 : f32 to vector<1x1xf32>
    %369 = arith.mulf %367, %368 : vector<1x1xf32>
    %370 = tpu.concatenate %361, %369 in 1 : vector<1x1xf32>, vector<1x1xf32> -> vector<1x2xf32>
    %c0_176 = arith.constant 0 : index
    %c0_177 = arith.constant 0 : index
    %371 = vector.load %arg26[%c0_176, %c0_177] : memref<1x2xf32, #tpu.memory_space<vmem>>, vector<1x2xf32>
    tpu.vector_store %arg26[%c0_176, %c0_177], %370 {strides = array<i32>} : memref<1x2xf32, #tpu.memory_space<vmem>>, vector<1x2xf32>,
    %c0_178 = arith.constant 0 : index
    %c0_179 = arith.constant 0 : index
    %372 = vector.load %arg21[%c0_178, %c0_179] : memref<32x10xf32, #tpu.memory_space<vmem>>, vector<32x10xf32>
    %cst_180 = arith.constant dense<0.000000e+00> : vector<4x10xf32>
    %373 = tpu.matmul %351, %372, %cst_180 {dimension_numbers = #tpu.dot_dimension_numbers<[1], [0], [0], [1], [0, 0, 1, 1], [], []>} : vector<4x32xf32>, vector<32x10xf32>, vector<4x10xf32> -> vector<4x10xf32>
    %c0_181 = arith.constant 0 : index
    %c0_182 = arith.constant 0 : index
    %374 = vector.load %arg22[%c0_181, %c0_182] : memref<1x10xf32, #tpu.memory_space<vmem>>, vector<1x10xf32>
    %375 = vector.broadcast %374 : vector<1x10xf32> to vector<4x10xf32>
    %376 = arith.addf %373, %375 : vector<4x10xf32>
    %c0_183 = arith.constant 0 : index
    %c0_184 = arith.constant 0 : index
    %377 = vector.load %arg27[%c0_183, %c0_184] : memref<4x10xf32, #tpu.memory_space<vmem>>, vector<4x10xf32>
    tpu.vector_store %arg27[%c0_183, %c0_184], %376 {strides = array<i32>} : memref<4x10xf32, #tpu.memory_space<vmem>>, vector<4x10xf32>,
    return
  }
  func.func @transform_0(%arg0: i32) -> (i32, i32) {
    %c0_i32 = arith.constant 0 : i32
    %c0_i32_0 = arith.constant 0 : i32
    %c0_i32_1 = arith.constant 0 : i32
    return %c0_i32, %c0_i32_0 : i32, i32
  }
  func.func @transform_1(%arg0: i32) -> (i32, i32) {
    %c0_i32 = arith.constant 0 : i32
    %c0_i32_0 = arith.constant 0 : i32
    %c0_i32_1 = arith.constant 0 : i32
    return %c0_i32, %c0_i32_0 : i32, i32
  }
  func.func @transform_2(%arg0: i32) -> (i32, i32) {
    %c0_i32 = arith.constant 0 : i32
    %c0_i32_0 = arith.constant 0 : i32
    %c0_i32_1 = arith.constant 0 : i32
    return %c0_i32, %c0_i32_0 : i32, i32
  }
  func.func @transform_3(%arg0: i32) -> (i32, i32) {
    %c0_i32 = arith.constant 0 : i32
    %c0_i32_0 = arith.constant 0 : i32
    %c0_i32_1 = arith.constant 0 : i32
    return %c0_i32, %c0_i32_0 : i32, i32
  }
  func.func @transform_4(%arg0: i32) -> (i32, i32, i32) {
    %c0_i32 = arith.constant 0 : i32
    %c0_i32_0 = arith.constant 0 : i32
    %c0_i32_1 = arith.constant 0 : i32
    %c0_i32_2 = arith.constant 0 : i32
    return %c0_i32, %c0_i32_0, %c0_i32_1 : i32, i32, i32
  }
  func.func @transform_5(%arg0: i32) -> (i32, i32, i32) {
    %c0_i32 = arith.constant 0 : i32
    %c0_i32_0 = arith.constant 0 : i32
    %c0_i32_1 = arith.constant 0 : i32
    %c0_i32_2 = arith.constant 0 : i32
    return %c0_i32, %c0_i32_0, %c0_i32_1 : i32, i32, i32
  }
  func.func @transform_6(%arg0: i32) -> (i32, i32, i32) {
    %c0_i32 = arith.constant 0 : i32
    %c0_i32_0 = arith.constant 0 : i32
    %c0_i32_1 = arith.constant 0 : i32
    %c0_i32_2 = arith.constant 0 : i32
    return %c0_i32, %c0_i32_0, %c0_i32_1 : i32, i32, i32
  }
  func.func @transform_7(%arg0: i32) -> (i32, i32, i32) {
    %c0_i32 = arith.constant 0 : i32
    %c0_i32_0 = arith.constant 0 : i32
    %c0_i32_1 = arith.constant 0 : i32
    %c0_i32_2 = arith.constant 0 : i32
    return %c0_i32, %c0_i32_0, %c0_i32_1 : i32, i32, i32
  }
  func.func @transform_8(%arg0: i32) -> (i32, i32, i32) {
    %c0_i32 = arith.constant 0 : i32
    %c0_i32_0 = arith.constant 0 : i32
    %c0_i32_1 = arith.constant 0 : i32
    %c0_i32_2 = arith.constant 0 : i32
    return %c0_i32, %c0_i32_0, %c0_i32_1 : i32, i32, i32
  }
  func.func @transform_9(%arg0: i32) -> (i32, i32, i32) {
    %c0_i32 = arith.constant 0 : i32
    %c0_i32_0 = arith.constant 0 : i32
    %c0_i32_1 = arith.constant 0 : i32
    %c0_i32_2 = arith.constant 0 : i32
    return %c0_i32, %c0_i32_0, %c0_i32_1 : i32, i32, i32
  }
  func.func @transform_10(%arg0: i32) -> (i32, i32, i32) {
    %c0_i32 = arith.constant 0 : i32
    %c0_i32_0 = arith.constant 0 : i32
    %c0_i32_1 = arith.constant 0 : i32
    %c0_i32_2 = arith.constant 0 : i32
    return %c0_i32, %c0_i32_0, %c0_i32_1 : i32, i32, i32
  }
  func.func @transform_11(%arg0: i32) -> (i32, i32, i32) {
    %c0_i32 = arith.constant 0 : i32
    %c0_i32_0 = arith.constant 0 : i32
    %c0_i32_1 = arith.constant 0 : i32
    %c0_i32_2 = arith.constant 0 : i32
    return %c0_i32, %c0_i32_0, %c0_i32_1 : i32, i32, i32
  }
  func.func @transform_12(%arg0: i32) -> (i32, i32, i32) {
    %c0_i32 = arith.constant 0 : i32
    %c0_i32_0 = arith.constant 0 : i32
    %c0_i32_1 = arith.constant 0 : i32
    %c0_i32_2 = arith.constant 0 : i32
    return %c0_i32, %c0_i32_0, %c0_i32_1 : i32, i32, i32
  }
  func.func @transform_13(%arg0: i32) -> (i32, i32, i32) {
    %c0_i32 = arith.constant 0 : i32
    %c0_i32_0 = arith.constant 0 : i32
    %c0_i32_1 = arith.constant 0 : i32
    %c0_i32_2 = arith.constant 0 : i32
    return %c0_i32, %c0_i32_0, %c0_i32_1 : i32, i32, i32
  }
  func.func @transform_14(%arg0: i32) -> (i32, i32, i32) {
    %c0_i32 = arith.constant 0 : i32
    %c0_i32_0 = arith.constant 0 : i32
    %c0_i32_1 = arith.constant 0 : i32
    %c0_i32_2 = arith.constant 0 : i32
    return %c0_i32, %c0_i32_0, %c0_i32_1 : i32, i32, i32
  }
  func.func @transform_15(%arg0: i32) -> (i32, i32, i32) {
    %c0_i32 = arith.constant 0 : i32
    %c0_i32_0 = arith.constant 0 : i32
    %c0_i32_1 = arith.constant 0 : i32
    %c0_i32_2 = arith.constant 0 : i32
    return %c0_i32, %c0_i32_0, %c0_i32_1 : i32, i32, i32
  }
  func.func @transform_16(%arg0: i32) -> (i32, i32) {
    %c0_i32 = arith.constant 0 : i32
    %c0_i32_0 = arith.constant 0 : i32
    %c0_i32_1 = arith.constant 0 : i32
    return %c0_i32, %c0_i32_0 : i32, i32
  }
  func.func @transform_17(%arg0: i32) -> (i32, i32) {
    %c0_i32 = arith.constant 0 : i32
    %c0_i32_0 = arith.constant 0 : i32
    %c0_i32_1 = arith.constant 0 : i32
    return %c0_i32, %c0_i32_0 : i32, i32
  }
  func.func @transform_18(%arg0: i32) -> (i32, i32) {
    %c0_i32 = arith.constant 0 : i32
    %c0_i32_0 = arith.constant 0 : i32
    %c0_i32_1 = arith.constant 0 : i32
    return %c0_i32, %c0_i32_0 : i32, i32
  }
  func.func @transform_19(%arg0: i32) -> (i32, i32) {
    %c0_i32 = arith.constant 0 : i32
    %c0_i32_0 = arith.constant 0 : i32
    %c0_i32_1 = arith.constant 0 : i32
    return %c0_i32, %c0_i32_0 : i32, i32
  }
  func.func @transform_20(%arg0: i32) -> (i32, i32) {
    %c0_i32 = arith.constant 0 : i32
    %c0_i32_0 = arith.constant 0 : i32
    %c0_i32_1 = arith.constant 0 : i32
    return %c0_i32, %c0_i32_0 : i32, i32
  }
  func.func @transform_21(%arg0: i32) -> (i32, i32) {
    %c0_i32 = arith.constant 0 : i32
    %c0_i32_0 = arith.constant 0 : i32
    %c0_i32_1 = arith.constant 0 : i32
    return %c0_i32, %c0_i32_0 : i32, i32
  }
  func.func @transform_22(%arg0: i32) -> (i32, i32) {
    %c0_i32 = arith.constant 0 : i32
    %c0_i32_0 = arith.constant 0 : i32
    %c0_i32_1 = arith.constant 0 : i32
    return %c0_i32, %c0_i32_0 : i32, i32
  }
  func.func @transform_23(%arg0: i32) -> (i32, i32) {
    %c0_i32 = arith.constant 0 : i32
    %c0_i32_0 = arith.constant 0 : i32
    %c0_i32_1 = arith.constant 0 : i32
    return %c0_i32, %c0_i32_0 : i32, i32
  }
  func.func @transform_24(%arg0: i32) -> (i32, i32) {
    %c0_i32 = arith.constant 0 : i32
    %c0_i32_0 = arith.constant 0 : i32
    %c0_i32_1 = arith.constant 0 : i32
    return %c0_i32, %c0_i32_0 : i32, i32
  }
  func.func @transform_25(%arg0: i32) -> (i32, i32) {
    %c0_i32 = arith.constant 0 : i32
    %c0_i32_0 = arith.constant 0 : i32
    %c0_i32_1 = arith.constant 0 : i32
    return %c0_i32, %c0_i32_0 : i32, i32
  }
  func.func @transform_26(%arg0: i32) -> (i32, i32) {
    %c0_i32 = arith.constant 0 : i32
    %c0_i32_0 = arith.constant 0 : i32
    %c0_i32_1 = arith.constant 0 : i32
    return %c0_i32, %c0_i32_0 : i32, i32
  }
}

</mosaic_0001>

<bundles_post_ra>
// kernel: vitrqfc_forward.1
= control target key start
LH: loop header
LB: loop body
LE: loop exit
PB: predicated region body
PF: predicated region fallthrough
CT: control target
= control target key end

     0   :  { %s3427_s0 = inlined_call_operand.vmem [shape: f32[10,192], index: 0, kind: input, shape index: {}]   ;;  %s3428_s1 = inlined_call_operand.vmem [shape: f32[10,32], index: 1, kind: input, shape index: {}]   ;;  %s3429_s2 = inlined_call_operand.vmem [shape: f32[192,32], index: 2, kind: input, shape index: {}]   ;;  %s3430_s3 = inlined_call_operand.vmem [shape: f32[10,10], index: 3, kind: input, shape index: {}]   ;;  %s3431_s4 = inlined_call_operand.vmem [shape: f32[2,1,32], index: 4, kind: input, shape index: {}]   ;;  %s3432_s5 = inlined_call_operand.vmem [shape: f32[2,1,32], index: 5, kind: input, shape index: {}]   ;;  %s3433_s6 = inlined_call_operand.vmem [shape: f32[2,32,96], index: 6, kind: input, shape index: {}]   ;;  %s3434_s7 = inlined_call_operand.vmem [shape: f32[2,1,96], index: 7, kind: input, shape index: {}]   ;;  %s3435_s8 = inlined_call_operand.vmem [shape: f32[2,32,32], index: 8, kind: input, shape index: {}]   ;;  %s3436_s9 = inlined_call_operand.vmem [shape: f32[2,1,32], index: 9, kind: input, shape index: {}]   ;;  %s3437_s10 = inlined_call_operand.vmem [shape: f32[2,1,32], index: 10, kind: input, shape index: {}]   ;;  %s3438_s11 = inlined_call_operand.vmem [shape: f32[2,1,32], index: 11, kind: input, shape index: {}]   ;;  %s3439_s12 = inlined_call_operand.vmem [shape: f32[2,32,128], index: 12, kind: input, shape index: {}]   ;;  %s3440_s13 = inlined_call_operand.vmem [shape: f32[2,1,128], index: 13, kind: input, shape index: {}]   ;;  %s3441_s14 = inlined_call_operand.vmem [shape: f32[2,128,32], index: 14, kind: input, shape index: {}]   ;;  %s3442_s15 = inlined_call_operand.vmem [shape: f32[2,1,32], index: 15, kind: input, shape index: {}]   ;;  %s3443_s16 = inlined_call_operand.vmem [shape: f32[1,32], index: 16, kind: input, shape index: {}]   ;;  %s3444_s17 = inlined_call_operand.vmem [shape: f32[1,32], index: 17, kind: input, shape index: {}]   ;;  %s3445_s18 = inlined_call_operand.vmem [shape: f32[32,10], index: 18, kind: input, shape index: {}]   ;;  %s3446_s19 = inlined_call_operand.vmem [shape: f32[1,10], index: 19, kind: input, shape index: {}]   ;;  %s3447_s20 = inlined_call_operand.vmem [shape: f32[32,10], index: 20, kind: input, shape index: {}]   ;;  %s3448_s21 = inlined_call_operand.vmem [shape: f32[1,10], index: 21, kind: input, shape index: {}]   ;;  %s3449_s22 = inlined_call_operand.vmem [shape: f32[4,32], index: 22, kind: input, shape index: {}]   ;;  %s3450_s23 = inlined_call_operand.hbm [shape: f32[2,32], index: 23, kind: output, shape index: {0}]   ;;  %s3451_s24 = inlined_call_operand.hbm [shape: f32[2,10], index: 24, kind: output, shape index: {1}]   ;;  %s3452_s25 = inlined_call_operand.vmem [shape: f32[1,2], index: 25, kind: output, shape index: {2}]   ;;  %s3453_s26 = inlined_call_operand.vmem [shape: f32[4,10], index: 26, kind: output, shape index: {3}]  }
   0x1   :  { %3493 = sst [smem:[#allocation8_spill]] %s3427_s0 }
   0x2   :  { %3494 = sst [smem:[#allocation9_spill]] %s3428_s1 }
   0x3   :  { %3495 = sst [smem:[#allocation10_spill]] %s3429_s2 }
   0x4   :  { %3496 = sst [smem:[#allocation11_spill]] %s3430_s3 }
   0x5   :  { %3497 = sst [smem:[#allocation12_spill]] %s3431_s4 }
   0x6   :  { %3498 = sst [smem:[#allocation13_spill]] %s3432_s5 }
   0x7   :  { %3499 = sst [smem:[#allocation14_spill]] %s3433_s6 }
   0x8   :  { %3500 = sst [smem:[#allocation15_spill]] %s3434_s7 }
   0x9   :  { %3501 = sst [smem:[#allocation16_spill]] %s3435_s8 }
   0xa   :  { %3502 = sst [smem:[#allocation17_spill]] %s3436_s9 }
   0xb   :  { %3503 = sst [smem:[#allocation18_spill]] %s3437_s10 }
   0xc   :  { %3504 = sst [smem:[#allocation19_spill]] %s3448_s21 }
   0xd   :  { %3505 = sst [smem:[#allocation20_spill]] %s3452_s25 }
   0xe   :  { %3506 = sst [smem:[#allocation21_spill]] %s3453_s26 }
   0xf   :  { %32 = vsyncpa [#allocation3], 0  ;;  %s3507_s7 = sld [smem:[#allocation10_spill]] }
  0x15   :  { %v101_v0 = vld [vmem:[%s3507_s7 + $0x78] sm:$0xff]  ;;  %v100_v1 = vld [vmem:[%s3507_s7 + $0x70] sm:$0xff]  ;;  %v99_v2 = vld [vmem:[%s3507_s7 + $0x68] sm:$0xff] }
  0x16   :  { %119 = vmatpush.msra.mxu0 %v101_v0  ;;  %v98_v3 = vld [vmem:[%s3507_s7 + $0x60] sm:$0xff]  ;;  %v109_v4 = vld [vmem:[%s3507_s7 + $0xb8] sm:$0xff]  ;;  %v108_v5 = vld [vmem:[%s3507_s7 + $0xb0] sm:$0xff] }
  0x17   :  { %2279 = vmatpush.msra.mxu1 %v109_v4  ;;  %v97_v6 = vld [vmem:[%s3507_s7 + $0x58] sm:$0xff]  ;;  %v107_v7 = vld [vmem:[%s3507_s7 + $0xa8] sm:$0xff]  ;;  %v96_v8 = vld [vmem:[%s3507_s7 + $0x50] sm:$0xff] }
  0x18   :  { %120 = vmatpush.msra.mxu0 %v100_v1  ;;  %v106_v9 = vld [vmem:[%s3507_s7 + $0xa0] sm:$0xff]  ;;  %v95_v10 = vld [vmem:[%s3507_s7 + $0x48] sm:$0xff]  ;;  %v105_v11 = vld [vmem:[%s3507_s7 + $0x98] sm:$0xff] }
  0x19   :  { %2280 = vmatpush.msra.mxu1 %v108_v5  ;;  %v94_v12 = vld [vmem:[%s3507_s7 + $0x40] sm:$0xff]  ;;  %v104_v13 = vld [vmem:[%s3507_s7 + $0x90] sm:$0xff]  ;;  %v93_v14 = vld [vmem:[%s3507_s7 + $0x38] sm:$0xff] }
  0x1a   :  { %121 = vmatpush.msra.mxu0 %v99_v2  ;;  %v103_v15 = vld [vmem:[%s3507_s7 + $0x88] sm:$0xff]  ;;  %v92_v16 = vld [vmem:[%s3507_s7 + $0x30] sm:$0xff]  ;;  %v102_v17 = vld [vmem:[%s3507_s7 + $0x80] sm:$0xff] }
  0x1b   :  { %2281 = vmatpush.msra.mxu1 %v107_v7 }
  0x1c   :  { %122 = vmatpush.msra.mxu0 %v98_v3 }
  0x1d   :  { %2282 = vmatpush.msra.mxu1 %v106_v9 }
  0x1e   :  { %123 = vmatpush.msra.mxu0 %v97_v6 }
  0x1f   :  { %2283 = vmatpush.msra.mxu1 %v105_v11 }
  0x20   :  { %124 = vmatpush.msra.mxu0 %v96_v8 }
  0x21   :  { %2284 = vmatpush.msra.mxu1 %v104_v13 }
  0x22   :  { %125 = vmatpush.msra.mxu0 %v95_v10 }
  0x24   :  { %126 = vmatpush.msra.mxu0 %v94_v12 }
  0x25   :  { %33 = vsyncpa [#allocation5], 0  ;;  %2285 = vmatpush.msra.mxu1 %v103_v15  ;;  %s3508_s5 = sld [smem:[#allocation8_spill]]  ;;  %vm112_vm0 = vcmask 523264   ;;  %v91_v19 = vld [vmem:[%s3507_s7 + $0x28] sm:$0xff]  ;;  %v90_v20 = vld [vmem:[%s3507_s7 + $0x20] sm:$0xff] }
  0x26   :  { %127 = vmatpush.msra.mxu0 %v93_v14  ;;  %v89_v21 = vld [vmem:[%s3507_s7 + $0x18] sm:$0xff]  ;;  %v88_v22 = vld [vmem:[%s3507_s7 + $0x10] sm:$0xff]  ;;  %v87_v23 = vld [vmem:[%s3507_s7 + $0x8] sm:$0xff]  ;;  %s3509_s8 = sld [smem:[#allocation9_spill]]  ;;  %vm167_vm1 = vcmask 261120   ;;  %vm171_vm2 = vcmask 254976  }
  0x27   :  { %2286 = vmatpush.msra.mxu1 %v102_v17  ;;  %v86_v24 = vld [vmem:[%s3507_s7] sm:$0xff]  ;;  %v2474_v40 = vmov 32.0   ;;  %s3510_s9 = sld [smem:[#allocation14_spill]]  ;;  %s3489_s2 = smov 96   ;;  %vm273_vm10 = vcmask 64512   ;;  %vm309_vm11 = vcmask 80896  }
  0x28   :  { %128 = vmatpush.msra.mxu0 %v92_v16  ;;  %2328 = vrcp.f32 %v2474_v40  ;;  %s3511_s28 = sld [smem:[#allocation12_spill]]  ;;  %vm313_vm12 = vcmask 74752   ;;  %s3479_s3 = smov 64   ;;  %vm370_vm13 = vcmask 1041408  }
  0x29   :  { %s3512_s29 = sld [smem:[#allocation13_spill]]  ;;  %s3477_s4 = smov 80  }
  0x2a   :  { %129 = vmatpush.msra.mxu0 %v91_v19  ;;  %s3513_s30 = sld [smem:[#allocation15_spill]]  ;;  %s3485_s0 = smov 120  }
  0x2b   :  { %v85_v18 = vld [vmem:[%s3508_s5 + $0x18] sm:$0x3]  ;;  %v82_v25 = vld [vmem:[%s3508_s5] sm:$0xff]  ;;  %v84_v26 = vld [vmem:[%s3508_s5 + $0x10] sm:$0x3]  ;;  %s3514_s1 = sld [smem:[#allocation11_spill]] }
  0x2c   :  { %2168 = vmatmul.msk.f32.vlgmr.msra.gmra.mxu1 %vm112_vm0, %v85_v18  ;;  %130 = vmatpush.msra.mxu0 %v90_v20  ;;  %v83_v27 = vld [vmem:[%s3508_s5 + $0x8] sm:$0xff]  ;;  %v110_v30 = vld [vmem:[%s3509_s8] sm:$0xff]  ;;  %s3473_s5 = smov 112   ;;  %s3475_s10 = smov 72  }
  0x2d   :  { %v111_v32 = vld [vmem:[%s3509_s8 + $0x8] sm:$0x3]  ;;  %v233_v57 = vld [vmem:[%s3510_s9 + $0x18] sm:$0xff]  ;;  %v232_v58 = vld [vmem:[%s3510_s9 + $0x10] sm:$0xff]  ;;  %s3483_s8 = smov 88   ;;  %s3465_s6 = smov 104  }
  0x2e   :  { %131 = vmatpush.msra.mxu0 %v89_v21  ;;  %v2329_v41 = vpop.eup %2328  ;;  %256 = vmatpush.msra.mxu2 %v233_v57  ;;  %v231_v59 = vld [vmem:[%s3510_s9 + $0x8] sm:$0xff]  ;;  %v230_v60 = vld [vmem:[%s3510_s9] sm:$0xff]  ;;  %s3471_s7 = smov 56   ;;  %s3469_s27 = smov 48  }
  0x2f   :  { %v176_v42 = vmul.f32 32.0, %v2329_v41  ;;  %vm180_vm3 = vweird.f32 %v2329_v41  ;;  %s3526_s26 = smov 56   ;;  %s3534_s21 = sld [smem:[#allocation20_spill]] }
  0x30   :  { %132 = vmatpush.msra.mxu0 %v88_v22  ;;  %257 = vmatpush.msra.mxu2 %v232_v58 }
  0x31   :  { %v177_v43 = vsub.f32 1.0, %v176_v42  ;;  %v2783_v40 = vld [vmem:[%s3514_s1 + $0x8] sm:$0x3] }
  0x32   :  { %133 = vmatpush.msra.mxu0 %v87_v23  ;;  %258 = vmatpush.msra.mxu2 %v231_v59 }
  0x33   :  { %v178_v44 = vmul.f32 %v2329_v41, %v177_v43 }
  0x34   :  { %134 = vmatpush.msra.mxu0 %v86_v24  ;;  %259 = vmatpush.msra.mxu2 %v230_v60 }
  0x35   :  { %135 = vmatmul.f32.vlgmr.msra.gmra.mxu0 %v82_v25  ;;  %v179_v45 = vadd.f32 %v2329_v41, %v178_v44 }
  0x36   :  { %150 = vmatpush.msrb.mxu0 %v109_v4 }
  0x37   :  { %v2726_v46 = vsel %vm180_vm3, %v2329_v41, %v179_v45 }
  0x38   :  { %151 = vmatpush.msrb.mxu0 %v108_v5 }
  0x3a   :  { %152 = vmatpush.msrb.mxu0 %v107_v7 }
  0x3c   :  { %153 = vmatpush.msrb.mxu0 %v106_v9 }
  0x3d   :  { %138 = vmatmul.f32.gmra.mxu0 %v84_v26  ;;  %v2310_v26 = vld [vmem:[%s3513_s30] ss:$0 sm:$0xff] }
  0x3e   :  { %154 = vmatpush.msrb.mxu0 %v105_v11  ;;  %v2308_v11 = vld [vmem:[%s3511_s28] ss:$0 sm:$0xff] }
  0x40   :  { %155 = vmatpush.msrb.mxu0 %v104_v13 }
  0x42   :  { %156 = vmatpush.msrb.mxu0 %v103_v15  ;;  %v2309_v15 = vld [vmem:[%s3512_s29] ss:$0 sm:$0xff] }
  0x44   :  { %157 = vmatpush.msrb.mxu0 %v102_v17 }
  0x45   :  { %2167 = vmatmul.msk.f32.vlgmr.msrb.gmra.mxu0 %vm112_vm0, %v83_v27 }
  0xa9   :  { %v162_v37 = vpop.f32.mrf.mxu1 }
  0xb2   :  { %v136_v28 = vpop.f32.mrf.mxu0 }
  0xb3   :  { %v137_v31 = vadd.f32 %v136_v28, %v110_v30 }
  0xba   :  { %v139_v29 = vpop.f32.mrf.mxu0 }
  0xbb   :  { %v140_v35 = vadd.f32 %v139_v29, %v111_v32 }
  0xbd   :  { %v2722_v38 = vadd.f32 %v162_v37, %v140_v35 }
  0xbf   :  { %v172_v39 = vsel %vm171_vm2, %v2722_v38, 0.0 }
  0xc2   :  { %v159_v33 = vpop.f32.mrf.mxu0 }
  0xc3   :  { %v2718_v34 = vadd.f32 %v159_v33, %v137_v31  ;;  %v2776_v33 = vld [vmem:[%s3514_s1] sm:$0xff] }
  0xc5   :  { %v168_v36 = vsel %vm167_vm1, %v2718_v34, 0.0 }
  0xc6   :  { %169 = vadd.xlane.f32.xlu0 %v168_v36 }
  0xce   :  { %173 = vadd.xlane.f32.xlu0 %v172_v39 }
 0x139   :  { %v170_v47 = vpop.xlane.xlu0 %169 }
 0x13a   :  { %v182_v48 = vmul.f32 %v2726_v46, %v170_v47 }
 0x13c   :  { %v184_v49 = vsub.f32 %v2718_v34, %v182_v48 }
 0x13e   :  { %v186_v50 = vmul.f32 %v184_v49, %v184_v49 }
 0x140   :  { %v188_v51 = vsel %vm167_vm1, %v186_v50, 0.0 }
 0x141   :  { %189 = vadd.xlane.f32.xlu1 %v188_v51  ;;  %v174_v52 = vpop.xlane.xlu0 %173 }
 0x142   :  { %v183_v53 = vmul.f32 %v2726_v46, %v174_v52 }
 0x144   :  { %v185_v54 = vsub.f32 %v2722_v38, %v183_v53 }
 0x146   :  { %v187_v55 = vmul.f32 %v185_v54, %v185_v54 }
 0x148   :  { %v191_v56 = vsel %vm171_vm2, %v187_v55, 0.0 }
 0x149   :  { %192 = vadd.xlane.f32.xlu1 %v191_v56 }
 0x1b4   :  { %v190_v61 = vpop.xlane.xlu1 %189 }
 0x1b5   :  { %v194_v62 = vmul.f32 %v190_v61, %v2726_v46 }
 0x1b7   :  { %v196_v63 = vadd.f32 1e-06, %v194_v62 }
 0x1b9   :  { %2330 = vrsqrt.f32 %v196_v63  ;;  %vm204_vm5 = vweird.f32 %v196_v63 }
 0x1bc   :  { %v193_v0 = vpop.xlane.xlu1 %192 }
 0x1bd   :  { %v195_v1 = vmul.f32 %v193_v0, %v2726_v46 }
 0x1bf   :  { %v2331_v2 = vpop.eup %2330  ;;  %v197_v3 = vadd.f32 1e-06, %v195_v1 }
 0x1c0   :  { %v199_v4 = vmul.f32 %v2331_v2, %v196_v63  ;;  %vm205_vm4 = vweird.f32 %v2331_v2 }
 0x1c1   :  { %2332 = vrsqrt.f32 %v197_v3  ;;  %vm206_vm6 = vmor %vm204_vm5, %vm205_vm4  ;;  %vm214_vm8 = vweird.f32 %v197_v3 }
 0x1c2   :  { %v200_v5 = vmul.f32 %v2331_v2, %v199_v4 }
 0x1c4   :  { %v201_v6 = vmul.f32 0.5, %v200_v5 }
 0x1c6   :  { %v202_v7 = vsub.f32 1.5, %v201_v6 }
 0x1c7   :  { %v2333_v8 = vpop.eup %2332 }
 0x1c8   :  { %v203_v9 = vmul.f32 %v2331_v2, %v202_v7  ;;  %v209_v10 = vmul.f32 %v2333_v8, %v197_v3  ;;  %vm215_vm7 = vweird.f32 %v2333_v8 }
 0x1c9   :  { %vm216_vm9 = vmor %vm214_vm8, %vm215_vm7 }
 0x1ca   :  { %v207_v12 = vsel %vm206_vm6, %v2331_v2, %v203_v9  ;;  %v210_v13 = vmul.f32 %v2333_v8, %v209_v10 }
 0x1cb   :  { %v218_v14 = vmul.f32 %v207_v12, %v184_v49 }
 0x1cc   :  { %v211_v16 = vmul.f32 0.5, %v210_v13 }
 0x1cd   :  { %v223_v17 = vmul.f32 %v2308_v11, %v218_v14 }
 0x1ce   :  { %v212_v18 = vsub.f32 1.5, %v211_v16 }
 0x1cf   :  { %v228_v19 = vadd.f32 %v2309_v15, %v223_v17 }
 0x1d0   :  { %v213_v20 = vmul.f32 %v2333_v8, %v212_v18 }
 0x1d1   :  { %2169 = vmatmul.msk.f32.vlgmr.msra.gmra.mxu2 %vm167_vm1, %v228_v19 }
 0x1d2   :  { %v217_v21 = vsel %vm216_vm9, %v2333_v8, %v213_v20 }
 0x1d3   :  { %v219_v22 = vmul.f32 %v217_v21, %v185_v54 }
 0x1d5   :  { %v224_v23 = vmul.f32 %v2308_v11, %v219_v22 }
 0x1d7   :  { %v229_v24 = vadd.f32 %v2309_v15, %v224_v23 }
 0x1d9   :  { %2170 = vmatmul.msk.f32.gmra.mxu2 %vm167_vm1, %v229_v24 }
 0x254   :  { %v261_v25 = vpop.f32.mrf.mxu2 }
 0x255   :  { %v2763_v29 = vadd.f32 %v2310_v26, %v261_v25 }
 0x25c   :  { %v264_v27 = vpop.f32.mrf.mxu2 }
 0x25d   :  { %v2759_v28 = vadd.f32 %v2310_v26, %v264_v27 }
 0x25f   :  { %271 = vrot.lane.b32.xlu2 %v2759_v28, %s3489_s2 }
 0x267   :  { %269 = vrot.lane.b32.xlu2 %v2763_v29, %s3489_s2  ;;  %s3523_s2 = smov 72  }
 0x2b9   :  { %v272_v30 = vpop.permute.xlu2 %271 }
 0x2ba   :  { %2171 = vmatpush.xpose.msk.msra.mxu3 %vm273_vm10, %v272_v30 }
 0x2c1   :  { %v270_v31 = vpop.permute.xlu2 %269 }
 0x2c2   :  { %2172 = vmatpush.xpose.msk.msra.mxu3 %vm273_vm10, %v270_v31 }
 0x2c5   :  { %2173 = vmatmul.msk.f32.vlgmr.msra.gmra.mxu3 %vm273_vm10, %v2763_v29 }
 0x2cd   :  { %2174 = vmatmul.msk.f32.gmra.mxu3 %vm273_vm10, %v2759_v28 }
 0x348   :  { %v299_v32 = vpop.f32.mrf.mxu3 }
 0x349   :  { %v305_v35 = vmul.f32 0.35355338, %v299_v32 }
 0x34b   :  { %v307_v36 = vadd.f32 %v305_v35, %v2776_v33 }
 0x34d   :  { %v310_v37 = vsel %vm309_vm11, %v307_v36, -inf }
 0x34e   :  { %311 = vmax.xlane.f32.xlu0 %v310_v37 }
 0x350   :  { %v302_v39 = vpop.f32.mrf.mxu3 }
 0x351   :  { %v306_v41 = vmul.f32 0.35355338, %v302_v39 }
 0x353   :  { %v308_v42 = vadd.f32 %v306_v41, %v2783_v40 }
 0x355   :  { %v314_v43 = vsel %vm313_vm12, %v308_v42, -inf }
 0x356   :  { %315 = vmax.xlane.f32.xlu1 %v314_v43 }
 0x362   :  { %359 = vrot.lane.b32.xlu0 %v2763_v29, %s3479_s3 }
 0x36a   :  { %400 = vrot.lane.b32.xlu0 %v2763_v29, %s3483_s8 }
 0x36f   :  { %361 = vrot.lane.b32.xlu1 %v2759_v28, %s3479_s3  ;;  %s3524_s3 = smov 112  }
 0x372   :  { %527 = vrot.lane.b32.xlu0 %v2763_v29, %s3477_s4 }
 0x377   :  { %402 = vrot.lane.b32.xlu1 %v2759_v28, %s3483_s8  ;;  %s3516_s8 = sld [smem:[#allocation17_spill]] }
 0x37a   :  { %523 = vrot.lane.b32.xlu0 %v2763_v29, %s3473_s5 }
 0x37f   :  { %396 = vrot.lane.b32.xlu1 %v2763_v29, %s3485_s0 }
 0x387   :  { %398 = vrot.lane.b32.xlu1 %v2759_v28, %s3485_s0  ;;  %s3517_s0 = sld [smem:[#allocation18_spill]] }
 0x38f   :  { %656 = vrot.lane.b32.xlu1 %v2759_v28, %s3475_s10 }
 0x397   :  { %654 = vrot.lane.b32.xlu1 %v2763_v29, %s3475_s10  ;;  %s3519_s10 = smov 120  }
 0x3c1   :  { %v312_v44 = vpop.xlane.xlu0 %311 }
 0x3c2   :  { %v317_v45 = vsub.f32 %v307_v36, %v312_v44 }
 0x3c4   :  { %v319_v47 = vmul.f32 1.442695, %v317_v45 }
 0x3c6   :  { %2334 = vpow2.f32 %v319_v47 }
 0x3c9   :  { %v316_v48 = vpop.xlane.xlu1 %315 }
 0x3ca   :  { %v318_v49 = vsub.f32 %v308_v42, %v316_v48 }
 0x3cc   :  { %v2335_v50 = vpop.eup %2334  ;;  %v321_v51 = vmul.f32 1.442695, %v318_v49 }
 0x3cd   :  { %v323_v52 = vsel %vm309_vm11, %v2335_v50, 0.0 }
 0x3ce   :  { %2336 = vpow2.f32 %v321_v51  ;;  %324 = vadd.xlane.f32.xlu2 %v323_v52 }
 0x3d4   :  { %v2808_v53 = vpop.eup %2336  ;;  %v360_v56 = vpop.permute.xlu0 %359 }
 0x3d5   :  { %v326_v54 = vsel %vm313_vm12, %v2808_v53, 0.0 }
 0x3d6   :  { %327 = vadd.xlane.f32.xlu0 %v326_v54 }
 0x3dc   :  { %v401_v58 = vpop.permute.xlu0 %400 }
 0x3e1   :  { %v362_v55 = vpop.permute.xlu1 %361 }
 0x3e2   :  { %2175 = vmatpush.msk.msrb.mxu2 %vm370_vm13, %v362_v55 }
 0x3e4   :  { %388 = vmatpush.msrb.mxu2 %v360_v56  ;;  %v528_v63 = vpop.permute.xlu0 %527 }
 0x3e6   :  { %529 = vrot.lane.b32.xlu2 %v2759_v28, %s3477_s4  ;;  %s3515_s4 = sld [smem:[#allocation16_spill]] }
 0x3e9   :  { %v403_v57 = vpop.permute.xlu1 %402 }
 0x3ea   :  { %2178 = vmatpush.xpose.msk.msrb.mxu3 %vm273_vm10, %v403_v57  ;;  %525 = vrot.lane.b32.xlu0 %v2759_v28, %s3473_s5  ;;  %s3528_s5 = smov 40  }
 0x3ec   :  { %v524_v0 = vpop.permute.xlu0 %523 }
 0x3ee   :  { %650 = vrot.lane.b32.xlu2 %v2763_v29, %s3465_s6  ;;  %2179 = vmatpush.xpose.msk.msrb.mxu3 %vm273_vm10, %v401_v58 }
 0x3f1   :  { %v397_v59 = vpop.permute.xlu1 %396 }
 0x3f2   :  { %652 = vrot.lane.b32.xlu0 %v2759_v28, %s3465_s6  ;;  %2180 = vmatmul.msk.f32.vlgmr.msrb.gmra.mxu3 %vm273_vm10, %v397_v59  ;;  %s3467_s6 = smov 40  }
 0x3f9   :  { %v399_v60 = vpop.permute.xlu1 %398 }
 0x3fa   :  { %2181 = vmatmul.msk.f32.gmra.mxu3 %vm273_vm10, %v399_v60 }
 0x401   :  { %v657_v61 = vpop.permute.xlu1 %656 }
 0x402   :  { %2192 = vmatpush.xpose.msk.msra.mxu0 %vm273_vm10, %v657_v61 }
 0x409   :  { %v655_v62 = vpop.permute.xlu1 %654 }
 0x40a   :  { %2193 = vmatpush.xpose.msk.msra.mxu0 %vm273_vm10, %v655_v62 }
 0x441   :  { %v325_v1 = vpop.xlane.xlu2 %324 }
 0x442   :  { %2338 = vrcp.f32 %v325_v1  ;;  %v340_v7 = vand.u32 2147483648, %v325_v1  ;;  %v338_v9 = vand.u32 2147483647, %v325_v1  ;;  %vm334_vm15 = vweird.f32 %v325_v1 }
 0x444   :  { %v341_v12 = vor.u32 1.1754944e-38, %v340_v7  ;;  %vm339_vm3 = vcmp.eq.f32.partialorder %v338_v9, 8.507059e+37 }
 0x448   :  { %v2339_v2 = vpop.eup %2338 }
 0x449   :  { %v330_v3 = vmul.f32 %v2339_v2, %v325_v1  ;;  %v530_v4 = vpop.permute.xlu2 %529  ;;  %v328_v5 = vpop.xlane.xlu0 %327  ;;  %vm335_vm14 = vweird.f32 %v2339_v2 }
 0x44a   :  { %2340 = vrcp.f32 %v328_v5  ;;  %2185 = vmatpush.xpose.msk.msra.mxu2 %vm273_vm10, %v530_v4  ;;  %vm336_vm0 = vmor %vm334_vm15, %vm335_vm14  ;;  %v355_v19 = vand.u32 2147483648, %v328_v5  ;;  %v353_v21 = vand.u32 2147483647, %v328_v5  ;;  %vm349_vm5 = vweird.f32 %v328_v5 }
 0x44b   :  { %v331_v6 = vsub.f32 1.0, %v330_v3 }
 0x44c   :  { %v356_v23 = vor.u32 1.1754944e-38, %v355_v19  ;;  %vm354_vm7 = vcmp.eq.f32.partialorder %v353_v21, 8.507059e+37 }
 0x44d   :  { %v332_v8 = vmul.f32 %v2339_v2, %v331_v6 }
 0x44e   :  { %2186 = vmatpush.xpose.msk.msra.mxu2 %vm273_vm10, %v528_v63 }
 0x44f   :  { %v333_v10 = vadd.f32 %v2339_v2, %v332_v8 }
 0x450   :  { %v2341_v11 = vpop.eup %2340 }
 0x451   :  { %v345_v13 = vmul.f32 %v2341_v11, %v328_v5  ;;  %v651_v14 = vpop.permute.xlu2 %650  ;;  %v337_v15 = vsel %vm336_vm0, %v2339_v2, %v333_v10  ;;  %vm350_vm4 = vweird.f32 %v2341_v11 }
 0x452   :  { %2194 = vmatmul.msk.f32.vlgmr.msra.gmra.mxu0 %vm273_vm10, %v651_v14  ;;  %v342_v16 = vsel %vm339_vm3, %v341_v12, %v337_v15  ;;  %vm351_vm6 = vmor %vm349_vm5, %vm350_vm4 }
 0x453   :  { %v346_v17 = vsub.f32 1.0, %v345_v13  ;;  %v343_v18 = vmul.f32 %v2335_v50, %v342_v16 }
 0x455   :  { %v347_v20 = vmul.f32 %v2341_v11, %v346_v17  ;;  %2176 = vmatmul.msk.f32.vlgmr.msrb.gmra.mxu2 %vm309_vm11, %v343_v18 }
 0x457   :  { %v348_v22 = vadd.f32 %v2341_v11, %v347_v20 }
 0x459   :  { %v352_v24 = vsel %vm351_vm6, %v2341_v11, %v348_v22 }
 0x45a   :  { %v357_v25 = vsel %vm354_vm7, %v356_v23, %v352_v24 }
 0x45b   :  { %v358_v26 = vmul.f32 %v2808_v53, %v357_v25 }
 0x45c   :  { %v526_v27 = vpop.permute.xlu0 %525 }
 0x45d   :  { %2177 = vmatmul.msk.f32.gmra.mxu2 %vm309_vm11, %v358_v26 }
 0x464   :  { %v653_v30 = vpop.permute.xlu0 %652 }
 0x465   :  { %2187 = vmatmul.msk.f32.vlgmr.msra.gmra.mxu2 %vm273_vm10, %v524_v0  ;;  %2195 = vmatmul.msk.f32.gmra.mxu0 %vm273_vm10, %v653_v30 }
 0x46d   :  { %2188 = vmatmul.msk.f32.gmra.mxu2 %vm273_vm10, %v526_v27 }
 0x475   :  { %v429_v31 = vpop.f32.mrf.mxu3 }
 0x476   :  { %v435_v32 = vmul.f32 0.35355338, %v429_v31 }
 0x478   :  { %v437_v35 = vadd.f32 %v435_v32, %v2776_v33 }
 0x47a   :  { %v439_v36 = vsel %vm309_vm11, %v437_v35, -inf }
 0x47b   :  { %440 = vmax.xlane.f32.xlu1 %v439_v36 }
 0x47d   :  { %v432_v37 = vpop.f32.mrf.mxu3 }
 0x47e   :  { %v436_v39 = vmul.f32 0.35355338, %v432_v37 }
 0x480   :  { %v438_v41 = vadd.f32 %v436_v39, %v2783_v40 }
 0x482   :  { %v442_v42 = vsel %vm313_vm12, %v438_v41, -inf }
 0x483   :  { %443 = vmax.xlane.f32.xlu2 %v442_v42 }
 0x4cf   :  { %v683_v43 = vpop.f32.mrf.mxu0 }
 0x4d0   :  { %v689_v44 = vmul.f32 0.35355338, %v683_v43 }
 0x4d2   :  { %v691_v45 = vadd.f32 %v689_v44, %v2776_v33 }
 0x4d4   :  { %v693_v47 = vsel %vm309_vm11, %v691_v45, -inf }
 0x4d5   :  { %694 = vmax.xlane.f32.xlu2 %v693_v47 }
 0x4d8   :  { %v2842_v48 = vpop.f32.mrf.mxu2 }
 0x4e0   :  { %v2844_v49 = vpop.f32.mrf.mxu2 }
 0x4e2   :  { %v686_v52 = vpop.f32.mrf.mxu0 }
 0x4e3   :  { %v690_v54 = vmul.f32 0.35355338, %v686_v52 }
 0x4e5   :  { %v692_v61 = vadd.f32 %v690_v54, %v2783_v40 }
 0x4e7   :  { %v696_v0 = vsel %vm313_vm12, %v692_v61, -inf }
 0x4e8   :  { %v556_v50 = vpop.f32.mrf.mxu2 }
 0x4e9   :  { %v562_v51 = vmul.f32 0.35355338, %v556_v50 }
 0x4eb   :  { %v564_v53 = vadd.f32 %v562_v51, %v2776_v33 }
 0x4ed   :  { %v566_v55 = vsel %vm309_vm11, %v564_v53, -inf }
 0x4ee   :  { %v441_v56 = vpop.xlane.xlu1 %440  ;;  %567 = vmax.xlane.f32.xlu0 %v566_v55 }
 0x4ef   :  { %v445_v57 = vsub.f32 %v437_v35, %v441_v56 }
 0x4f0   :  { %v559_v58 = vpop.f32.mrf.mxu2 }
 0x4f1   :  { %v447_v59 = vmul.f32 1.442695, %v445_v57  ;;  %v563_v60 = vmul.f32 0.35355338, %v559_v58 }
 0x4f3   :  { %2342 = vpow2.f32 %v447_v59  ;;  %v565_v62 = vadd.f32 %v563_v60, %v2783_v40 }
 0x4f5   :  { %v569_v63 = vsel %vm313_vm12, %v565_v62, -inf }
 0x4f6   :  { %v444_v1 = vpop.xlane.xlu2 %443  ;;  %570 = vmax.xlane.f32.xlu1 %v569_v63  ;;  %697 = vmax.xlane.f32.xlu0 %v696_v0 }
 0x4f7   :  { %v446_v33 = vsub.f32 %v438_v41, %v444_v1 }
 0x4f9   :  { %v2852_v2 = vpop.eup %2342  ;;  %v449_v3 = vmul.f32 1.442695, %v446_v33 }
 0x4fa   :  { %v451_v4 = vsel %vm309_vm11, %v2852_v2, 0.0 }
 0x4fb   :  { %2344 = vpow2.f32 %v449_v3  ;;  %452 = vadd.xlane.f32.xlu2 %v451_v4 }
 0x501   :  { %v2856_v5 = vpop.eup %2344 }
 0x502   :  { %v454_v40 = vsel %vm313_vm12, %v2856_v5, 0.0 }
 0x503   :  { %455 = vadd.xlane.f32.xlu1 %v454_v40 }
 0x51c   :  { %489 = vrot.lane.b32.xlu1 %v2759_v28, %s3471_s7 }
 0x524   :  { %614 = vrot.lane.b32.xlu1 %v2763_v29, %s3469_s27 }
 0x52c   :  { %741 = vrot.lane.b32.xlu1 %v2763_v29, %s3467_s6 }
 0x548   :  { %v695_v6 = vpop.xlane.xlu2 %694 }
 0x549   :  { %v699_v7 = vsub.f32 %v691_v45, %v695_v6 }
 0x54b   :  { %v701_v8 = vmul.f32 1.442695, %v699_v7 }
 0x54d   :  { %2346 = vpow2.f32 %v701_v8 }
 0x553   :  { %v2866_v9 = vpop.eup %2346 }
 0x554   :  { %v705_v10 = vsel %vm309_vm11, %v2866_v9, 0.0 }
 0x555   :  { %706 = vadd.xlane.f32.xlu2 %v705_v10 }
 0x561   :  { %v568_v11 = vpop.xlane.xlu0 %567 }
 0x562   :  { %v572_v15 = vsub.f32 %v564_v53, %v568_v11 }
 0x564   :  { %v574_v16 = vmul.f32 1.442695, %v572_v15 }
 0x569   :  { %v698_v12 = vpop.xlane.xlu0 %697  ;;  %v571_v17 = vpop.xlane.xlu1 %570 }
 0x56a   :  { %v700_v13 = vsub.f32 %v692_v61, %v698_v12  ;;  %v573_v19 = vsub.f32 %v565_v62, %v571_v17 }
 0x56c   :  { %v703_v14 = vmul.f32 1.442695, %v700_v13  ;;  %v576_v21 = vmul.f32 1.442695, %v573_v19 }
 0x56d   :  { %487 = vrot.lane.b32.xlu2 %v2763_v29, %s3471_s7  ;;  %s3491_s7 = smov 16  }
 0x56e   :  { %2348 = vpow2.f32 %v703_v14  ;;  %v453_v27 = vpop.xlane.xlu2 %452 }
 0x56f   :  { %2350 = vpow2.f32 %v574_v16  ;;  %v468_v42 = vand.u32 2147483648, %v453_v27  ;;  %vm462_vm9 = vweird.f32 %v453_v27  ;;  %v466_v43 = vand.u32 2147483647, %v453_v27 }
 0x570   :  { %2352 = vpow2.f32 %v576_v21 }
 0x571   :  { %2354 = vrcp.f32 %v453_v27  ;;  %v469_v47 = vor.u32 1.1754944e-38, %v468_v42  ;;  %vm467_vm15 = vcmp.eq.f32.partialorder %v466_v43, 8.507059e+37 }
 0x574   :  { %v2872_v18 = vpop.eup %2348 }
 0x575   :  { %743 = vrot.lane.b32.xlu2 %v2759_v28, %s3467_s6  ;;  %v708_v20 = vsel %vm313_vm12, %v2872_v18, 0.0  ;;  %v2878_v22 = vpop.eup %2350  ;;  %s3481_s6 = smov 8  }
 0x576   :  { %709 = vadd.xlane.f32.xlu0 %v708_v20  ;;  %v578_v29 = vsel %vm309_vm11, %v2878_v22, 0.0  ;;  %v2882_v23 = vpop.eup %2352  ;;  %v456_v24 = vpop.xlane.xlu1 %455 }
 0x577   :  { %v581_v25 = vsel %vm313_vm12, %v2882_v23, 0.0  ;;  %v2355_v30 = vpop.eup %2354  ;;  %2356 = vrcp.f32 %v456_v24  ;;  %v483_v53 = vand.u32 2147483648, %v456_v24  ;;  %vm477_vm3 = vweird.f32 %v456_v24 }
 0x578   :  { %v458_v31 = vmul.f32 %v2355_v30, %v453_v27  ;;  %vm463_vm8 = vweird.f32 %v2355_v30  ;;  %v481_v58 = vand.u32 2147483647, %v456_v24 }
 0x579   :  { %vm464_vm14 = vmor %vm462_vm9, %vm463_vm8  ;;  %v484_v61 = vor.u32 1.1754944e-38, %v483_v53 }
 0x57a   :  { %v459_v32 = vsub.f32 1.0, %v458_v31  ;;  %vm482_vm5 = vcmp.eq.f32.partialorder %v481_v58, 8.507059e+37  ;;  %v812_v58 = vld [vmem:[%s3515_s4 + $0x18] sm:$0xff] }
 0x57b   :  { %831 = vmatpush.msrb.mxu2 %v812_v58 }
 0x57c   :  { %v460_v36 = vmul.f32 %v2355_v30, %v459_v32 }
 0x57d   :  { %v2357_v35 = vpop.eup %2356 }
 0x57e   :  { %579 = vadd.xlane.f32.xlu0 %v578_v29  ;;  %v473_v37 = vmul.f32 %v2357_v35, %v456_v24  ;;  %v461_v39 = vadd.f32 %v2355_v30, %v460_v36  ;;  %vm478_vm0 = vweird.f32 %v2357_v35 }
 0x57f   :  { %vm479_vm4 = vmor %vm477_vm3, %vm478_vm0 }
 0x580   :  { %v474_v41 = vsub.f32 1.0, %v473_v37 }
 0x582   :  { %v475_v45 = vmul.f32 %v2357_v35, %v474_v41 }
 0x584   :  { %v476_v51 = vadd.f32 %v2357_v35, %v475_v45 }
 0x586   :  { %582 = vadd.xlane.f32.xlu0 %v581_v25  ;;  %v480_v60 = vsel %vm479_vm4, %v2357_v35, %v476_v51 }
 0x587   :  { %v485_v63 = vsel %vm482_vm5, %v484_v61, %v480_v60  ;;  %v810_v60 = vld [vmem:[%s3515_s4 + $0x8] sm:$0xff]  ;;  %v809_v61 = vld [vmem:[%s3515_s4] sm:$0xff] }
 0x588   :  { %v486_v4 = vmul.f32 %v2856_v5, %v485_v63 }
 0x58e   :  { %v490_v26 = vpop.permute.xlu1 %489 }
 0x58f   :  { %2182 = vmatpush.msk.msrb.mxu1 %vm370_vm13, %v490_v26 }
 0x596   :  { %v2889_v54 = vpop.permute.xlu1 %614 }
 0x59a   :  { %616 = vrot.lane.b32.xlu0 %v2759_v28, %s3469_s27  ;;  %v465_v28 = vsel %vm464_vm14, %v2355_v30, %v461_v39  ;;  %s3487_s27 = smov 24  }
 0x59b   :  { %v470_v50 = vsel %vm467_vm15, %v469_v47, %v465_v28 }
 0x59c   :  { %v471_v57 = vmul.f32 %v2852_v2, %v470_v50 }
 0x59e   :  { %v742_v2 = vpop.permute.xlu1 %741 }
 0x5c8   :  { %v707_v44 = vpop.xlane.xlu2 %706 }
 0x5c9   :  { %2358 = vrcp.f32 %v707_v44  ;;  %v722_v1 = vand.u32 2147483648, %v707_v44  ;;  %vm716_vm7 = vweird.f32 %v707_v44  ;;  %v720_v33 = vand.u32 2147483647, %v707_v44 }
 0x5cb   :  { %v723_v6 = vor.u32 1.1754944e-38, %v722_v1  ;;  %vm721_vm9 = vcmp.eq.f32.partialorder %v720_v33, 8.507059e+37 }
 0x5cf   :  { %v2359_v52 = vpop.eup %2358 }
 0x5d0   :  { %v712_v55 = vmul.f32 %v2359_v52, %v707_v44  ;;  %v488_v56 = vpop.permute.xlu2 %487  ;;  %vm717_vm6 = vweird.f32 %v2359_v52 }
 0x5d1   :  { %515 = vmatpush.msrb.mxu1 %v488_v56  ;;  %vm718_vm8 = vmor %vm716_vm7, %vm717_vm6 }
 0x5d2   :  { %v713_v59 = vsub.f32 1.0, %v712_v55  ;;  %2183 = vmatmul.msk.f32.vlgmr.msrb.gmra.mxu1 %vm309_vm11, %v471_v57 }
 0x5d4   :  { %v714_v62 = vmul.f32 %v2359_v52, %v713_v59  ;;  %v811_v59 = vld [vmem:[%s3515_s4 + $0x10] sm:$0xff] }
 0x5d5   :  { %832 = vmatpush.msrb.mxu2 %v811_v59 }
 0x5d6   :  { %v715_v0 = vadd.f32 %v2359_v52, %v714_v62 }
 0x5d7   :  { %833 = vmatpush.msrb.mxu2 %v810_v60 }
 0x5d8   :  { %v744_v3 = vpop.permute.xlu2 %743  ;;  %v719_v40 = vsel %vm718_vm8, %v2359_v52, %v715_v0 }
 0x5d9   :  { %2196 = vmatpush.msk.msra.mxu1 %vm370_vm13, %v744_v3  ;;  %v724_v7 = vsel %vm721_vm9, %v723_v6, %v719_v40  ;;  %834 = vmatpush.msrb.mxu2 %v809_v61 }
 0x5da   :  { %2184 = vmatmul.msk.f32.gmra.mxu1 %vm309_vm11, %v486_v4  ;;  %v725_v8 = vmul.f32 %v2866_v9, %v724_v7 }
 0x5db   :  { %769 = vmatpush.msra.mxu1 %v742_v2 }
 0x5e2   :  { %2197 = vmatmul.msk.f32.vlgmr.msra.gmra.mxu1 %vm309_vm11, %v725_v8 }
 0x5e9   :  { %v710_v10 = vpop.xlane.xlu0 %709 }
 0x5ea   :  { %2360 = vrcp.f32 %v710_v10  ;;  %v737_v14 = vand.u32 2147483648, %v710_v10  ;;  %v735_v16 = vand.u32 2147483647, %v710_v10  ;;  %vm731_vm15 = vweird.f32 %v710_v10 }
 0x5ec   :  { %v738_v20 = vor.u32 1.1754944e-38, %v737_v14  ;;  %vm736_vm3 = vcmp.eq.f32.partialorder %v735_v16, 8.507059e+37 }
 0x5f0   :  { %v2361_v11 = vpop.eup %2360 }
 0x5f1   :  { %v727_v12 = vmul.f32 %v2361_v11, %v710_v10  ;;  %v580_v5 = vpop.xlane.xlu0 %579  ;;  %vm732_vm14 = vweird.f32 %v2361_v11 }
 0x5f2   :  { %2362 = vrcp.f32 %v580_v5  ;;  %vm733_vm0 = vmor %vm731_vm15, %vm732_vm14  ;;  %v595_v36 = vand.u32 2147483648, %v580_v5  ;;  %vm589_vm5 = vweird.f32 %v580_v5  ;;  %v593_v37 = vand.u32 2147483647, %v580_v5 }
 0x5f3   :  { %v728_v13 = vsub.f32 1.0, %v727_v12 }
 0x5f4   :  { %v596_v42 = vor.u32 1.1754944e-38, %v595_v36  ;;  %vm594_vm7 = vcmp.eq.f32.partialorder %v593_v37, 8.507059e+37 }
 0x5f5   :  { %v729_v15 = vmul.f32 %v2361_v11, %v728_v13 }
 0x5f7   :  { %v730_v17 = vadd.f32 %v2361_v11, %v729_v15 }
 0x5f8   :  { %v2363_v19 = vpop.eup %2362 }
 0x5f9   :  { %v585_v21 = vmul.f32 %v2363_v19, %v580_v5  ;;  %v583_v9 = vpop.xlane.xlu0 %582  ;;  %v734_v29 = vsel %vm733_vm0, %v2361_v11, %v730_v17  ;;  %vm590_vm4 = vweird.f32 %v2363_v19  ;;  %vm803_vm0 = vcmask 130048  }
 0x5fa   :  { %2364 = vrcp.f32 %v583_v9  ;;  %v739_v24 = vsel %vm736_vm3, %v738_v20, %v734_v29  ;;  %vm591_vm6 = vmor %vm589_vm5, %vm590_vm4  ;;  %v610_v45 = vand.u32 2147483648, %v583_v9  ;;  %vm604_vm9 = vweird.f32 %v583_v9 }
 0x5fb   :  { %v740_v25 = vmul.f32 %v2872_v18, %v739_v24  ;;  %v586_v26 = vsub.f32 1.0, %v585_v21  ;;  %v608_v47 = vand.u32 2147483647, %v583_v9  ;;  %vm806_vm3 = vcmask 195584  }
 0x5fc   :  { %v611_v51 = vor.u32 1.1754944e-38, %v610_v45 }
 0x5fd   :  { %2198 = vmatmul.msk.f32.gmra.mxu1 %vm309_vm11, %v740_v25  ;;  %v587_v30 = vmul.f32 %v2363_v19, %v586_v26  ;;  %vm609_vm15 = vcmp.eq.f32.partialorder %v608_v47, 8.507059e+37  ;;  %v909_v25 = vld [vmem:[%s3439_s12 + $0x18] sm:$0xff]  ;;  %v908_v26 = vld [vmem:[%s3439_s12 + $0x10] sm:$0xff] }
 0x5ff   :  { %v588_v32 = vadd.f32 %v2363_v19, %v587_v30  ;;  %v906_v30 = vld [vmem:[%s3439_s12] sm:$0xff] }
 0x600   :  { %v2365_v27 = vpop.eup %2364 }
 0x601   :  { %v600_v31 = vmul.f32 %v2365_v27, %v583_v9  ;;  %v592_v39 = vsel %vm591_vm6, %v2363_v19, %v588_v32  ;;  %vm605_vm8 = vweird.f32 %v2365_v27 }
 0x602   :  { %v597_v43 = vsel %vm594_vm7, %v596_v42, %v592_v39  ;;  %vm606_vm14 = vmor %vm604_vm9, %vm605_vm8 }
 0x603   :  { %v601_v35 = vsub.f32 1.0, %v600_v31  ;;  %v598_v28 = vmul.f32 %v2878_v22, %v597_v43 }
 0x605   :  { %v602_v41 = vmul.f32 %v2365_v27, %v601_v35 }
 0x607   :  { %v603_v18 = vadd.f32 %v2365_v27, %v602_v41 }
 0x609   :  { %v607_v50 = vsel %vm606_vm14, %v2365_v27, %v603_v18  ;;  %v907_v27 = vld [vmem:[%s3439_s12 + $0x8] sm:$0xff] }
 0x60a   :  { %v612_v52 = vsel %vm609_vm15, %v611_v51, %v607_v50  ;;  %v2312_v50 = vld [vmem:[%s3517_s0] ss:$0 sm:$0xff] }
 0x60b   :  { %v613_v53 = vmul.f32 %v2882_v23, %v612_v52 }
 0x60c   :  { %v617_v44 = vpop.permute.xlu0 %616 }
 0x60d   :  { %2189 = vmatpush.msk.msra.mxu3 %vm370_vm13, %v617_v44 }
 0x60f   :  { %642 = vmatpush.msra.mxu3 %v2889_v54 }
 0x610   :  { %2190 = vmatmul.msk.f32.vlgmr.msra.gmra.mxu3 %vm309_vm11, %v598_v28 }
 0x611   :  { %932 = vmatpush.msrb.mxu3 %v909_v25  ;;  %v1034_v25 = vld [vmem:[%s3441_s14 + $0x18] sm:$0xff] }
 0x613   :  { %933 = vmatpush.msrb.mxu3 %v908_v26 }
 0x615   :  { %934 = vmatpush.msrb.mxu3 %v907_v27 }
 0x617   :  { %935 = vmatpush.msrb.mxu3 %v906_v30 }
 0x618   :  { %2191 = vmatmul.msk.f32.gmra.mxu3 %vm309_vm11, %v613_v53 }
 0x64f   :  { %v517_v55 = vpop.f32.mrf.mxu1 }
 0x650   :  { %779 = vrot.lane.b32.xlu0 %v517_v55, %s3481_s6  ;;  %v2313_v55 = vld [vmem:[%s3438_s11] ss:$0 sm:$0xff] }
 0x657   :  { %v520_v56 = vpop.f32.mrf.mxu1 }
 0x658   :  { %781 = vrot.lane.b32.xlu0 %v520_v56, %s3481_s6  ;;  %s3520_s6 = smov 88  }
 0x65f   :  { %v771_v22 = vpop.f32.mrf.mxu1 }
 0x660   :  { %795 = vrot.lane.b32.xlu1 %v771_v22, %s3487_s27 }
 0x67a   :  { %v774_v54 = vpop.f32.mrf.mxu1 }
 0x67b   :  { %797 = vrot.lane.b32.xlu1 %v774_v54, %s3487_s27  ;;  %s3521_s27 = smov 64  }
 0x693   :  { %v644_v57 = vpop.f32.mrf.mxu3 }
 0x694   :  { %787 = vrot.lane.b32.xlu2 %v644_v57, %s3491_s7 }
 0x69b   :  { %v647_v23 = vpop.f32.mrf.mxu3 }
 0x69c   :  { %789 = vrot.lane.b32.xlu2 %v647_v23, %s3491_s7 }
 0x6c2   :  { %v780_v62 = vpop.permute.xlu0 %779 }
 0x6c3   :  { %v801_v63 = vsel %vm273_vm10, %v2842_v48, %v780_v62  ;;  %v2311_v48 = vld [vmem:[%s3516_s8] ss:$0 sm:$0xff]  ;;  %v1046_v62 = vld [vmem:[%s3441_s14 + $0x78] sm:$0xff] }
 0x6c4   :  { %1047 = vmatpush.msrb.mxu0 %v1046_v62 }
 0x6ca   :  { %v782_v4 = vpop.permute.xlu0 %781 }
 0x6cb   :  { %v802_v2 = vsel %vm273_vm10, %v2844_v49, %v782_v4 }
 0x6d2   :  { %v796_v1 = vpop.permute.xlu1 %795 }
 0x6ed   :  { %v798_v6 = vpop.permute.xlu1 %797 }
 0x6ee   :  { %v788_v0 = vpop.permute.xlu2 %787 }
 0x6ef   :  { %v804_v33 = vsel %vm803_vm0, %v801_v63, %v788_v0  ;;  %v1045_v63 = vld [vmem:[%s3441_s14 + $0x70] sm:$0xff]  ;;  %v1044_v0 = vld [vmem:[%s3441_s14 + $0x68] sm:$0xff] }
 0x6f0   :  { %v807_v3 = vsel %vm806_vm3, %v804_v33, %v796_v1  ;;  %1048 = vmatpush.msrb.mxu0 %v1045_v63  ;;  %v2314_v1 = vld [vmem:[%s3440_s13] ss:$0 sm:$0xff] }
 0x6f1   :  { %2199 = vmatmul.msk.f32.vlgmr.msrb.gmra.mxu2 %vm167_vm1, %v807_v3  ;;  %v1043_v33 = vld [vmem:[%s3441_s14 + $0x60] sm:$0xff]  ;;  %v1042_v3 = vld [vmem:[%s3441_s14 + $0x58] sm:$0xff] }
 0x6f2   :  { %1049 = vmatpush.msrb.mxu0 %v1044_v0 }
 0x6f4   :  { %1050 = vmatpush.msrb.mxu0 %v1043_v33 }
 0x6f6   :  { %v790_v40 = vpop.permute.xlu2 %789  ;;  %1051 = vmatpush.msrb.mxu0 %v1042_v3 }
 0x6f7   :  { %v805_v7 = vsel %vm803_vm0, %v802_v2, %v790_v40  ;;  %v1041_v40 = vld [vmem:[%s3441_s14 + $0x50] sm:$0xff] }
 0x6f8   :  { %v808_v8 = vsel %vm806_vm3, %v805_v7, %v798_v6  ;;  %1052 = vmatpush.msrb.mxu0 %v1041_v40  ;;  %v1040_v7 = vld [vmem:[%s3441_s14 + $0x48] sm:$0xff] }
 0x6f9   :  { %2200 = vmatmul.msk.f32.gmra.mxu2 %vm167_vm1, %v808_v8 }
 0x6fa   :  { %1053 = vmatpush.msrb.mxu0 %v1040_v7 }
 0x774   :  { %v836_v10 = vpop.f32.mrf.mxu2 }
 0x775   :  { %v842_v11 = vadd.f32 %v836_v10, %v2718_v34 }
 0x777   :  { %v2938_v12 = vadd.f32 %v2311_v48, %v842_v11  ;;  %v1038_v11 = vld [vmem:[%s3441_s14 + $0x38] sm:$0xff] }
 0x779   :  { %v852_v49 = vsel %vm167_vm1, %v2938_v12, 0.0 }
 0x77a   :  { %853 = vadd.xlane.f32.xlu0 %v852_v49 }
 0x77c   :  { %v839_v5 = vpop.f32.mrf.mxu2 }
 0x77d   :  { %v843_v13 = vadd.f32 %v839_v5, %v2722_v38 }
 0x77f   :  { %v2943_v14 = vadd.f32 %v2311_v48, %v843_v13  ;;  %v1039_v48 = vld [vmem:[%s3441_s14 + $0x40] sm:$0xff] }
 0x780   :  { %1054 = vmatpush.msrb.mxu0 %v1039_v48 }
 0x781   :  { %v855_v15 = vsel %vm171_vm2, %v2943_v14, 0.0 }
 0x782   :  { %856 = vadd.xlane.f32.xlu2 %v855_v15  ;;  %1055 = vmatpush.msrb.mxu0 %v1038_v11 }
 0x7ed   :  { %v854_v16 = vpop.xlane.xlu0 %853 }
 0x7ee   :  { %v858_v17 = vmul.f32 %v854_v16, %v2726_v46  ;;  %v1037_v16 = vld [vmem:[%s3441_s14 + $0x30] sm:$0xff] }
 0x7ef   :  { %1056 = vmatpush.msrb.mxu0 %v1037_v16 }
 0x7f0   :  { %v860_v34 = vsub.f32 %v2938_v12, %v858_v17 }
 0x7f2   :  { %v862_v19 = vmul.f32 %v860_v34, %v860_v34 }
 0x7f4   :  { %v864_v20 = vsel %vm167_vm1, %v862_v19, 0.0  ;;  %v1036_v19 = vld [vmem:[%s3441_s14 + $0x28] sm:$0xff] }
 0x7f5   :  { %v857_v21 = vpop.xlane.xlu2 %856  ;;  %865 = vadd.xlane.f32.xlu1 %v864_v20  ;;  %1057 = vmatpush.msrb.mxu0 %v1036_v19 }
 0x7f6   :  { %v859_v9 = vmul.f32 %v857_v21, %v2726_v46 }
 0x7f8   :  { %v861_v38 = vsub.f32 %v2943_v14, %v859_v9 }
 0x7fa   :  { %v863_v29 = vmul.f32 %v861_v38, %v861_v38 }
 0x7fc   :  { %v867_v24 = vsel %vm171_vm2, %v863_v29, 0.0 }
 0x7fd   :  { %868 = vadd.xlane.f32.xlu2 %v867_v24 }
 0x868   :  { %v866_v31 = vpop.xlane.xlu1 %865 }
 0x869   :  { %v870_v32 = vmul.f32 %v866_v31, %v2726_v46  ;;  %v1033_v31 = vld [vmem:[%s3441_s14 + $0x10] sm:$0xff] }
 0x86b   :  { %v872_v35 = vadd.f32 1e-06, %v870_v32 }
 0x86d   :  { %2366 = vrsqrt.f32 %v872_v35  ;;  %vm880_vm5 = vweird.f32 %v872_v35 }
 0x870   :  { %v869_v36 = vpop.xlane.xlu2 %868 }
 0x871   :  { %v871_v37 = vmul.f32 %v869_v36, %v2726_v46 }
 0x873   :  { %v2367_v39 = vpop.eup %2366  ;;  %v873_v41 = vadd.f32 1e-06, %v871_v37  ;;  %v1032_v37 = vld [vmem:[%s3441_s14 + $0x8] sm:$0xff] }
 0x874   :  { %v875_v42 = vmul.f32 %v2367_v39, %v872_v35  ;;  %vm881_vm4 = vweird.f32 %v2367_v39 }
 0x875   :  { %2368 = vrsqrt.f32 %v873_v41  ;;  %vm882_vm6 = vmor %vm880_vm5, %vm881_vm4  ;;  %vm890_vm8 = vweird.f32 %v873_v41 }
 0x876   :  { %v876_v43 = vmul.f32 %v2367_v39, %v875_v42  ;;  %v1031_v42 = vld [vmem:[%s3441_s14] sm:$0xff] }
 0x878   :  { %v877_v44 = vmul.f32 0.5, %v876_v43 }
 0x87a   :  { %v878_v18 = vsub.f32 1.5, %v877_v44 }
 0x87b   :  { %v2369_v45 = vpop.eup %2368 }
 0x87c   :  { %v879_v28 = vmul.f32 %v2367_v39, %v878_v18  ;;  %v885_v47 = vmul.f32 %v2369_v45, %v873_v41  ;;  %vm891_vm7 = vweird.f32 %v2369_v45 }
 0x87d   :  { %vm892_vm9 = vmor %vm890_vm8, %vm891_vm7 }
 0x87e   :  { %v883_v51 = vsel %vm882_vm6, %v2367_v39, %v879_v28  ;;  %v886_v52 = vmul.f32 %v2369_v45, %v885_v47 }
 0x87f   :  { %v894_v53 = vmul.f32 %v883_v51, %v860_v34 }
 0x880   :  { %v887_v56 = vmul.f32 0.5, %v886_v52 }
 0x881   :  { %v899_v22 = vmul.f32 %v2312_v50, %v894_v53 }
 0x882   :  { %v888_v54 = vsub.f32 1.5, %v887_v56 }
 0x883   :  { %v904_v57 = vadd.f32 %v2313_v55, %v899_v22 }
 0x884   :  { %v889_v23 = vmul.f32 %v2369_v45, %v888_v54 }
 0x885   :  { %2201 = vmatmul.msk.f32.vlgmr.msrb.gmra.mxu3 %vm167_vm1, %v904_v57 }
 0x886   :  { %v893_v58 = vsel %vm892_vm9, %v2369_v45, %v889_v23 }
 0x887   :  { %v895_v59 = vmul.f32 %v893_v58, %v861_v38  ;;  %v1035_v38 = vld [vmem:[%s3441_s14 + $0x20] sm:$0xff] }
 0x888   :  { %1058 = vmatpush.msrb.mxu0 %v1035_v38 }
 0x889   :  { %v900_v60 = vmul.f32 %v2312_v50, %v895_v59 }
 0x88a   :  { %1059 = vmatpush.msrb.mxu0 %v1034_v25 }
 0x88b   :  { %v905_v61 = vadd.f32 %v2313_v55, %v900_v60 }
 0x88c   :  { %1060 = vmatpush.msrb.mxu0 %v1033_v31 }
 0x88d   :  { %2202 = vmatmul.msk.f32.gmra.mxu3 %vm167_vm1, %v905_v61 }
 0x88e   :  { %1061 = vmatpush.msrb.mxu0 %v1032_v37 }
 0x890   :  { %1062 = vmatpush.msrb.mxu0 %v1031_v42 }
 0x908   :  { %v937_v4 = vpop.f32.mrf.mxu3 }
 0x909   :  { %v2993_v2 = vadd.f32 %v2314_v1, %v937_v4 }
 0x90b   :  { %v2999_v6 = vmul.f32 0.70710677, %v2993_v2  ;;  %v943_v25 = vmul.f32 0.5, %v2993_v2  ;;  %v2315_v2 = vld [vmem:[%s3442_s15] ss:$0 sm:$0xff] }
 0x90d   :  { %v947_v8 = vmul.f32 %v2999_v6, %v2999_v6 }
 0x90f   :  { %v948_v10 = vmin.f32 %v947_v8, 16.0 }
 0x910   :  { %v940_v49 = vpop.f32.mrf.mxu3 }
 0x911   :  { %v949_v5 = vmul.f32 2.1237322e-06, %v948_v10  ;;  %v960_v13 = vmul.f32 3.8918573e-05, %v948_v10  ;;  %v3012_v15 = vadd.f32 %v2314_v1, %v940_v49 }
 0x913   :  { %v950_v17 = vadd.f32 0.00028619796, %v949_v5  ;;  %v961_v34 = vadd.f32 0.001143296, %v960_v13  ;;  %v3021_v20 = vmul.f32 0.70710677, %v3012_v15 }
 0x915   :  { %v951_v21 = vmul.f32 %v950_v17, %v948_v10  ;;  %v962_v9 = vmul.f32 %v961_v34, %v948_v10  ;;  %v987_v29 = vmul.f32 %v3021_v20, %v3021_v20 }
 0x917   :  { %v963_v24 = vadd.f32 0.014752088, %v962_v9  ;;  %v952_v26 = vadd.f32 0.0036580483, %v951_v21  ;;  %v988_v27 = vmin.f32 %v987_v29, 16.0 }
 0x919   :  { %v964_v30 = vmul.f32 %v963_v24, %v948_v10  ;;  %v989_v32 = vmul.f32 2.1237322e-06, %v988_v27  ;;  %v1000_v35 = vmul.f32 3.8918573e-05, %v988_v27  ;;  %v953_v39 = vmul.f32 %v952_v26, %v948_v10 }
 0x91b   :  { %v965_v36 = vadd.f32 0.112945676, %v964_v30  ;;  %v990_v41 = vadd.f32 0.00028619796, %v989_v32  ;;  %v1001_v43 = vadd.f32 0.001143296, %v1000_v35 }
 0x91c   :  { %v954_v47 = vadd.f32 0.05243302, %v953_v39  ;;  %v944_v39 = vmul.f32 0.5, %v3012_v15 }
 0x91d   :  { %v966_v44 = vmul.f32 %v965_v36, %v948_v10  ;;  %v991_v18 = vmul.f32 %v990_v41, %v988_v27  ;;  %v1002_v45 = vmul.f32 %v1001_v43, %v988_v27 }
 0x91e   :  { %v955_v56 = vmul.f32 %v954_v47, %v948_v10 }
 0x91f   :  { %v967_v28 = vadd.f32 0.4994258, %v966_v44  ;;  %v1003_v50 = vadd.f32 0.014752088, %v1002_v45  ;;  %v992_v52 = vadd.f32 0.0036580483, %v991_v18 }
 0x920   :  { %v956_v23 = vadd.f32 0.18741608, %v955_v56 }
 0x921   :  { %v968_v51 = vmul.f32 %v967_v28, %v948_v10  ;;  %v1004_v53 = vmul.f32 %v1003_v50, %v988_v27  ;;  %v993_v54 = vmul.f32 %v992_v52, %v988_v27 }
 0x922   :  { %v957_v62 = vmul.f32 %v956_v23, %v948_v10  ;;  %v2209_v23 = vld [vmem:[%s3510_s9 + $0x30] sm:$0xff] }
 0x923   :  { %v969_v55 = vadd.f32 1.0, %v968_v51  ;;  %v1005_v22 = vadd.f32 0.112945676, %v1004_v53  ;;  %v994_v59 = vadd.f32 0.05243302, %v993_v54 }
 0x924   :  { %v958_v4 = vadd.f32 1.1283791, %v957_v62 }
 0x925   :  { %2370 = vrcp.f32 %v969_v55  ;;  %v1006_v57 = vmul.f32 %v1005_v22, %v988_v27  ;;  %v995_v1 = vmul.f32 %v994_v59, %v988_v27  ;;  %v981_v3 = vand.u32 2147483648, %v969_v55  ;;  %v2207_v59 = vld [vmem:[%s3510_s9 + $0x20] sm:$0xff] }
 0x926   :  { %v979_v7 = vand.u32 2147483647, %v969_v55  ;;  %vm975_vm15 = vweird.f32 %v969_v55  ;;  %v959_v5 = vmul.f32 %v958_v4, %v2999_v6 }
 0x927   :  { %v1007_v58 = vadd.f32 0.4994258, %v1006_v57  ;;  %v996_v8 = vadd.f32 0.18741608, %v995_v1  ;;  %v982_v11 = vor.u32 1.1754944e-38, %v981_v3  ;;  %v2210_v57 = vld [vmem:[%s3510_s9 + $0x38] sm:$0xff] }
 0x928   :  { %vm980_vm5 = vcmp.eq.f32.partialorder %v979_v7, 8.507059e+37  ;;  %1164 = vmatpush.msrb.mxu1 %v2210_v57 }
 0x929   :  { %v1008_v60 = vmul.f32 %v1007_v58, %v988_v27  ;;  %v997_v16 = vmul.f32 %v996_v8, %v988_v27  ;;  %v2208_v58 = vld [vmem:[%s3510_s9 + $0x28] sm:$0xff] }
 0x92a   :  { %1165 = vmatpush.msrb.mxu1 %v2209_v23 }
 0x92b   :  { %v2371_v61 = vpop.eup %2370  ;;  %v1009_v0 = vadd.f32 1.0, %v1008_v60  ;;  %v998_v38 = vadd.f32 1.1283791, %v997_v16  ;;  %v2317_v16 = vld [vmem:[%s3512_s29 + $0x1] ss:$0 sm:$0xff]  ;;  %s3518_s29 = smov 96  }
 0x92c   :  { %v971_v63 = vmul.f32 %v2371_v61, %v969_v55  ;;  %vm976_vm14 = vweird.f32 %v2371_v61  ;;  %1166 = vmatpush.msrb.mxu1 %v2208_v58 }
 0x92d   :  { %2372 = vrcp.f32 %v1009_v0  ;;  %vm977_vm4 = vmor %vm975_vm15, %vm976_vm14  ;;  %v1021_v9 = vand.u32 2147483648, %v1009_v0  ;;  %v1019_v24 = vand.u32 2147483647, %v1009_v0  ;;  %vm1015_vm7 = vweird.f32 %v1009_v0 }
 0x92e   :  { %v972_v33 = vsub.f32 1.0, %v971_v63  ;;  %v999_v32 = vmul.f32 %v998_v38, %v3021_v20  ;;  %1167 = vmatpush.msrb.mxu1 %v2207_v59 }
 0x92f   :  { %v1022_v6 = vor.u32 1.1754944e-38, %v1021_v9  ;;  %vm1020_vm9 = vcmp.eq.f32.partialorder %v1019_v24, 8.507059e+37 }
 0x930   :  { %v973_v40 = vmul.f32 %v2371_v61, %v972_v33 }
 0x932   :  { %v974_v48 = vadd.f32 %v2371_v61, %v973_v40 }
 0x933   :  { %v2373_v49 = vpop.eup %2372 }
 0x934   :  { %v978_v13 = vsel %vm977_vm4, %v2371_v61, %v974_v48  ;;  %v1011_v17 = vmul.f32 %v2373_v49, %v1009_v0  ;;  %vm1016_vm6 = vweird.f32 %v2373_v49 }
 0x935   :  { %v983_v10 = vsel %vm980_vm5, %v982_v11, %v978_v13  ;;  %vm1017_vm8 = vmor %vm1015_vm7, %vm1016_vm6  ;;  %v2316_v11 = vld [vmem:[%s3511_s28 + $0x1] ss:$0 sm:$0xff]  ;;  %s3527_s28 = smov 48  }
 0x936   :  { %v984_v34 = vmul.f32 %v983_v10, %v959_v5  ;;  %v1012_v19 = vsub.f32 1.0, %v1011_v17 }
 0x938   :  { %v2203_v21 = vclamps-f32 %v984_v34, 1.0  ;;  %v1013_v29 = vmul.f32 %v2373_v49, %v1012_v19 }
 0x93a   :  { %v1027_v26 = vadd.f32 1.0, %v2203_v21  ;;  %v1014_v30 = vadd.f32 %v2373_v49, %v1013_v29 }
 0x93c   :  { %v1029_v31 = vmul.f32 %v1027_v26, %v943_v25  ;;  %v1018_v27 = vsel %vm1017_vm8, %v2373_v49, %v1014_v30  ;;  %v2318_v26 = vld [vmem:[%s3513_s30 + $0x1] ss:$0 sm:$0xff]  ;;  %s3522_s30 = smov 80  }
 0x93d   :  { %v1023_v35 = vsel %vm1020_vm9, %v1022_v6, %v1018_v27 }
 0x93e   :  { %1063 = vmatmul.f32.vlgmr.msrb.gmra.mxu0 %v1029_v31  ;;  %v1024_v36 = vmul.f32 %v1023_v35, %v999_v32 }
 0x940   :  { %v2204_v37 = vclamps-f32 %v1024_v36, 1.0 }
 0x942   :  { %v1028_v41 = vadd.f32 1.0, %v2204_v37 }
 0x944   :  { %v1030_v42 = vmul.f32 %v1028_v41, %v944_v39 }
 0x946   :  { %1066 = vmatmul.f32.gmra.mxu0 %v1030_v42 }
 0x9bb   :  { %v1064_v43 = vpop.f32.mrf.mxu0 }
 0x9bc   :  { %v1070_v44 = vadd.f32 %v1064_v43, %v2938_v12 }
 0x9be   :  { %v3048_v18 = vadd.f32 %v2315_v2, %v1070_v44 }
 0x9c0   :  { %v1082_v20 = vsel %vm167_vm1, %v3048_v18, 0.0 }
 0x9c1   :  { %1083 = vadd.xlane.f32.xlu0 %v1082_v20 }
 0x9c3   :  { %v1067_v45 = vpop.f32.mrf.mxu0 }
 0x9c4   :  { %v1071_v28 = vadd.f32 %v1067_v45, %v2943_v14 }
 0x9c6   :  { %v3053_v15 = vadd.f32 %v2315_v2, %v1071_v28  ;;  %v3130_v28 = vld [vmem:[%s3514_s1] sm:$0xff] }
 0x9c8   :  { %v1085_v47 = vsel %vm171_vm2, %v3053_v15, 0.0 }
 0x9c9   :  { %1086 = vadd.xlane.f32.xlu1 %v1085_v47 }
 0xa34   :  { %v1084_v50 = vpop.xlane.xlu0 %1083 }
 0xa35   :  { %v1088_v51 = vmul.f32 %v1084_v50, %v2726_v46 }
 0xa37   :  { %v1090_v12 = vsub.f32 %v3048_v18, %v1088_v51 }
 0xa39   :  { %v1092_v52 = vmul.f32 %v1090_v12, %v1090_v12 }
 0xa3b   :  { %v1094_v53 = vsel %vm167_vm1, %v1092_v52, 0.0 }
 0xa3c   :  { %1095 = vadd.xlane.f32.xlu2 %v1094_v53  ;;  %v1087_v55 = vpop.xlane.xlu1 %1086 }
 0xa3d   :  { %v1089_v56 = vmul.f32 %v1087_v55, %v2726_v46 }
 0xa3f   :  { %v1091_v14 = vsub.f32 %v3053_v15, %v1089_v56 }
 0xa41   :  { %v1093_v22 = vmul.f32 %v1091_v14, %v1091_v14 }
 0xa43   :  { %v1097_v54 = vsel %vm171_vm2, %v1093_v22, 0.0 }
 0xa44   :  { %1098 = vadd.xlane.f32.xlu0 %v1097_v54 }
 0xaaf   :  { %v1096_v60 = vpop.xlane.xlu2 %1095 }
 0xab0   :  { %v1100_v61 = vmul.f32 %v1096_v60, %v2726_v46 }
 0xab2   :  { %v1102_v62 = vadd.f32 1e-06, %v1100_v61 }
 0xab4   :  { %2374 = vrsqrt.f32 %v1102_v62  ;;  %vm1110_vm15 = vweird.f32 %v1102_v62 }
 0xab7   :  { %v1099_v63 = vpop.xlane.xlu0 %1098 }
 0xab8   :  { %v1101_v0 = vmul.f32 %v1099_v63, %v2726_v46 }
 0xaba   :  { %v2375_v1 = vpop.eup %2374  ;;  %v1103_v3 = vadd.f32 1e-06, %v1101_v0 }
 0xabb   :  { %v1105_v33 = vmul.f32 %v2375_v1, %v1102_v62  ;;  %vm1111_vm14 = vweird.f32 %v2375_v1 }
 0xabc   :  { %2376 = vrsqrt.f32 %v1103_v3  ;;  %vm1112_vm4 = vmor %vm1110_vm15, %vm1111_vm14  ;;  %vm1120_vm6 = vweird.f32 %v1103_v3 }
 0xabd   :  { %v1106_v4 = vmul.f32 %v2375_v1, %v1105_v33 }
 0xabf   :  { %v1107_v40 = vmul.f32 0.5, %v1106_v4 }
 0xac1   :  { %v1108_v7 = vsub.f32 1.5, %v1107_v40 }
 0xac2   :  { %v2377_v8 = vpop.eup %2376 }
 0xac3   :  { %v1109_v48 = vmul.f32 %v2375_v1, %v1108_v7  ;;  %v1115_v49 = vmul.f32 %v2377_v8, %v1103_v3  ;;  %vm1121_vm5 = vweird.f32 %v2377_v8 }
 0xac4   :  { %vm1122_vm7 = vmor %vm1120_vm6, %vm1121_vm5 }
 0xac5   :  { %v1113_v5 = vsel %vm1112_vm4, %v2375_v1, %v1109_v48  ;;  %v1116_v10 = vmul.f32 %v2377_v8, %v1115_v49 }
 0xac6   :  { %v1124_v13 = vmul.f32 %v1113_v5, %v1090_v12 }
 0xac7   :  { %v1117_v34 = vmul.f32 0.5, %v1116_v10 }
 0xac8   :  { %v1129_v17 = vmul.f32 %v2316_v11, %v1124_v13 }
 0xac9   :  { %v1118_v19 = vsub.f32 1.5, %v1117_v34 }
 0xaca   :  { %v1134_v21 = vadd.f32 %v2317_v16, %v1129_v17 }
 0xacb   :  { %v1119_v9 = vmul.f32 %v2377_v8, %v1118_v19 }
 0xacc   :  { %2212 = vmatmul.msk.f32.vlgmr.msrb.gmra.mxu1 %vm167_vm1, %v1134_v21 }
 0xacd   :  { %v1123_v38 = vsel %vm1122_vm7, %v2377_v8, %v1119_v9 }
 0xace   :  { %v1125_v29 = vmul.f32 %v1123_v38, %v1091_v14  ;;  %v3139_v14 = vld [vmem:[%s3514_s1 + $0x8] sm:$0x3]  ;;  %s3525_s1 = smov 104  }
 0xad0   :  { %v1130_v24 = vmul.f32 %v2316_v11, %v1125_v29 }
 0xad2   :  { %v1135_v25 = vadd.f32 %v2317_v16, %v1130_v24 }
 0xad4   :  { %2213 = vmatmul.msk.f32.gmra.mxu1 %vm167_vm1, %v1135_v25 }
 0xb49   :  { %v1169_v30 = vpop.f32.mrf.mxu1 }
 0xb4a   :  { %v3088_v31 = vadd.f32 %v2318_v26, %v1169_v30 }
 0xb4c   :  { %1177 = vrot.lane.b32.xlu2 %v3088_v31, %s3518_s29  ;;  %1300 = vrot.lane.b32.xlu0 %v3088_v31, %s3519_s10 }
 0xb51   :  { %v1172_v6 = vpop.f32.mrf.mxu1 }
 0xb52   :  { %v3094_v32 = vadd.f32 %v2318_v26, %v1172_v6 }
 0xb54   :  { %1304 = vrot.lane.b32.xlu2 %v3088_v31, %s3520_s6  ;;  %1266 = vrot.lane.b32.xlu0 %v3094_v32, %s3521_s27 }
 0xb55   :  { %1179 = vrot.lane.b32.xlu1 %v3094_v32, %s3518_s29  ;;  %s3529_s29 = smov 8  }
 0xb5c   :  { %1264 = vrot.lane.b32.xlu2 %v3088_v31, %s3521_s27  ;;  %1433 = vrot.lane.b32.xlu0 %v3094_v32, %s3522_s30 }
 0xb64   :  { %1306 = vrot.lane.b32.xlu2 %v3094_v32, %s3520_s6  ;;  %s3531_s6 = smov 16  }
 0xb6c   :  { %1302 = vrot.lane.b32.xlu2 %v3094_v32, %s3519_s10  ;;  %s3530_s10 = smov 24  }
 0xb74   :  { %1560 = vrot.lane.b32.xlu2 %v3094_v32, %s3523_s2 }
 0xb7c   :  { %1427 = vrot.lane.b32.xlu2 %v3088_v31, %s3524_s3 }
 0xba6   :  { %v1178_v27 = vpop.permute.xlu2 %1177 }
 0xbae   :  { %v1305_v35 = vpop.permute.xlu2 %1304 }
 0xbb6   :  { %v1265_v36 = vpop.permute.xlu2 %1264 }
 0xbbe   :  { %v1307_v37 = vpop.permute.xlu2 %1306  ;;  %v1301_v39 = vpop.permute.xlu0 %1300 }
 0xbbf   :  { %2221 = vmatpush.xpose.msk.msra.mxu1 %vm273_vm10, %v1307_v37 }
 0xbc3   :  { %2222 = vmatpush.xpose.msk.msra.mxu1 %vm273_vm10, %v1305_v35 }
 0xbc6   :  { %v1303_v41 = vpop.permute.xlu2 %1302  ;;  %2223 = vmatmul.msk.f32.vlgmr.msra.gmra.mxu1 %vm273_vm10, %v1301_v39  ;;  %v1267_v2 = vpop.permute.xlu0 %1266 }
 0xbc7   :  { %v1180_v42 = vpop.permute.xlu1 %1179  ;;  %2218 = vmatpush.msk.msra.mxu3 %vm370_vm13, %v1267_v2 }
 0xbc8   :  { %2214 = vmatpush.xpose.msk.msra.mxu2 %vm273_vm10, %v1180_v42 }
 0xbc9   :  { %1292 = vmatpush.msra.mxu3 %v1265_v36 }
 0xbcc   :  { %2215 = vmatpush.xpose.msk.msra.mxu2 %vm273_vm10, %v1178_v27 }
 0xbce   :  { %v1561_v43 = vpop.permute.xlu2 %1560  ;;  %2224 = vmatmul.msk.f32.gmra.mxu1 %vm273_vm10, %v1303_v41  ;;  %v1434_v44 = vpop.permute.xlu0 %1433 }
 0xbcf   :  { %2216 = vmatmul.msk.f32.vlgmr.msra.gmra.mxu2 %vm273_vm10, %v3088_v31  ;;  %2235 = vmatpush.xpose.msk.msrb.mxu1 %vm273_vm10, %v1561_v43 }
 0xbd0   :  { %2228 = vmatpush.xpose.msk.msrb.mxu3 %vm273_vm10, %v1434_v44 }
 0xbd6   :  { %v1428_v3 = vpop.permute.xlu2 %1427 }
 0xbd7   :  { %2217 = vmatmul.msk.f32.gmra.mxu2 %vm273_vm10, %v3094_v32 }
 0xc43   :  { %v1333_v20 = vpop.f32.mrf.mxu1 }
 0xc44   :  { %v1339_v45 = vmul.f32 0.35355338, %v1333_v20 }
 0xc46   :  { %v1341_v47 = vadd.f32 %v3130_v28, %v1339_v45 }
 0xc48   :  { %v1343_v50 = vsel %vm309_vm11, %v1341_v47, -inf }
 0xc49   :  { %1344 = vmax.xlane.f32.xlu2 %v1343_v50 }
 0xc4b   :  { %v1336_v40 = vpop.f32.mrf.mxu1 }
 0xc4c   :  { %v1340_v8 = vmul.f32 0.35355338, %v1336_v40 }
 0xc4e   :  { %v1342_v11 = vadd.f32 %v3139_v14, %v1340_v8 }
 0xc50   :  { %v1346_v49 = vsel %vm313_vm12, %v1342_v11, -inf }
 0xc52   :  { %v1206_v51 = vpop.f32.mrf.mxu2 }
 0xc53   :  { %v1212_v12 = vmul.f32 0.35355338, %v1206_v51 }
 0xc55   :  { %v1214_v52 = vadd.f32 %v3130_v28, %v1212_v12 }
 0xc57   :  { %v1216_v53 = vsel %vm309_vm11, %v1214_v52, -inf }
 0xc58   :  { %1217 = vmax.xlane.f32.xlu0 %v1216_v53 }
 0xc5a   :  { %v1209_v55 = vpop.f32.mrf.mxu2 }
 0xc5b   :  { %v1213_v56 = vmul.f32 0.35355338, %v1209_v55 }
 0xc5d   :  { %v1215_v22 = vadd.f32 %v3139_v14, %v1213_v56 }
 0xc5f   :  { %v1219_v54 = vsel %vm313_vm12, %v1215_v22, -inf }
 0xc60   :  { %1220 = vmax.xlane.f32.xlu0 %v1219_v54 }
 0xc74   :  { %1431 = vrot.lane.b32.xlu0 %v3088_v31, %s3522_s30 }
 0xcbc   :  { %v1345_v4 = vpop.xlane.xlu2 %1344 }
 0xcbd   :  { %v1349_v7 = vsub.f32 %v1341_v47, %v1345_v4 }
 0xcbf   :  { %v1351_v48 = vmul.f32 1.442695, %v1349_v7 }
 0xccb   :  { %v1218_v57 = vpop.xlane.xlu0 %1217 }
 0xccc   :  { %v1222_v23 = vsub.f32 %v1214_v52, %v1218_v57 }
 0xcce   :  { %v1224_v58 = vmul.f32 1.442695, %v1222_v23 }
 0xcd0   :  { %2378 = vpow2.f32 %v1224_v58 }
 0xcd3   :  { %v1221_v59 = vpop.xlane.xlu0 %1220 }
 0xcd4   :  { %v1223_v60 = vsub.f32 %v1215_v22, %v1221_v59 }
 0xcd6   :  { %v2379_v61 = vpop.eup %2378  ;;  %v1226_v62 = vmul.f32 1.442695, %v1223_v60 }
 0xcd7   :  { %v1228_v63 = vsel %vm309_vm11, %v2379_v61, 0.0 }
 0xcd8   :  { %2380 = vpow2.f32 %v1226_v62  ;;  %1229 = vadd.xlane.f32.xlu0 %v1228_v63 }
 0xcd9   :  { %2382 = vpow2.f32 %v1351_v48 }
 0xcde   :  { %v2381_v0 = vpop.eup %2380 }
 0xcdf   :  { %v1231_v1 = vsel %vm313_vm12, %v2381_v0, 0.0  ;;  %v3154_v5 = vpop.eup %2382 }
 0xce0   :  { %1232 = vadd.xlane.f32.xlu1 %v1231_v1  ;;  %v1355_v13 = vsel %vm309_vm11, %v3154_v5, 0.0 }
 0xce6   :  { %v1432_v33 = vpop.permute.xlu0 %1431 }
 0xce7   :  { %2229 = vmatpush.xpose.msk.msrb.mxu3 %vm273_vm10, %v1432_v33 }
 0xcec   :  { %1554 = vrot.lane.b32.xlu0 %v3088_v31, %s3525_s1 }
 0xcf9   :  { %1558 = vrot.lane.b32.xlu1 %v3088_v31, %s3523_s2 }
 0xd16   :  { %1347 = vmax.xlane.f32.xlu0 %v1346_v49 }
 0xd1e   :  { %1356 = vadd.xlane.f32.xlu0 %v1355_v13 }
 0xd4b   :  { %v1230_v10 = vpop.xlane.xlu0 %1229 }
 0xd4c   :  { %2384 = vrcp.f32 %v1230_v10  ;;  %v1245_v21 = vand.u32 2147483648, %v1230_v10  ;;  %v1243_v38 = vand.u32 2147483647, %v1230_v10  ;;  %vm1239_vm9 = vweird.f32 %v1230_v10 }
 0xd4e   :  { %v1246_v25 = vor.u32 1.1754944e-38, %v1245_v21  ;;  %vm1244_vm15 = vcmp.eq.f32.partialorder %v1243_v38, 8.507059e+37 }
 0xd52   :  { %v2385_v16 = vpop.eup %2384 }
 0xd53   :  { %v1235_v17 = vmul.f32 %v2385_v16, %v1230_v10  ;;  %v1233_v34 = vpop.xlane.xlu1 %1232  ;;  %vm1240_vm8 = vweird.f32 %v2385_v16 }
 0xd54   :  { %2386 = vrcp.f32 %v1233_v34  ;;  %vm1241_vm14 = vmor %vm1239_vm9, %vm1240_vm8  ;;  %v1260_v36 = vand.u32 2147483648, %v1233_v34  ;;  %v1258_v39 = vand.u32 2147483647, %v1233_v34  ;;  %vm1254_vm5 = vweird.f32 %v1233_v34 }
 0xd55   :  { %v1236_v19 = vsub.f32 1.0, %v1235_v17 }
 0xd56   :  { %v1261_v42 = vor.u32 1.1754944e-38, %v1260_v36  ;;  %vm1259_vm7 = vcmp.eq.f32.partialorder %v1258_v39, 8.507059e+37 }
 0xd57   :  { %v1237_v9 = vmul.f32 %v2385_v16, %v1236_v19 }
 0xd59   :  { %v1238_v29 = vadd.f32 %v2385_v16, %v1237_v9 }
 0xd5a   :  { %v2387_v24 = vpop.eup %2386 }
 0xd5b   :  { %v1242_v26 = vsel %vm1241_vm14, %v2385_v16, %v1238_v29  ;;  %v1250_v30 = vmul.f32 %v2387_v24, %v1233_v34  ;;  %vm1255_vm4 = vweird.f32 %v2387_v24 }
 0xd5c   :  { %v1247_v6 = vsel %vm1244_vm15, %v1246_v25, %v1242_v26  ;;  %vm1256_vm6 = vmor %vm1254_vm5, %vm1255_vm4 }
 0xd5d   :  { %v1251_v27 = vsub.f32 1.0, %v1250_v30  ;;  %v1248_v35 = vmul.f32 %v2379_v61, %v1247_v6 }
 0xd5e   :  { %v1555_v45 = vpop.permute.xlu0 %1554 }
 0xd5f   :  { %v1252_v37 = vmul.f32 %v2387_v24, %v1251_v27  ;;  %2219 = vmatmul.msk.f32.vlgmr.msra.gmra.mxu3 %vm309_vm11, %v1248_v35 }
 0xd61   :  { %v1253_v41 = vadd.f32 %v2387_v24, %v1252_v37 }
 0xd63   :  { %v1257_v2 = vsel %vm1256_vm6, %v2387_v24, %v1253_v41 }
 0xd64   :  { %v1262_v43 = vsel %vm1259_vm7, %v1261_v42, %v1257_v2 }
 0xd65   :  { %v1263_v44 = vmul.f32 %v2381_v0, %v1262_v43 }
 0xd67   :  { %2220 = vmatmul.msk.f32.gmra.mxu3 %vm309_vm11, %v1263_v44 }
 0xd6b   :  { %v1559_v20 = vpop.permute.xlu1 %1558 }
 0xd6c   :  { %2236 = vmatpush.xpose.msk.msrb.mxu1 %vm273_vm10, %v1559_v20 }
 0xd6f   :  { %2230 = vmatmul.msk.f32.vlgmr.msrb.gmra.mxu3 %vm273_vm10, %v1428_v3  ;;  %2237 = vmatmul.msk.f32.vlgmr.msrb.gmra.mxu1 %vm273_vm10, %v1555_v45 }
 0xd89   :  { %v1348_v51 = vpop.xlane.xlu0 %1347 }
 0xd8a   :  { %v1350_v53 = vsub.f32 %v1342_v11, %v1348_v51 }
 0xd8c   :  { %v1353_v22 = vmul.f32 1.442695, %v1350_v53 }
 0xd8e   :  { %2388 = vpow2.f32 %v1353_v22 }
 0xd94   :  { %v2389_v59 = vpop.eup %2388 }
 0xd95   :  { %v1358_v60 = vsel %vm313_vm12, %v2389_v59, 0.0 }
 0xde2   :  { %v3163_v47 = vpop.f32.mrf.mxu3 }
 0xdea   :  { %v3165_v50 = vpop.f32.mrf.mxu3 }
 0xdec   :  { %v1587_v12 = vpop.f32.mrf.mxu1 }
 0xded   :  { %v1593_v52 = vmul.f32 0.35355338, %v1587_v12 }
 0xdef   :  { %v1595_v55 = vadd.f32 %v3130_v28, %v1593_v52 }
 0xdf1   :  { %v1597_v56 = vsel %vm309_vm11, %v1595_v55, -inf }
 0xdf2   :  { %v1460_v54 = vpop.f32.mrf.mxu3  ;;  %1598 = vmax.xlane.f32.xlu1 %v1597_v56 }
 0xdf3   :  { %v1466_v57 = vmul.f32 0.35355338, %v1460_v54 }
 0xdf5   :  { %v3170_v23 = vadd.f32 %v3130_v28, %v1466_v57  ;;  %v1357_v28 = vpop.xlane.xlu0 %1356 }
 0xdf6   :  { %2390 = vrcp.f32 %v1357_v28  ;;  %v1372_v48 = vand.u32 2147483648, %v1357_v28  ;;  %vm1366_vm9 = vweird.f32 %v1357_v28  ;;  %v1370_v11 = vand.u32 2147483647, %v1357_v28 }
 0xdf7   :  { %v1470_v58 = vsel %vm309_vm11, %v3170_v23, -inf }
 0xdf8   :  { %1471 = vmax.xlane.f32.xlu2 %v1470_v58  ;;  %v1373_v10 = vor.u32 1.1754944e-38, %v1372_v48  ;;  %vm1371_vm15 = vcmp.eq.f32.partialorder %v1370_v11, 8.507059e+37 }
 0xdfc   :  { %v2391_v62 = vpop.eup %2390 }
 0xdfd   :  { %v1362_v1 = vmul.f32 %v2391_v62, %v1357_v28  ;;  %vm1367_vm8 = vweird.f32 %v2391_v62 }
 0xdfe   :  { %vm1368_vm14 = vmor %vm1366_vm9, %vm1367_vm8 }
 0xdff   :  { %v1363_v3 = vsub.f32 1.0, %v1362_v1 }
 0xe00   :  { %1359 = vadd.xlane.f32.xlu2 %v1358_v60 }
 0xe01   :  { %v1364_v40 = vmul.f32 %v2391_v62, %v1363_v3 }
 0xe0b   :  { %1393 = vrot.lane.b32.xlu1 %v3094_v32, %s3526_s26 }
 0xe13   :  { %1520 = vrot.lane.b32.xlu1 %v3094_v32, %s3527_s28 }
 0xe18   :  { %1391 = vrot.lane.b32.xlu2 %v3088_v31, %s3526_s26 }
 0xe1b   :  { %1429 = vrot.lane.b32.xlu1 %v3094_v32, %s3524_s3 }
 0xe20   :  { %1645 = vrot.lane.b32.xlu2 %v3088_v31, %s3528_s5 }
 0xe28   :  { %1518 = vrot.lane.b32.xlu2 %v3088_v31, %s3527_s28  ;;  %v1365_v31 = vadd.f32 %v2391_v62, %v1364_v40 }
 0xe2a   :  { %v1369_v49 = vsel %vm1368_vm14, %v2391_v62, %v1365_v31 }
 0xe2b   :  { %v1374_v34 = vsel %vm1371_vm15, %v1373_v10, %v1369_v49  ;;  %v2244_v10 = vld [vmem:[%s3515_s4 + $0x30] sm:$0xff] }
 0xe2c   :  { %v1375_v29 = vmul.f32 %v3154_v5, %v1374_v34 }
 0xe65   :  { %v1599_v61 = vpop.xlane.xlu1 %1598 }
 0xe66   :  { %v1603_v63 = vsub.f32 %v1595_v55, %v1599_v61 }
 0xe68   :  { %v1605_v0 = vmul.f32 1.442695, %v1603_v63 }
 0xe6a   :  { %2392 = vpow2.f32 %v1605_v0 }
 0xe6b   :  { %v1472_v33 = vpop.xlane.xlu2 %1471 }
 0xe6c   :  { %v1476_v39 = vsub.f32 %v3170_v23, %v1472_v33 }
 0xe6e   :  { %v1478_v41 = vmul.f32 1.442695, %v1476_v39 }
 0xe70   :  { %v3187_v4 = vpop.eup %2392 }
 0xe71   :  { %v1609_v7 = vsel %vm309_vm11, %v3187_v4, 0.0 }
 0xe72   :  { %1610 = vadd.xlane.f32.xlu0 %v1609_v7 }
 0xe73   :  { %v1360_v8 = vpop.xlane.xlu2 %1359 }
 0xe74   :  { %2394 = vrcp.f32 %v1360_v8  ;;  %v1387_v9 = vand.u32 2147483648, %v1360_v8  ;;  %v1385_v24 = vand.u32 2147483647, %v1360_v8  ;;  %vm1381_vm5 = vweird.f32 %v1360_v8 }
 0xe75   :  { %2396 = vpow2.f32 %v1478_v41 }
 0xe76   :  { %v1388_v26 = vor.u32 1.1754944e-38, %v1387_v9  ;;  %vm1386_vm7 = vcmp.eq.f32.partialorder %v1385_v24, 8.507059e+37  ;;  %v2242_v9 = vld [vmem:[%s3515_s4 + $0x20] sm:$0xff] }
 0xe7a   :  { %v2395_v13 = vpop.eup %2394 }
 0xe7b   :  { %v1377_v16 = vmul.f32 %v2395_v13, %v1360_v8  ;;  %v1392_v17 = vpop.permute.xlu2 %1391  ;;  %vm1382_vm4 = vweird.f32 %v2395_v13  ;;  %v2397_v42 = vpop.eup %2396 }
 0xe7c   :  { %vm1383_vm6 = vmor %vm1381_vm5, %vm1382_vm4  ;;  %v1482_v2 = vsel %vm309_vm11, %v2397_v42, 0.0 }
 0xe7d   :  { %v1378_v19 = vsub.f32 1.0, %v1377_v16  ;;  %v1394_v21 = vpop.permute.xlu1 %1393 }
 0xe7e   :  { %2225 = vmatpush.msk.msrb.mxu2 %vm370_vm13, %v1394_v21 }
 0xe7f   :  { %v1379_v38 = vmul.f32 %v2395_v13, %v1378_v19 }
 0xe80   :  { %1419 = vmatpush.msrb.mxu2 %v1392_v17  ;;  %v2243_v17 = vld [vmem:[%s3515_s4 + $0x28] sm:$0xff] }
 0xe81   :  { %2226 = vmatmul.msk.f32.vlgmr.msrb.gmra.mxu2 %vm309_vm11, %v1375_v29  ;;  %v1380_v25 = vadd.f32 %v2395_v13, %v1379_v38 }
 0xe83   :  { %v1646_v30 = vpop.permute.xlu2 %1645  ;;  %v1384_v6 = vsel %vm1383_vm6, %v2395_v13, %v1380_v25  ;;  %v2245_v13 = vld [vmem:[%s3515_s4 + $0x38] sm:$0xff] }
 0xe84   :  { %v1389_v27 = vsel %vm1386_vm7, %v1388_v26, %v1384_v6  ;;  %1734 = vmatpush.msra.mxu3 %v2245_v13  ;;  %v2253_v13 = vld [vmem:[%s3439_s12 + $0x30] sm:$0xff] }
 0xe85   :  { %v1521_v35 = vpop.permute.xlu1 %1520  ;;  %v1390_v5 = vmul.f32 %v2389_v59, %v1389_v27 }
 0xe86   :  { %1647 = vrot.lane.b32.xlu0 %v3094_v32, %s3528_s5  ;;  %2232 = vmatpush.msk.msra.mxu0 %vm370_vm13, %v1521_v35 }
 0xe87   :  { %1735 = vmatpush.msra.mxu3 %v2244_v10  ;;  %v2252_v10 = vld [vmem:[%s3439_s12 + $0x28] sm:$0xff] }
 0xe89   :  { %2227 = vmatmul.msk.f32.gmra.mxu2 %vm309_vm11, %v1390_v5  ;;  %1736 = vmatpush.msra.mxu3 %v2243_v17 }
 0xe8b   :  { %v1519_v36 = vpop.permute.xlu2 %1518  ;;  %1737 = vmatpush.msra.mxu3 %v2242_v9 }
 0xe8c   :  { %1546 = vmatpush.msra.mxu0 %v1519_v36 }
 0xe8d   :  { %v1430_v37 = vpop.permute.xlu1 %1429 }
 0xe8e   :  { %2231 = vmatmul.msk.f32.gmra.mxu3 %vm273_vm10, %v1430_v37 }
 0xeb0   :  { %1483 = vadd.xlane.f32.xlu0 %v1482_v2 }
 0xec4   :  { %1556 = vrot.lane.b32.xlu0 %v3094_v32, %s3525_s1 }
 0xee5   :  { %v1611_v43 = vpop.xlane.xlu0 %1610 }
 0xee6   :  { %2398 = vrcp.f32 %v1611_v43  ;;  %v1626_v12 = vand.u32 2147483648, %v1611_v43  ;;  %v1624_v52 = vand.u32 2147483647, %v1611_v43  ;;  %vm1620_vm9 = vweird.f32 %v1611_v43 }
 0xee8   :  { %v1627_v56 = vor.u32 1.1754944e-38, %v1626_v12  ;;  %vm1625_vm15 = vcmp.eq.f32.partialorder %v1624_v52, 8.507059e+37 }
 0xeec   :  { %v2399_v44 = vpop.eup %2398 }
 0xeed   :  { %v1616_v20 = vmul.f32 %v2399_v44, %v1611_v43  ;;  %vm1621_vm8 = vweird.f32 %v2399_v44 }
 0xeee   :  { %vm1622_vm14 = vmor %vm1620_vm9, %vm1621_vm8 }
 0xeef   :  { %v1617_v45 = vsub.f32 1.0, %v1616_v20 }
 0xef1   :  { %v1618_v51 = vmul.f32 %v2399_v44, %v1617_v45 }
 0xef3   :  { %v1619_v53 = vadd.f32 %v2399_v44, %v1618_v51 }
 0xef5   :  { %v1623_v55 = vsel %vm1622_vm14, %v2399_v44, %v1619_v53 }
 0xef6   :  { %v1628_v22 = vsel %vm1625_vm15, %v1627_v56, %v1623_v55 }
 0xef7   :  { %v1629_v32 = vmul.f32 %v3187_v4, %v1628_v22 }
 0xef8   :  { %v1648_v54 = vpop.permute.xlu0 %1647 }
 0xef9   :  { %2239 = vmatpush.msk.msra.mxu2 %vm370_vm13, %v1648_v54 }
 0xefb   :  { %1673 = vmatpush.msra.mxu2 %v1646_v30 }
 0xefc   :  { %2240 = vmatmul.msk.f32.vlgmr.msra.gmra.mxu2 %vm309_vm11, %v1629_v32 }
 0xf04   :  { %v1421_v57 = vpop.f32.mrf.mxu2 }
 0xf05   :  { %1683 = vrot.lane.b32.xlu2 %v1421_v57, %s3529_s29 }
 0xf0c   :  { %v1424_v40 = vpop.f32.mrf.mxu2 }
 0xf11   :  { %v1463_v16 = vpop.f32.mrf.mxu3 }
 0xf12   :  { %v1467_v34 = vmul.f32 0.35355338, %v1463_v16  ;;  %v2251_v16 = vld [vmem:[%s3439_s12 + $0x20] sm:$0xff] }
 0xf14   :  { %v1469_v19 = vadd.f32 %v3139_v14, %v1467_v34 }
 0xf16   :  { %v1473_v21 = vsel %vm313_vm12, %v1469_v19, -inf }
 0xf23   :  { %v1484_v23 = vpop.xlane.xlu0 %1483 }
 0xf24   :  { %2400 = vrcp.f32 %v1484_v23  ;;  %v1499_v28 = vand.u32 2147483648, %v1484_v23  ;;  %v1497_v62 = vand.u32 2147483647, %v1484_v23  ;;  %vm1493_vm5 = vweird.f32 %v1484_v23 }
 0xf26   :  { %v1500_v0 = vor.u32 1.1754944e-38, %v1499_v28  ;;  %vm1498_vm7 = vcmp.eq.f32.partialorder %v1497_v62, 8.507059e+37 }
 0xf2a   :  { %v2401_v58 = vpop.eup %2400 }
 0xf2b   :  { %v1489_v59 = vmul.f32 %v2401_v58, %v1484_v23  ;;  %vm1494_vm4 = vweird.f32 %v2401_v58 }
 0xf2c   :  { %vm1495_vm6 = vmor %vm1493_vm5, %vm1494_vm4 }
 0xf2d   :  { %v1490_v60 = vsub.f32 1.0, %v1489_v59 }
 0xf2f   :  { %v1491_v61 = vmul.f32 %v2401_v58, %v1490_v60 }
 0xf31   :  { %v1492_v63 = vadd.f32 %v2401_v58, %v1491_v61 }
 0xf33   :  { %v1496_v1 = vsel %vm1495_vm6, %v2401_v58, %v1492_v63 }
 0xf34   :  { %v1501_v33 = vsel %vm1498_vm7, %v1500_v0, %v1496_v1 }
 0xf35   :  { %v1502_v3 = vmul.f32 %v2397_v42, %v1501_v33  ;;  %v3238_v42 = vld [vmem:[%s3516_s8 + $0x1] ss:$0 sm:$0xff] }
 0xf36   :  { %v1557_v4 = vpop.permute.xlu0 %1556 }
 0xf37   :  { %2233 = vmatmul.msk.f32.vlgmr.msra.gmra.mxu0 %vm309_vm11, %v1502_v3  ;;  %2238 = vmatmul.msk.f32.gmra.mxu1 %vm273_vm10, %v1557_v4 }
 0xf5f   :  { %v1684_v38 = vpop.permute.xlu2 %1683 }
 0xf60   :  { %v1705_v29 = vsel %vm273_vm10, %v3163_v47, %v1684_v38 }
 0xf7f   :  { %v1675_v7 = vpop.f32.mrf.mxu2 }
 0xf80   :  { %1699 = vrot.lane.b32.xlu0 %v1675_v7, %s3530_s10 }
 0xfb4   :  { %v1548_v8 = vpop.f32.mrf.mxu0  ;;  %v1590_v31 = vpop.f32.mrf.mxu1 }
 0xfb5   :  { %v1594_v48 = vmul.f32 0.35355338, %v1590_v31  ;;  %1691 = vrot.lane.b32.xlu1 %v1548_v8, %s3531_s6 }
 0xfb7   :  { %v1596_v11 = vadd.f32 %v3139_v14, %v1594_v48 }
 0xfb9   :  { %v1600_v49 = vsel %vm313_vm12, %v1596_v11, -inf }
 0xfba   :  { %1601 = vmax.xlane.f32.xlu2 %v1600_v49  ;;  %v2254_v49 = vld [vmem:[%s3439_s12 + $0x38] sm:$0xff]  ;;  %s3532_s12 = sld [smem:[#allocation19_spill]] }
 0xfbb   :  { %1840 = vmatpush.msrb.mxu0 %v2254_v49 }
 0xfbd   :  { %1841 = vmatpush.msrb.mxu0 %v2253_v13 }
 0xfbf   :  { %1842 = vmatpush.msrb.mxu0 %v2252_v10 }
 0xfc1   :  { %1843 = vmatpush.msrb.mxu0 %v2251_v16 }
 0xfdf   :  { %1474 = vmax.xlane.f32.xlu1 %v1473_v21 }
 0xff2   :  { %v1700_v25 = vpop.permute.xlu0 %1699 }
0x1027   :  { %v1692_v24 = vpop.permute.xlu1 %1691 }
0x1028   :  { %v1707_v26 = vsel %vm803_vm0, %v1705_v29, %v1692_v24 }
0x1029   :  { %v1709_v30 = vsel %vm806_vm3, %v1707_v26, %v1700_v25  ;;  %v3269_v26 = vld [vmem:[%s3517_s0 + $0x1] ss:$0 sm:$0xff] }
0x102a   :  { %2246 = vmatmul.msk.f32.vlgmr.msra.gmra.mxu3 %vm167_vm1, %v1709_v30 }
0x102d   :  { %v1602_v14 = vpop.xlane.xlu2 %1601 }
0x102e   :  { %v1604_v6 = vsub.f32 %v1596_v11, %v1602_v14 }
0x1030   :  { %v1607_v27 = vmul.f32 1.442695, %v1604_v6  ;;  %v3274_v6 = vld [vmem:[%s3438_s11 + $0x1] ss:$0 sm:$0xff]  ;;  %s3533_s11 = sld [smem:[#allocation21_spill]] }
0x1032   :  { %2402 = vpow2.f32 %v1607_v27 }
0x1038   :  { %v2403_v35 = vpop.eup %2402 }
0x1039   :  { %v1612_v5 = vsel %vm313_vm12, %v2403_v35, 0.0 }
0x103a   :  { %1613 = vadd.xlane.f32.xlu0 %v1612_v5 }
0x1052   :  { %v1475_v36 = vpop.xlane.xlu1 %1474 }
0x1053   :  { %v1477_v37 = vsub.f32 %v1469_v19, %v1475_v36 }
0x1055   :  { %v1480_v39 = vmul.f32 1.442695, %v1477_v37 }
0x1057   :  { %2404 = vpow2.f32 %v1480_v39 }
0x105d   :  { %v2405_v47 = vpop.eup %2404 }
0x105e   :  { %v1485_v41 = vsel %vm313_vm12, %v2405_v47, 0.0 }
0x105f   :  { %1486 = vadd.xlane.f32.xlu2 %v1485_v41 }
0x1077   :  { %1685 = vrot.lane.b32.xlu2 %v1424_v40, %s3529_s29 }
0x10ad   :  { %v1739_v2 = vpop.f32.mrf.mxu3  ;;  %v1614_v43 = vpop.xlane.xlu0 %1613 }
0x10ae   :  { %v1745_v44 = vadd.f32 %v1739_v2, %v3048_v18  ;;  %2406 = vrcp.f32 %v1614_v43  ;;  %v1641_v53 = vand.u32 2147483648, %v1614_v43  ;;  %v1639_v56 = vand.u32 2147483647, %v1614_v43  ;;  %v2275_v2 = vld [vmem:[%s3441_s14 + $0xf8] sm:$0xff] }
0x10af   :  { %vm1635_vm9 = vweird.f32 %v1614_v43  ;;  %1956 = vmatpush.msra.mxu1 %v2275_v2 }
0x10b0   :  { %v3242_v20 = vadd.f32 %v3238_v42, %v1745_v44  ;;  %v1642_v54 = vor.u32 1.1754944e-38, %v1641_v53  ;;  %vm1640_vm15 = vcmp.eq.f32.partialorder %v1639_v56, 8.507059e+37  ;;  %v3296_v44 = vld [vmem:[%s3440_s13 + $0x1] ss:$0 sm:$0xff]  ;;  %v2270_v53 = vld [vmem:[%s3441_s14 + $0xd0] sm:$0xff]  ;;  %v2269_v56 = vld [vmem:[%s3441_s14 + $0xc8] sm:$0xff] }
0x10b1   :  { %s2490_s13 = smov [#allocation4]  }
0x10b2   :  { %v1758_v45 = vsel %vm167_vm1, %v3242_v20, 0.0  ;;  %s2143_s30 = sshll.u32 %s2490_s13, 4  ;;  %s2144_s30 = int_to_ptr.vmem [resolvable:$true] %s2143_s30 }
0x10b3   :  { %1759 = vadd.xlane.f32.xlu1 %v1758_v45  ;;  %v2272_v45 = vld [vmem:[%s3441_s14 + $0xe0] sm:$0xff] }
0x10b4   :  { %v2407_v51 = vpop.eup %2406 }
0x10b5   :  { %v1631_v12 = vmul.f32 %v2407_v51, %v1614_v43  ;;  %vm1636_vm8 = vweird.f32 %v2407_v51  ;;  %v2274_v43 = vld [vmem:[%s3441_s14 + $0xf0] sm:$0xff] }
0x10b6   :  { %vm1637_vm14 = vmor %vm1635_vm9, %vm1636_vm8  ;;  %1957 = vmatpush.msra.mxu1 %v2274_v43 }
0x10b7   :  { %v1632_v52 = vsub.f32 1.0, %v1631_v12 }
0x10b9   :  { %v1633_v55 = vmul.f32 %v2407_v51, %v1632_v52 }
0x10bb   :  { %v1634_v22 = vadd.f32 %v2407_v51, %v1633_v55 }
0x10bd   :  { %v1638_v18 = vsel %vm1637_vm14, %v2407_v51, %v1634_v22  ;;  %v2271_v51 = vld [vmem:[%s3441_s14 + $0xd8] sm:$0xff] }
0x10be   :  { %v1643_v32 = vsel %vm1640_vm15, %v1642_v54, %v1638_v18  ;;  %v2268_v54 = vld [vmem:[%s3441_s14 + $0xc0] sm:$0xff]  ;;  %vm1988_vm15 = vcmask 1040384  }
0x10bf   :  { %v1644_v57 = vmul.f32 %v2403_v35, %v1643_v32  ;;  %v2267_v32 = vld [vmem:[%s3441_s14 + $0xb8] sm:$0xff] }
0x10c1   :  { %2241 = vmatmul.msk.f32.gmra.mxu2 %vm309_vm11, %v1644_v57 }
0x10d2   :  { %v1487_v23 = vpop.xlane.xlu2 %1486 }
0x10d3   :  { %2408 = vrcp.f32 %v1487_v23  ;;  %v1514_v28 = vand.u32 2147483648, %v1487_v23  ;;  %v1512_v62 = vand.u32 2147483647, %v1487_v23  ;;  %vm1508_vm5 = vweird.f32 %v1487_v23 }
0x10d5   :  { %v1515_v0 = vor.u32 1.1754944e-38, %v1514_v28  ;;  %vm1513_vm7 = vcmp.eq.f32.partialorder %v1512_v62, 8.507059e+37  ;;  %v2265_v28 = vld [vmem:[%s3441_s14 + $0xa8] sm:$0xff] }
0x10d9   :  { %v2409_v58 = vpop.eup %2408 }
0x10da   :  { %v1504_v59 = vmul.f32 %v2409_v58, %v1487_v23  ;;  %vm1509_vm4 = vweird.f32 %v2409_v58  ;;  %v1686_v5 = vpop.permute.xlu2 %1685 }
0x10db   :  { %vm1510_vm6 = vmor %vm1508_vm5, %vm1509_vm4  ;;  %v1706_v36 = vsel %vm273_vm10, %v3165_v50, %v1686_v5  ;;  %v2273_v50 = vld [vmem:[%s3441_s14 + $0xe8] sm:$0xff] }
0x10dc   :  { %v1505_v60 = vsub.f32 1.0, %v1504_v59  ;;  %1958 = vmatpush.msra.mxu1 %v2273_v50 }
0x10de   :  { %v1506_v61 = vmul.f32 %v2409_v58, %v1505_v60  ;;  %1959 = vmatpush.msra.mxu1 %v2272_v45 }
0x10e0   :  { %v1507_v63 = vadd.f32 %v2409_v58, %v1506_v61  ;;  %1960 = vmatpush.msra.mxu1 %v2271_v51 }
0x10e2   :  { %v1511_v1 = vsel %vm1510_vm6, %v2409_v58, %v1507_v63  ;;  %1961 = vmatpush.msra.mxu1 %v2270_v53  ;;  %v2266_v58 = vld [vmem:[%s3441_s14 + $0xb0] sm:$0xff]  ;;  %v2264_v63 = vld [vmem:[%s3441_s14 + $0xa0] sm:$0xff] }
0x10e3   :  { %v1516_v33 = vsel %vm1513_vm7, %v1515_v0, %v1511_v1  ;;  %v2263_v1 = vld [vmem:[%s3441_s14 + $0x98] sm:$0xff] }
0x10e4   :  { %v1517_v3 = vmul.f32 %v2405_v47, %v1516_v33  ;;  %1962 = vmatpush.msra.mxu1 %v2269_v56 }
0x10e6   :  { %2234 = vmatmul.msk.f32.gmra.mxu0 %vm309_vm11, %v1517_v3  ;;  %1963 = vmatpush.msra.mxu1 %v2268_v54 }
0x10e8   :  { %1964 = vmatpush.msra.mxu1 %v2267_v32 }
0x10ea   :  { %1965 = vmatpush.msra.mxu1 %v2266_v58 }
0x10ec   :  { %1966 = vmatpush.msra.mxu1 %v2265_v28 }
0x10ee   :  { %1967 = vmatpush.msra.mxu1 %v2264_v63 }
0x10f0   :  { %1968 = vmatpush.msra.mxu1 %v2263_v1 }
0x1126   :  { %v1760_v4 = vpop.xlane.xlu1 %1759 }
0x1127   :  { %v1764_v40 = vmul.f32 %v1760_v4, %v2726_v46  ;;  %v2262_v4 = vld [vmem:[%s3441_s14 + $0x90] sm:$0xff] }
0x1128   :  { %1969 = vmatpush.msra.mxu1 %v2262_v4 }
0x1129   :  { %v1766_v7 = vsub.f32 %v3242_v20, %v1764_v40 }
0x112b   :  { %v1768_v8 = vmul.f32 %v1766_v7, %v1766_v7 }
0x112d   :  { %v1770_v31 = vsel %vm167_vm1, %v1768_v8, 0.0 }
0x112e   :  { %1771 = vadd.xlane.f32.xlu0 %v1770_v31  ;;  %v2260_v31 = vld [vmem:[%s3441_s14 + $0x80] sm:$0xff] }
0x1144   :  { %v1678_v48 = vpop.f32.mrf.mxu2 }
0x1145   :  { %1701 = vrot.lane.b32.xlu0 %v1678_v48, %s3530_s10 }
0x1163   :  { %v1551_v11 = vpop.f32.mrf.mxu0 }
0x1164   :  { %1693 = vrot.lane.b32.xlu1 %v1551_v11, %s3531_s6  ;;  %s2145_s6 = sshll.u32 %s3451_s24, 4  ;;  %s2146_s6 = int_to_ptr.hbm [resolvable:$true] %s2145_s6 }
0x11a1   :  { %v1772_v17 = vpop.xlane.xlu0 %1771 }
0x11a2   :  { %v1776_v34 = vmul.f32 %v1772_v17, %v2726_v46 }
0x11a4   :  { %v1778_v19 = vadd.f32 1e-06, %v1776_v34 }
0x11a6   :  { %2410 = vrsqrt.f32 %v1778_v19  ;;  %vm1786_vm8 = vweird.f32 %v1778_v19 }
0x11ac   :  { %v2411_v21 = vpop.eup %2410 }
0x11ad   :  { %v1781_v9 = vmul.f32 %v2411_v21, %v1778_v19  ;;  %vm1787_vm11 = vweird.f32 %v2411_v21 }
0x11ae   :  { %vm1788_vm9 = vmor %vm1786_vm8, %vm1787_vm11 }
0x11af   :  { %v1782_v38 = vmul.f32 %v2411_v21, %v1781_v9 }
0x11b1   :  { %v1783_v29 = vmul.f32 0.5, %v1782_v38 }
0x11b3   :  { %v1784_v24 = vsub.f32 1.5, %v1783_v29 }
0x11b5   :  { %v1785_v25 = vmul.f32 %v2411_v21, %v1784_v24 }
0x11b7   :  { %v1789_v30 = vsel %vm1788_vm9, %v2411_v21, %v1785_v25  ;;  %v1702_v39 = vpop.permute.xlu0 %1701 }
0x11b8   :  { %v1800_v14 = vmul.f32 %v1789_v30, %v1766_v7  ;;  %v2261_v7 = vld [vmem:[%s3441_s14 + $0x88] sm:$0xff]  ;;  %s2134_s14 = sshll.u32 %s3450_s23, 4  ;;  %s2135_s14 = int_to_ptr.hbm [resolvable:$true] %s2134_s14 }
0x11b9   :  { %1970 = vmatpush.msra.mxu1 %v2261_v7 }
0x11ba   :  { %v1805_v27 = vmul.f32 %v3269_v26, %v1800_v14 }
0x11bb   :  { %1971 = vmatpush.msra.mxu1 %v2260_v31  ;;  %v2026_v31 = vld [vmem:[%s3445_s18 + $0x18] sm:$0xff] }
0x11bc   :  { %v1810_v35 = vadd.f32 %v3274_v6, %v1805_v27  ;;  %2046 = vmatpush.msrb.mxu2 %v2026_v31 }
0x11be   :  { %2256 = vmatmul.msk.f32.vlgmr.msrb.gmra.mxu0 %vm167_vm1, %v1810_v35 }
0x11d6   :  { %v1694_v37 = vpop.permute.xlu1 %1693 }
0x11d7   :  { %v1708_v47 = vsel %vm803_vm0, %v1706_v36, %v1694_v37 }
0x11d8   :  { %v1710_v41 = vsel %vm806_vm3, %v1708_v47, %v1702_v39 }
0x11d9   :  { %2247 = vmatmul.msk.f32.gmra.mxu3 %vm167_vm1, %v1710_v41 }
0x123b   :  { %v1845_v12 = vpop.f32.mrf.mxu0 }
0x123c   :  { %v3305_v52 = vadd.f32 %v3296_v44, %v1845_v12 }
0x123e   :  { %v1853_v55 = vmul.f32 0.70710677, %v3305_v52 }
0x1240   :  { %v1855_v22 = vmul.f32 %v1853_v55, %v1853_v55 }
0x1242   :  { %v1856_v18 = vmin.f32 %v1855_v22, 16.0 }
0x1244   :  { %v1857_v57 = vmul.f32 2.1237322e-06, %v1856_v18  ;;  %v1868_v23 = vmul.f32 3.8918573e-05, %v1856_v18 }
0x1246   :  { %v1858_v59 = vadd.f32 0.00028619796, %v1857_v57  ;;  %v1869_v60 = vadd.f32 0.001143296, %v1868_v23 }
0x1248   :  { %v1859_v61 = vmul.f32 %v1858_v59, %v1856_v18  ;;  %v1870_v62 = vmul.f32 %v1869_v60, %v1856_v18 }
0x124a   :  { %v1871_v0 = vadd.f32 0.014752088, %v1870_v62  ;;  %v1860_v33 = vadd.f32 0.0036580483, %v1859_v61 }
0x124c   :  { %v1872_v3 = vmul.f32 %v1871_v0, %v1856_v18  ;;  %v1861_v8 = vmul.f32 %v1860_v33, %v1856_v18 }
0x124e   :  { %v1873_v40 = vadd.f32 0.112945676, %v1872_v3  ;;  %v1862_v49 = vadd.f32 0.05243302, %v1861_v8 }
0x1250   :  { %v1874_v48 = vmul.f32 %v1873_v40, %v1856_v18  ;;  %v1863_v16 = vmul.f32 %v1862_v49, %v1856_v18  ;;  %v2096_v49 = vld [vmem:[%s3447_s20 + $0x10] sm:$0xff] }
0x1252   :  { %v1875_v11 = vadd.f32 0.4994258, %v1874_v48  ;;  %v1864_v17 = vadd.f32 0.18741608, %v1863_v16  ;;  %v2023_v48 = vld [vmem:[%s3445_s18] sm:$0xff]  ;;  %v2095_v16 = vld [vmem:[%s3447_s20 + $0x8] sm:$0xff] }
0x1254   :  { %v1876_v13 = vmul.f32 %v1875_v11, %v1856_v18  ;;  %v1865_v9 = vmul.f32 %v1864_v17, %v1856_v18  ;;  %v2097_v11 = vld [vmem:[%s3447_s20 + $0x18] sm:$0xff]  ;;  %v2094_v17 = vld [vmem:[%s3447_s20] sm:$0xff] }
0x1255   :  { %2117 = vmatpush.msrb.mxu3 %v2097_v11 }
0x1256   :  { %v1877_v10 = vadd.f32 1.0, %v1876_v13  ;;  %v1866_v14 = vadd.f32 1.1283791, %v1865_v9 }
0x1257   :  { %2118 = vmatpush.msrb.mxu3 %v2096_v49 }
0x1258   :  { %2412 = vrcp.f32 %v1877_v10  ;;  %v1889_v30 = vand.u32 2147483648, %v1877_v10  ;;  %v1887_v35 = vand.u32 2147483647, %v1877_v10  ;;  %vm1883_vm0 = vweird.f32 %v1877_v10 }
0x1259   :  { %v1867_v37 = vmul.f32 %v1866_v14, %v1853_v55  ;;  %v2323_v55 = vld [vmem:[%s3442_s15 + $0x1] ss:$0 sm:$0xff]  ;;  %2119 = vmatpush.msrb.mxu3 %v2095_v16 }
0x125a   :  { %v1890_v36 = vor.u32 1.1754944e-38, %v1889_v30  ;;  %vm1888_vm14 = vcmp.eq.f32.partialorder %v1887_v35, 8.507059e+37 }
0x125b   :  { %2120 = vmatpush.msrb.mxu3 %v2094_v17 }
0x125c   :  { %v1742_v34 = vpop.f32.mrf.mxu3 }
0x125d   :  { %v1746_v19 = vadd.f32 %v1742_v34, %v3053_v15 }
0x125e   :  { %v2413_v21 = vpop.eup %2412 }
0x125f   :  { %v1879_v38 = vmul.f32 %v2413_v21, %v1877_v10  ;;  %v1753_v29 = vadd.f32 %v3238_v42, %v1746_v19  ;;  %vm1884_vm10 = vweird.f32 %v2413_v21  ;;  %v1851_v42 = vmul.f32 0.5, %v3305_v52 }
0x1260   :  { %vm1885_vm3 = vmor %vm1883_vm0, %vm1884_vm10  ;;  %vm2092_vm0 = vcmask 8192  }
0x1261   :  { %v1880_v24 = vsub.f32 1.0, %v1879_v38  ;;  %v1761_v25 = vsel %vm171_vm2, %v1753_v29, 0.0 }
0x1262   :  { %1762 = vadd.xlane.f32.xlu0 %v1761_v25 }
0x1263   :  { %v1881_v27 = vmul.f32 %v2413_v21, %v1880_v24 }
0x1265   :  { %v1882_v5 = vadd.f32 %v2413_v21, %v1881_v27 }
0x1267   :  { %v1886_v15 = vsel %vm1885_vm3, %v2413_v21, %v1882_v5 }
0x1268   :  { %v1891_v39 = vsel %vm1888_vm14, %v1890_v36, %v1886_v15 }
0x1269   :  { %v1892_v47 = vmul.f32 %v1891_v39, %v1867_v37 }
0x126b   :  { %v2258_v41 = vclamps-f32 %v1892_v47, 1.0  ;;  %v2324_v47 = vld [vmem:[%s3443_s16] ss:$0 sm:$0xff]  ;;  %s2489_s16 = smov [#allocation2]  }
0x126d   :  { %v1935_v2 = vadd.f32 1.0, %v2258_v41 }
0x126f   :  { %v1937_v43 = vmul.f32 %v1935_v2, %v1851_v42 }
0x1271   :  { %1972 = vmatmul.f32.vlgmr.msra.gmra.mxu1 %v1937_v43 }
0x12d5   :  { %v1763_v50 = vpop.xlane.xlu0 %1762 }
0x12d6   :  { %v1765_v45 = vmul.f32 %v1763_v50, %v2726_v46  ;;  %v2325_v50 = vld [vmem:[%s3444_s17] ss:$0 sm:$0xff]  ;;  %s2132_s17 = sshll.u32 %s2489_s16, 4  ;;  %s2133_s17 = int_to_ptr.vmem [resolvable:$true] %s2132_s17 }
0x12d8   :  { %v1767_v51 = vsub.f32 %v1753_v29, %v1765_v45 }
0x12da   :  { %v1769_v12 = vmul.f32 %v1767_v51, %v1767_v51 }
0x12dc   :  { %v1773_v53 = vsel %vm171_vm2, %v1769_v12, 0.0 }
0x12dd   :  { %1774 = vadd.xlane.f32.xlu2 %v1773_v53 }
0x12ee   :  { %v1973_v56 = vpop.f32.mrf.mxu1 }
0x12ef   :  { %v1978_v22 = vadd.f32 %v1973_v56, %v3242_v20  ;;  %v2055_v56 = vld [vmem:[%s3449_s22] sm:$0xf] }
0x12f1   :  { %v1984_v54 = vadd.f32 %v2323_v55, %v1978_v22 }
0x12f3   :  { %v1986_v52 = vrot.slane %v1984_v54, 4 }
0x12f5   :  { %v1989_v18 = vsel %vm1988_vm15, %v1984_v54, %v1986_v52 }
0x12f6   :  { %v1992_v32 = vsel %vm171_vm2, %v1989_v18, 0.0 }
0x12f7   :  { %1993 = vadd.xlane.f32.xlu1 %v1992_v32 }
0x1350   :  { %v1775_v57 = vpop.xlane.xlu2 %1774 }
0x1351   :  { %v1777_v23 = vmul.f32 %v1775_v57, %v2726_v46 }
0x1353   :  { %v1779_v58 = vadd.f32 1e-06, %v1777_v23 }
0x1355   :  { %2414 = vrsqrt.f32 %v1779_v58  ;;  %vm1796_vm5 = vweird.f32 %v1779_v58 }
0x135b   :  { %v2415_v59 = vpop.eup %2414 }
0x135c   :  { %v1791_v60 = vmul.f32 %v2415_v59, %v1779_v58  ;;  %vm1797_vm4 = vweird.f32 %v2415_v59 }
0x135d   :  { %vm1798_vm6 = vmor %vm1796_vm5, %vm1797_vm4 }
0x135e   :  { %v1792_v28 = vmul.f32 %v2415_v59, %v1791_v60 }
0x1360   :  { %v1793_v61 = vmul.f32 0.5, %v1792_v28 }
0x1362   :  { %v1794_v62 = vsub.f32 1.5, %v1793_v61 }
0x1364   :  { %v1795_v63 = vmul.f32 %v2415_v59, %v1794_v62 }
0x1366   :  { %v1799_v20 = vsel %vm1798_vm6, %v2415_v59, %v1795_v63 }
0x1367   :  { %v1801_v0 = vmul.f32 %v1799_v20, %v1767_v51 }
0x1369   :  { %v1806_v1 = vmul.f32 %v3269_v26, %v1801_v0  ;;  %v2025_v26 = vld [vmem:[%s3445_s18 + $0x10] sm:$0xff] }
0x136a   :  { %v1994_v33 = vpop.xlane.xlu1 %1993  ;;  %2047 = vmatpush.msrb.mxu2 %v2025_v26 }
0x136b   :  { %v1995_v3 = vmul.f32 %v1994_v33, %v2726_v46  ;;  %v1811_v4 = vadd.f32 %v3274_v6, %v1806_v1  ;;  %v2024_v6 = vld [vmem:[%s3445_s18 + $0x8] sm:$0xff] }
0x136c   :  { %2048 = vmatpush.msrb.mxu2 %v2024_v6 }
0x136d   :  { %v1996_v40 = vsub.f32 %v1989_v18, %v1995_v3  ;;  %2257 = vmatmul.msk.f32.gmra.mxu0 %vm167_vm1, %v1811_v4 }
0x136e   :  { %2049 = vmatpush.msrb.mxu2 %v2023_v48 }
0x136f   :  { %v1997_v7 = vmul.f32 %v1996_v40, %v1996_v40 }
0x1371   :  { %v1998_v8 = vsel %vm171_vm2, %v1997_v7, 0.0 }
0x1372   :  { %1999 = vadd.xlane.f32.xlu0 %v1998_v8 }
0x13e5   :  { %v2000_v13 = vpop.xlane.xlu0 %1999 }
0x13e6   :  { %v2001_v10 = vmul.f32 %v2000_v13, %v2726_v46 }
0x13e8   :  { %v2002_v34 = vadd.f32 1e-06, %v2001_v10 }
0x13ea   :  { %2416 = vrsqrt.f32 %v2002_v34  ;;  %v1848_v19 = vpop.f32.mrf.mxu0  ;;  %vm2009_vm11 = vweird.f32 %v2002_v34 }
0x13eb   :  { %v3384_v21 = vadd.f32 %v3296_v44, %v1848_v19 }
0x13ed   :  { %v3387_v9 = vmul.f32 0.70710677, %v3384_v21  ;;  %v1852_v10 = vmul.f32 0.5, %v3384_v21 }
0x13ef   :  { %v1895_v46 = vmul.f32 %v3387_v9, %v3387_v9 }
0x13f0   :  { %v2417_v38 = vpop.eup %2416 }
0x13f1   :  { %v2004_v29 = vmul.f32 %v2417_v38, %v2002_v34  ;;  %v1896_v24 = vmin.f32 %v1895_v46, 16.0  ;;  %vm2010_vm7 = vweird.f32 %v2417_v38 }
0x13f2   :  { %vm2011_vm8 = vmor %vm2009_vm11, %vm2010_vm7 }
0x13f3   :  { %v2005_v25 = vmul.f32 %v2417_v38, %v2004_v29  ;;  %v1897_v30 = vmul.f32 2.1237322e-06, %v1896_v24  ;;  %v1908_v14 = vmul.f32 3.8918573e-05, %v1896_v24 }
0x13f5   :  { %v2006_v27 = vmul.f32 0.5, %v2005_v25  ;;  %v1898_v35 = vadd.f32 0.00028619796, %v1897_v30  ;;  %v1909_v5 = vadd.f32 0.001143296, %v1908_v14 }
0x13f7   :  { %v2007_v36 = vsub.f32 1.5, %v2006_v27  ;;  %v1899_v37 = vmul.f32 %v1898_v35, %v1896_v24  ;;  %v1910_v44 = vmul.f32 %v1909_v5, %v1896_v24  ;;  %v2327_v35 = vld [vmem:[%s3532_s12] ss:$0 sm:$0xff] }
0x13f9   :  { %v2008_v15 = vmul.f32 %v2417_v38, %v2007_v36  ;;  %v1911_v39 = vadd.f32 0.014752088, %v1910_v44  ;;  %v1900_v41 = vadd.f32 0.0036580483, %v1899_v37 }
0x13fb   :  { %v2012_v42 = vsel %vm2011_vm8, %v2417_v38, %v2008_v15  ;;  %v1912_v2 = vmul.f32 %v1911_v39, %v1896_v24  ;;  %v1901_v12 = vmul.f32 %v1900_v41, %v1896_v24 }
0x13fc   :  { %v2013_v43 = vmul.f32 %v2012_v42, %v1996_v40 }
0x13fd   :  { %v1913_v45 = vadd.f32 0.112945676, %v1912_v2  ;;  %v1902_v54 = vadd.f32 0.05243302, %v1901_v12 }
0x13fe   :  { %v2017_v51 = vmul.f32 %v2324_v47, %v2013_v43 }
0x13ff   :  { %v1914_v53 = vmul.f32 %v1913_v45, %v1896_v24  ;;  %v1903_v58 = vmul.f32 %v1902_v54, %v1896_v24 }
0x1400   :  { %v2021_v55 = vadd.f32 %v2325_v50, %v2017_v51 }
0x1401   :  { %v1915_v22 = vadd.f32 0.4994258, %v1914_v53  ;;  %v1904_v28 = vadd.f32 0.18741608, %v1903_v58 }
0x1402   :  { %2277 = vmatmul.msk.f32.vlgmr.msrb.gmra.mxu2 %vm167_vm1, %v2021_v55  ;;  %2022 = vst.msk [vmem:[#allocation2] sm:$0x3] %vm171_vm2, %v2021_v55  ;;  %v2056_v52 = vrot.slane %v2021_v55, 6 }
0x1403   :  { %v1916_v18 = vmul.f32 %v1915_v22, %v1896_v24  ;;  %v1905_v0 = vmul.f32 %v1904_v28, %v1896_v24  ;;  %2137 = dma.vmem_to_hbm [thread:$0]  %s2133_s17, 32, %s2135_s14, [#allocation3]  }
0x1404   :  { %v2058_v32 = vsel %vm370_vm13, %v2021_v55, %v2056_v52 }
0x1405   :  { %v2059_v57 = vsub.f32 %v2055_v56, %v2058_v32  ;;  %v1917_v23 = vadd.f32 1.0, %v1916_v18  ;;  %v1906_v40 = vadd.f32 1.1283791, %v1905_v0 }
0x1407   :  { %v2060_v59 = vadd.f32 %v2059_v57, %v2058_v32  ;;  %2418 = vrcp.f32 %v1917_v23  ;;  %v1929_v4 = vand.u32 2147483648, %v1917_v23  ;;  %v1927_v8 = vand.u32 2147483647, %v1917_v23 }
0x1408   :  { %v1907_v6 = vmul.f32 %v1906_v40, %v3387_v9  ;;  %v2326_v9 = vld [vmem:[%s3446_s19] ss:$0 sm:$0xff] }
0x1409   :  { %2278 = vmatmul.msk.f32.vlgmr.msrb.gmra.mxu3 %vm167_vm1, %v2060_v59  ;;  %v2061_v60 = vsub.f32 %v2058_v32, %v2060_v59  ;;  %vm1923_vm1 = vweird.f32 %v1917_v23  ;;  %v1930_v26 = vor.u32 1.1754944e-38, %v1929_v4  ;;  %vm1928_vm10 = vcmp.eq.f32.partialorder %v1927_v8, 8.507059e+37 }
0x140b   :  { %v2062_v61 = vmul.f32 %v2061_v60, %v2061_v60 }
0x140d   :  { %v2419_v62 = vpop.eup %2418  ;;  %v2063_v63 = vsel %vm171_vm2, %v2062_v61, 0.0  ;;  %v2076_v20 = vrot.slane %v2062_v61, 2 }
0x140e   :  { %2064 = vadd.xlane.f32.xlu2 %v2063_v63  ;;  %v1919_v1 = vmul.f32 %v2419_v62, %v1917_v23  ;;  %vm1924_vm13 = vweird.f32 %v2419_v62 }
0x140f   :  { %v2078_v33 = vsel %vm171_vm2, %v2076_v20, 0.0  ;;  %vm1925_vm9 = vmor %vm1923_vm1, %vm1924_vm13  ;;  %vm2125_vm2 = vcmask 76800  }
0x1410   :  { %2079 = vadd.xlane.f32.xlu1 %v2078_v33  ;;  %v1920_v3 = vsub.f32 1.0, %v1919_v1 }
0x1412   :  { %v1921_v7 = vmul.f32 %v2419_v62, %v1920_v3 }
0x1414   :  { %v1922_v31 = vadd.f32 %v2419_v62, %v1921_v7 }
0x1416   :  { %v1926_v48 = vsel %vm1925_vm9, %v2419_v62, %v1922_v31 }
0x1417   :  { %v1931_v11 = vsel %vm1928_vm10, %v1930_v26, %v1926_v48 }
0x1418   :  { %v1932_v49 = vmul.f32 %v1931_v11, %v1907_v6 }
0x141a   :  { %v2259_v13 = vclamps-f32 %v1932_v49, 1.0 }
0x141c   :  { %v1936_v16 = vadd.f32 1.0, %v2259_v13 }
0x141e   :  { %v1938_v17 = vmul.f32 %v1936_v16, %v1852_v10 }
0x1420   :  { %1975 = vmatmul.f32.gmra.mxu1 %v1938_v17 }
0x1481   :  { %v2065_v34 = vpop.xlane.xlu2 %2064 }
0x1482   :  { %v2066_v19 = vrot.slane %v2065_v34, 4 }
0x1483   :  { %v2080_v46 = vpop.xlane.xlu1 %2079 }
0x1484   :  { %v2067_v21 = vadd.f32 %v2066_v19, %v2065_v34  ;;  %v2081_v38 = vrot.slane %v2080_v46, 4 }
0x1485   :  { %v2051_v29 = vpop.f32.mrf.mxu2 }
0x1486   :  { %v2068_v24 = vrot.slane %v2067_v21, 2  ;;  %v2082_v25 = vadd.f32 %v2081_v38, %v2080_v46  ;;  %v2052_v30 = vadd.f32 %v2326_v9, %v2051_v29 }
0x1488   :  { %v2083_v14 = vrot.slane %v2082_v25, 2  ;;  %2054 = vst.msk [vmem:[#allocation4] sm:$0x3] %vm313_vm12, %v2052_v30  ;;  %v2069_v27 = vadd.f32 %v2068_v24, %v2067_v21  ;;  %vm2090_vm12 = vcmask 7168  }
0x1489   :  { %2148 = dma.vmem_to_hbm [thread:$0]  %s2144_s30, 32, %s2146_s6, [#allocation5]  }
0x148a   :  { %v2084_v5 = vadd.f32 %v2083_v14, %v2082_v25  ;;  %v2070_v36 = vrot.slane %v2069_v27, 1 }
0x148c   :  { %v2122_v37 = vpop.f32.mrf.mxu3  ;;  %v2071_v44 = vadd.f32 %v2070_v36, %v2069_v27  ;;  %v2085_v15 = vrot.slane %v2084_v5, 1 }
0x148d   :  { %v2123_v39 = vadd.f32 %v2327_v35, %v2122_v37 }
0x148e   :  { %2287 = vpush %v2071_v44  ;;  %v2086_v47 = vadd.f32 %v2085_v15, %v2084_v5 }
0x148f   :  { %2126 = vst.msk [vmem:[%s3533_s11] sm:$0xf] %vm2125_vm2, %v2123_v39 }
0x1490   :  { %2289 = vpush %v2086_v47 }
0x149d   :  { %v1976_v41 = vpop.f32.mrf.mxu1 }
0x14bf   :  { %s2288_s0 = spop %2287 }
0x14c0   :  { %v2073_v42 = vstv %s2288_s0 }
0x14c1   :  { %s2290_s7 = spop %2289  ;;  %v2074_v43 = vmul.f32 0.015625, %v2073_v42 }
0x14c2   :  { %v2088_v2 = vstv %s2290_s7 }
0x14c3   :  { %v2089_v50 = vmul.f32 0.015625, %v2088_v2 }
0x14c5   :  { %v2091_v45 = vsel %vm2090_vm12, %v2074_v43, %v2089_v50 }
0x14c6   :  { %2093 = vst.msk [vmem:[%s3534_s21] sm:$0x1] %vm2092_vm0, %v2091_v45 }
0x14c7   :  { %2470 = dma.done.wait [#allocation3], 32  }
0x14c8   :  { %2471 = vsyncadd [#allocation3], 4294967264 }
0x14c9   :  { %2472 = dma.done.wait [#allocation5], 32  }
0x14ca   :  { %2473 = vsyncadd [#allocation5], 4294967264 }
0x14cb   :  { %2165 = vsyncpa [#allocation3], 1 }
0x14cc   :  { %2166 = vsyncpa [#allocation5], 1 }

</bundles_post_ra>
